<compile_context>
chip_gen: v6e
topology: v6e:2x2x1
jax: 0.10.0
libtpu: 0.0.40
codegen_flags: <defaults>
</compile_context>

<pallas_src>
import functools

import jax
import jax.numpy as jnp
from jax.experimental import pallas as pl
from jax.experimental.pallas import tpu as pltpu


def _pair(v):
    if isinstance(v, (tuple, list)):
        return (int(v[0]), int(v[1]))
    return (int(v), int(v))


# -----------------------------------------------------------------------------
# Kernel
# -----------------------------------------------------------------------------
def _make_sepconv_kernel(B, Ho, Wo, kh, kw, eps):
    taps = kh * kw

    def kernel(x_ref, dw_ref, pw_ref, g_ref, b_ref, o_ref):
        # x_ref: (B, Hp, Wp, Cin) channels-last, already zero-padded spatially.
        x = jnp.maximum(x_ref[...], 0.0)          # ReLU (zero pad rows stay 0)
        cin = x.shape[-1]
        w_dw = dw_ref[...]                        # (taps, Cin), loaded once

        # Depthwise conv: per-tap per-channel multiply-accumulate on the VPU,
        # shifts expressed as static slices of the single padded input.
        acc = None
        for t in range(taps):
            dh, dwi = divmod(t, kw)
            sl = x[:, dh:dh + Ho, dwi:dwi + Wo, :]            # (B, Ho, Wo, Cin)
            term = sl * w_dw[t, :].reshape(1, 1, 1, cin)
            acc = term if acc is None else acc + term

        # Pointwise 1x1 conv: one MXU matmul over all spatial/batch positions.
        m = acc.reshape(B * Ho * Wo, cin)                      # lane dim = Cin
        y = jnp.dot(m, pw_ref[...], preferred_element_type=jnp.float32)  # (M, Cout)

        # BatchNorm2d, training-mode batch statistics (biased variance),
        # affine folded into one scale/shift per channel.
        mean = jnp.mean(y, axis=0, keepdims=True)              # (1, Cout)
        var = jnp.mean((y - mean) ** 2, axis=0, keepdims=True)
        a = g_ref[...] * jax.lax.rsqrt(var + eps)
        b = b_ref[...] - mean * a
        o_ref[...] = y * a + b

    return kernel


# -----------------------------------------------------------------------------
# Host-side wrapper
# -----------------------------------------------------------------------------
@functools.partial(jax.jit, static_argnames=("kernel_size", "stride", "padding", "eps"))
def sepconv_forward(x, params, *, kernel_size, stride, padding, eps=1e-3):
    """Forward of SepConv.  x: (B, C_in, H, W) NCHW float32.  Returns NCHW."""
    kh, kw = _pair(kernel_size)
    sh, sw = _pair(stride)
    ph, pw_ = _pair(padding)
    if sh != 1 or sw != 1:
        # TODO(synk): stride > 1 needs strided tap slices (or in-kernel
        # subsampling before the BN batch statistics); not implemented.
        raise NotImplementedError("sepconv_forward currently supports stride=1 only")

    B, C_in, H, W = x.shape
    C_out = params["pw_w"].shape[1]
    Ho = H + 2 * ph - kh + 1
    Wo = W + 2 * pw_ - kw + 1

    # Layout glue: NCHW -> channels-last, one zero pad (ReLU(0)=0 so padding
    # before the in-kernel ReLU is equivalent to relu-then-pad).
    xcl = jnp.transpose(x, (0, 2, 3, 1)).astype(jnp.float32)
    xp = jnp.pad(xcl, ((0, 0), (ph, ph), (pw_, pw_), (0, 0)))

    kernel = _make_sepconv_kernel(B, Ho, Wo, kh, kw, float(eps))
    out2d = pl.pallas_call(
        kernel,
        out_shape=jax.ShapeDtypeStruct((B * Ho * Wo, C_out), jnp.float32),
        in_specs=[pl.BlockSpec(memory_space=pltpu.MemorySpace.VMEM)] * 5,
        out_specs=pl.BlockSpec(memory_space=pltpu.MemorySpace.VMEM),
    )(xp, params["dw_w"], params["pw_w"], params["bn_g"], params["bn_b"])

    # Back to NCHW to match the PyTorch module's output layout.
    return jnp.transpose(out2d.reshape(B, Ho, Wo, C_out), (0, 3, 1, 2))


# -----------------------------------------------------------------------------
# Deterministic parameter init (PyTorch layouts, rearranged for the kernel)
# -----------------------------------------------------------------------------
def init_params(key, C_in, C_out, kernel_size, affine=True):
    kh, kw = _pair(kernel_size)
    k_dw, k_pw = jax.random.split(key)
    # PyTorch: conv1.weight (C_in, 1, kh, kw) [groups=C_in], pw.weight (C_out, C_in, 1, 1)
    dw_pt = 0.1 * jax.random.normal(k_dw, (C_in, 1, kh, kw), dtype=jnp.float32)
    pw_pt = 0.1 * jax.random.normal(k_pw, (C_out, C_in, 1, 1), dtype=jnp.float32)
    return {
        # kernel layout: (kh*kw, C_in) per-tap per-channel scales
        "dw_w": jnp.transpose(dw_pt[:, 0, :, :], (1, 2, 0)).reshape(kh * kw, C_in),
        # kernel layout: (C_in, C_out)
        "pw_w": jnp.transpose(pw_pt[:, :, 0, 0], (1, 0)),
        # BatchNorm2d fresh-init: gamma=1, beta=0 (ones even if affine=False)
        "bn_g": jnp.ones((1, C_out), jnp.float32),
        "bn_b": jnp.zeros((1, C_out), jnp.float32),
    }


# -----------------------------------------------------------------------------
# Pure-JAX reference (same semantics) for a numeric sanity check
# -----------------------------------------------------------------------------
def sepconv_reference(x, params, *, kernel_size, stride, padding, eps=1e-3):
    kh, kw = _pair(kernel_size)
    ph, pw_ = _pair(padding)
    B, C_in, H, W = x.shape
    C_out = params["pw_w"].shape[1]
    xr = jnp.maximum(x, 0.0)
    dw = jnp.transpose(params["dw_w"].reshape(kh, kw, C_in), (2, 0, 1))[:, None]   # (Cin,1,kh,kw)
    y = jax.lax.conv_general_dilated(
        xr, dw, window_strides=_pair(stride), padding=((ph, ph), (pw_, pw_)),
        dimension_numbers=("NCHW", "OIHW", "NCHW"), feature_group_count=C_in)
    pw_w = jnp.transpose(params["pw_w"], (1, 0))[:, :, None, None]                 # (Cout,Cin,1,1)
    y = jax.lax.conv_general_dilated(
        y, pw_w, window_strides=(1, 1), padding=((0, 0), (0, 0)),
        dimension_numbers=("NCHW", "OIHW", "NCHW"))
    mean = jnp.mean(y, axis=(0, 2, 3), keepdims=True)
    var = jnp.mean((y - mean) ** 2, axis=(0, 2, 3), keepdims=True)
    g = params["bn_g"].reshape(1, C_out, 1, 1)
    b = params["bn_b"].reshape(1, C_out, 1, 1)
    return (y - mean) * jax.lax.rsqrt(var + eps) * g + b


if __name__ == "__main__":
    key = jax.random.PRNGKey(0)
    kp, kx = jax.random.split(key)

    # Small shapes consistent with the module: SepConv(C_in=4, C_out=8, k=3, s=1, p=1)
    B, C_in, C_out, H, W = 2, 4, 8, 16, 16
    K, S, P = 3, 1, 1

    params = init_params(kp, C_in, C_out, K)
    x = jax.random.normal(kx, (B, C_in, H, W), dtype=jnp.float32)

    out = sepconv_forward(x, params, kernel_size=K, stride=S, padding=P)
    out = jax.block_until_ready(out)

    assert out.shape == (B, C_out, H, W)
    assert bool(jnp.all(jnp.isfinite(out)))

    ref = sepconv_reference(x, params, kernel_size=K, stride=S, padding=P)
    max_err = float(jnp.max(jnp.abs(out - ref)))
    assert max_err < 1e-3, f"mismatch vs reference: {max_err}"

    print("KERNEL_OK")
</pallas_src>

<mosaic_0001>
module attributes {stable_mosaic.version = 11 : i64} {
  func.func @kernel(%arg0: memref<2x18x18x4xf32, #tpu.memory_space<vmem>>, %arg1: memref<9x4xf32, #tpu.memory_space<vmem>>, %arg2: memref<4x8xf32, #tpu.memory_space<vmem>>, %arg3: memref<1x8xf32, #tpu.memory_space<vmem>>, %arg4: memref<1x8xf32, #tpu.memory_space<vmem>>, %arg5: memref<512x8xf32, #tpu.memory_space<vmem>>) attributes {dimension_semantics = [], scalar_prefetch = 0 : i64, scratch_operands = 0 : i64, tpu.core_type = #tpu.core_type<tc>} {
    %c0 = arith.constant 0 : index
    %c0_0 = arith.constant 0 : index
    %c0_1 = arith.constant 0 : index
    %c0_2 = arith.constant 0 : index
    %0 = vector.load %arg0[%c0, %c0_0, %c0_1, %c0_2] : memref<2x18x18x4xf32, #tpu.memory_space<vmem>>, vector<2x18x18x4xf32>
    %cst = arith.constant 0.000000e+00 : f32
    %1 = vector.broadcast %cst : f32 to vector<2x18x18x4xf32>
    %2 = arith.maximumf %0, %1 : vector<2x18x18x4xf32>
    %c0_3 = arith.constant 0 : index
    %c0_4 = arith.constant 0 : index
    %3 = vector.load %arg1[%c0_3, %c0_4] : memref<9x4xf32, #tpu.memory_space<vmem>>, vector<9x4xf32>
    %4 = vector.extract_strided_slice %2 {offsets = [0, 0, 0, 0], sizes = [2, 16, 16, 4], strides = [1, 1, 1, 1]} : vector<2x18x18x4xf32> to vector<2x16x16x4xf32>
    %5 = vector.extract_strided_slice %3 {offsets = [0, 0], sizes = [1, 4], strides = [1, 1]} : vector<9x4xf32> to vector<1x4xf32>
    %6 = vector.shape_cast %5 : vector<1x4xf32> to vector<4xf32>
    %7 = vector.shape_cast %6 : vector<4xf32> to vector<1x1x1x4xf32>
    %8 = vector.broadcast %7 : vector<1x1x1x4xf32> to vector<2x16x16x4xf32>
    %9 = arith.mulf %4, %8 : vector<2x16x16x4xf32>
    %10 = vector.extract_strided_slice %2 {offsets = [0, 0, 1, 0], sizes = [2, 16, 16, 4], strides = [1, 1, 1, 1]} : vector<2x18x18x4xf32> to vector<2x16x16x4xf32>
    %11 = vector.extract_strided_slice %3 {offsets = [1, 0], sizes = [1, 4], strides = [1, 1]} : vector<9x4xf32> to vector<1x4xf32>
    %12 = vector.shape_cast %11 : vector<1x4xf32> to vector<4xf32>
    %13 = vector.shape_cast %12 : vector<4xf32> to vector<1x1x1x4xf32>
    %14 = vector.broadcast %13 : vector<1x1x1x4xf32> to vector<2x16x16x4xf32>
    %15 = arith.mulf %10, %14 : vector<2x16x16x4xf32>
    %16 = arith.addf %9, %15 : vector<2x16x16x4xf32>
    %17 = vector.extract_strided_slice %2 {offsets = [0, 0, 2, 0], sizes = [2, 16, 16, 4], strides = [1, 1, 1, 1]} : vector<2x18x18x4xf32> to vector<2x16x16x4xf32>
    %18 = vector.extract_strided_slice %3 {offsets = [2, 0], sizes = [1, 4], strides = [1, 1]} : vector<9x4xf32> to vector<1x4xf32>
    %19 = vector.shape_cast %18 : vector<1x4xf32> to vector<4xf32>
    %20 = vector.shape_cast %19 : vector<4xf32> to vector<1x1x1x4xf32>
    %21 = vector.broadcast %20 : vector<1x1x1x4xf32> to vector<2x16x16x4xf32>
    %22 = arith.mulf %17, %21 : vector<2x16x16x4xf32>
    %23 = arith.addf %16, %22 : vector<2x16x16x4xf32>
    %24 = vector.extract_strided_slice %2 {offsets = [0, 1, 0, 0], sizes = [2, 16, 16, 4], strides = [1, 1, 1, 1]} : vector<2x18x18x4xf32> to vector<2x16x16x4xf32>
    %25 = vector.extract_strided_slice %3 {offsets = [3, 0], sizes = [1, 4], strides = [1, 1]} : vector<9x4xf32> to vector<1x4xf32>
    %26 = vector.shape_cast %25 : vector<1x4xf32> to vector<4xf32>
    %27 = vector.shape_cast %26 : vector<4xf32> to vector<1x1x1x4xf32>
    %28 = vector.broadcast %27 : vector<1x1x1x4xf32> to vector<2x16x16x4xf32>
    %29 = arith.mulf %24, %28 : vector<2x16x16x4xf32>
    %30 = arith.addf %23, %29 : vector<2x16x16x4xf32>
    %31 = vector.extract_strided_slice %2 {offsets = [0, 1, 1, 0], sizes = [2, 16, 16, 4], strides = [1, 1, 1, 1]} : vector<2x18x18x4xf32> to vector<2x16x16x4xf32>
    %32 = vector.extract_strided_slice %3 {offsets = [4, 0], sizes = [1, 4], strides = [1, 1]} : vector<9x4xf32> to vector<1x4xf32>
    %33 = vector.shape_cast %32 : vector<1x4xf32> to vector<4xf32>
    %34 = vector.shape_cast %33 : vector<4xf32> to vector<1x1x1x4xf32>
    %35 = vector.broadcast %34 : vector<1x1x1x4xf32> to vector<2x16x16x4xf32>
    %36 = arith.mulf %31, %35 : vector<2x16x16x4xf32>
    %37 = arith.addf %30, %36 : vector<2x16x16x4xf32>
    %38 = vector.extract_strided_slice %2 {offsets = [0, 1, 2, 0], sizes = [2, 16, 16, 4], strides = [1, 1, 1, 1]} : vector<2x18x18x4xf32> to vector<2x16x16x4xf32>
    %39 = vector.extract_strided_slice %3 {offsets = [5, 0], sizes = [1, 4], strides = [1, 1]} : vector<9x4xf32> to vector<1x4xf32>
    %40 = vector.shape_cast %39 : vector<1x4xf32> to vector<4xf32>
    %41 = vector.shape_cast %40 : vector<4xf32> to vector<1x1x1x4xf32>
    %42 = vector.broadcast %41 : vector<1x1x1x4xf32> to vector<2x16x16x4xf32>
    %43 = arith.mulf %38, %42 : vector<2x16x16x4xf32>
    %44 = arith.addf %37, %43 : vector<2x16x16x4xf32>
    %45 = vector.extract_strided_slice %2 {offsets = [0, 2, 0, 0], sizes = [2, 16, 16, 4], strides = [1, 1, 1, 1]} : vector<2x18x18x4xf32> to vector<2x16x16x4xf32>
    %46 = vector.extract_strided_slice %3 {offsets = [6, 0], sizes = [1, 4], strides = [1, 1]} : vector<9x4xf32> to vector<1x4xf32>
    %47 = vector.shape_cast %46 : vector<1x4xf32> to vector<4xf32>
    %48 = vector.shape_cast %47 : vector<4xf32> to vector<1x1x1x4xf32>
    %49 = vector.broadcast %48 : vector<1x1x1x4xf32> to vector<2x16x16x4xf32>
    %50 = arith.mulf %45, %49 : vector<2x16x16x4xf32>
    %51 = arith.addf %44, %50 : vector<2x16x16x4xf32>
    %52 = vector.extract_strided_slice %2 {offsets = [0, 2, 1, 0], sizes = [2, 16, 16, 4], strides = [1, 1, 1, 1]} : vector<2x18x18x4xf32> to vector<2x16x16x4xf32>
    %53 = vector.extract_strided_slice %3 {offsets = [7, 0], sizes = [1, 4], strides = [1, 1]} : vector<9x4xf32> to vector<1x4xf32>
    %54 = vector.shape_cast %53 : vector<1x4xf32> to vector<4xf32>
    %55 = vector.shape_cast %54 : vector<4xf32> to vector<1x1x1x4xf32>
    %56 = vector.broadcast %55 : vector<1x1x1x4xf32> to vector<2x16x16x4xf32>
    %57 = arith.mulf %52, %56 : vector<2x16x16x4xf32>
    %58 = arith.addf %51, %57 : vector<2x16x16x4xf32>
    %59 = vector.extract_strided_slice %2 {offsets = [0, 2, 2, 0], sizes = [2, 16, 16, 4], strides = [1, 1, 1, 1]} : vector<2x18x18x4xf32> to vector<2x16x16x4xf32>
    %60 = vector.extract_strided_slice %3 {offsets = [8, 0], sizes = [1, 4], strides = [1, 1]} : vector<9x4xf32> to vector<1x4xf32>
    %61 = vector.shape_cast %60 : vector<1x4xf32> to vector<4xf32>
    %62 = vector.shape_cast %61 : vector<4xf32> to vector<1x1x1x4xf32>
    %63 = vector.broadcast %62 : vector<1x1x1x4xf32> to vector<2x16x16x4xf32>
    %64 = arith.mulf %59, %63 : vector<2x16x16x4xf32>
    %65 = arith.addf %58, %64 : vector<2x16x16x4xf32>
    %66 = vector.shape_cast %65 : vector<2x16x16x4xf32> to vector<512x4xf32>
    %c0_5 = arith.constant 0 : index
    %c0_6 = arith.constant 0 : index
    %67 = vector.load %arg2[%c0_5, %c0_6] : memref<4x8xf32, #tpu.memory_space<vmem>>, vector<4x8xf32>
    %cst_7 = arith.constant dense<0.000000e+00> : vector<512x8xf32>
    %68 = tpu.matmul %66, %67, %cst_7 {dimension_numbers = #tpu.dot_dimension_numbers<[1], [0], [0], [1], [0, 0, 1, 1], [], []>} : vector<512x4xf32>, vector<4x8xf32>, vector<512x8xf32> -> vector<512x8xf32>
    %cst_8 = arith.constant dense<0.000000e+00> : vector<8xf32>
    %69 = vector.multi_reduction <add>, %68, %cst_8 [0] : vector<512x8xf32> to vector<8xf32>
    %70 = vector.shape_cast %69 : vector<8xf32> to vector<1x8xf32>
    %cst_9 = arith.constant 5.120000e+02 : f32
    %71 = vector.broadcast %cst_9 : f32 to vector<1x8xf32>
    %72 = arith.divf %70, %71 : vector<1x8xf32>
    %73 = vector.broadcast %72 : vector<1x8xf32> to vector<512x8xf32>
    %74 = arith.subf %68, %73 : vector<512x8xf32>
    %75 = arith.mulf %74, %74 : vector<512x8xf32>
    %cst_10 = arith.constant dense<0.000000e+00> : vector<8xf32>
    %76 = vector.multi_reduction <add>, %75, %cst_10 [0] : vector<512x8xf32> to vector<8xf32>
    %77 = vector.shape_cast %76 : vector<8xf32> to vector<1x8xf32>
    %cst_11 = arith.constant 5.120000e+02 : f32
    %78 = vector.broadcast %cst_11 : f32 to vector<1x8xf32>
    %79 = arith.divf %77, %78 : vector<1x8xf32>
    %c0_12 = arith.constant 0 : index
    %c0_13 = arith.constant 0 : index
    %80 = vector.load %arg3[%c0_12, %c0_13] : memref<1x8xf32, #tpu.memory_space<vmem>>, vector<1x8xf32>
    %cst_14 = arith.constant 1.000000e-03 : f32
    %81 = vector.broadcast %cst_14 : f32 to vector<1x8xf32>
    %82 = arith.addf %79, %81 : vector<1x8xf32>
    %83 = math.rsqrt %82 : vector<1x8xf32>
    %84 = arith.mulf %80, %83 : vector<1x8xf32>
    %c0_15 = arith.constant 0 : index
    %c0_16 = arith.constant 0 : index
    %85 = vector.load %arg4[%c0_15, %c0_16] : memref<1x8xf32, #tpu.memory_space<vmem>>, vector<1x8xf32>
    %86 = arith.mulf %72, %84 : vector<1x8xf32>
    %87 = arith.subf %85, %86 : vector<1x8xf32>
    %88 = vector.broadcast %84 : vector<1x8xf32> to vector<512x8xf32>
    %89 = arith.mulf %68, %88 : vector<512x8xf32>
    %90 = vector.broadcast %87 : vector<1x8xf32> to vector<512x8xf32>
    %91 = arith.addf %89, %90 : vector<512x8xf32>
    %c0_17 = arith.constant 0 : index
    %c0_18 = arith.constant 0 : index
    %92 = vector.load %arg5[%c0_17, %c0_18] : memref<512x8xf32, #tpu.memory_space<vmem>>, vector<512x8xf32>
    tpu.vector_store %arg5[%c0_17, %c0_18], %91 {strides = array<i32>} : memref<512x8xf32, #tpu.memory_space<vmem>>, vector<512x8xf32>,
    return
  }
}

</mosaic_0001>

<bundles_post_ra>
// kernel: sepconv_forward.1
= control target key start
LH: loop header
LB: loop body
LE: loop exit
PB: predicated region body
PF: predicated region fallthrough
CT: control target
= control target key end

     0   :  { %vm3670_vm0 = vcmask 1043456   ;;  %v238_v0 = vlaneseq  ;;  %vm502_vm1 = vcmask 1046528   ;;  %vm987_vm2 = vcmask 1045504   ;;  %s8858_s2 = inlined_call_operand.vmem [shape: f32[4,8], index: 2, kind: input, shape index: {}]   ;;  %s8859_s0 = inlined_call_operand.vmem [shape: f32[2,18,18,4], index: 0, kind: input, shape index: {}]   ;;  %s8860_s1 = inlined_call_operand.vmem [shape: f32[9,4], index: 1, kind: input, shape index: {}]   ;;  %s8861_s3 = inlined_call_operand.vmem [shape: f32[1,8], index: 3, kind: input, shape index: {}]   ;;  %s8862_s4 = inlined_call_operand.vmem [shape: f32[1,8], index: 4, kind: input, shape index: {}]   ;;  %s8863_s5 = inlined_call_operand.vmem [shape: f32[512,8], index: 5, kind: output, shape index: {}]  }
   0x1   :  { %v3476_v1 = vld [vmem:[%s8858_s2] sm:$0xf]  ;;  %v21_v3 = vld [vmem:[%s8859_s0 + $0x8] sm:$0xff]  ;;  %v23_v4 = vld [vmem:[%s8859_s0 + $0x18] sm:$0xff]  ;;  %vm3477_vm3 = vcmask 31744   ;;  %vm4059_vm4 = vcmask 64512  }
   0x2   :  { %v20_v2 = vld [vmem:[%s8859_s0] sm:$0xff]  ;;  %4803 = vmatprep.subr.msk.mxu0 %vm3670_vm0, %v3476_v1  ;;  %v239_v6 = vshrl.u32 %v238_v0, 7  ;;  %4901 = vmatprep.subr.msk.mxu1 %vm3670_vm0, %v3476_v1  ;;  %v26_v7 = vld [vmem:[%s8859_s0 + $0x30] sm:$0xff]  ;;  %v4960_v9 = vmax.f32 %v21_v3, 0.0  ;;  %v4962_v10 = vmax.f32 %v23_v4, 0.0  ;;  %v27_v32 = vld [vmem:[%s8859_s0 + $0x38] sm:$0xff] }
   0x3   :  { %v24_v5 = vld [vmem:[%s8859_s0 + $0x20] sm:$0xff]  ;;  %4804 = vmatpush3.msk.msra.mxu0 %vm3670_vm0, %v3476_v1  ;;  %v128_v8 = vmax.f32 %v20_v2, 0.0  ;;  %4902 = vmatpush3.msk.msra.mxu1 %vm3670_vm0, %v3476_v1  ;;  %v4972_v20 = vmax.f32 %v26_v7, 0.0  ;;  %v5010_v41 = vld [vmem:[%s8860_s1 + $0x8] ss:$0 sm:$0xff]  ;;  %v5015_v46 = vmax.f32 %v27_v32, 0.0 }
   0x4   :  { %v236_v11 = vld [vmem:[%s8860_s1] sm:$0xff]  ;;  %v4968_v12 = vmax.f32 %v24_v5, 0.0  ;;  %v4970_v13 = vsub.s32 0, %v239_v6  ;;  %v308_v14 = vsub.s32 1, %v239_v6  ;;  %v793_v15 = vsub.s32 2, %v239_v6 }
   0x5   :  { %v1278_v16 = vsub.s32 3, %v239_v6  ;;  %v1410_v17 = vsub.s32 4, %v239_v6  ;;  %v1894_v18 = vsub.s32 5, %v239_v6  ;;  %v2378_v19 = vsub.s32 6, %v239_v6  ;;  %v22_v50 = vld [vmem:[%s8859_s0 + $0x10] sm:$0x3] }
   0x6   :  { %8905 = vst [vmem:[#allocation2_spill] sm:$0xff] %v4970_v13  ;;  %v4975_v21 = vrot.slane %v236_v11, %v4970_v13  ;;  %v4977_v22 = vrot.slane %v236_v11, %v308_v14  ;;  %v4979_v23 = vrot.slane %v236_v11, %v793_v15  ;;  %v2510_v27 = vsub.s32 7, %v239_v6  ;;  %v25_v59 = vld [vmem:[%s8859_s0 + $0x28] sm:$0x3]  ;;  %v28_v63 = vld [vmem:[%s8859_s0 + $0x40] sm:$0x3] }
   0x7   :  { %v4981_v24 = vrot.slane %v236_v11, %v1278_v16  ;;  %v4983_v25 = vrot.slane %v236_v11, %v1410_v17  ;;  %v4985_v26 = vrot.slane %v236_v11, %v1894_v18  ;;  %v4991_v31 = vrot.slane %v236_v11, %v2378_v19 }
   0x8   :  { %v310_v28 = vmul.f32 %v4977_v22, %v128_v8  ;;  %v311_v29 = vmul.f32 %v4977_v22, %v4960_v9  ;;  %v795_v30 = vmul.f32 %v4979_v23, %v128_v8  ;;  %v242_v33 = vmul.f32 %v4975_v21, %v128_v8 }
   0x9   :  { %v796_v34 = vmul.f32 %v4979_v23, %v4960_v9  ;;  %v1412_v35 = vmul.f32 %v4983_v25, %v4962_v10  ;;  %v5003_v36 = vmul.f32 %v4983_v25, %v4968_v12  ;;  %v1896_v40 = vmul.f32 %v4985_v26, %v4962_v10 }
   0xa   :  { %v503_v37 = vrot.slane %v310_v28, 1  ;;  %v504_v38 = vrot.slane %v311_v29, 1  ;;  %v988_v39 = vrot.slane %v795_v30, 2  ;;  %v1897_v45 = vmul.f32 %v4985_v26, %v4968_v12 }
   0xb   :  { %v989_v42 = vrot.slane %v796_v34, 2  ;;  %v1604_v43 = vrot.slane %v1412_v35, 1  ;;  %v1605_v44 = vrot.slane %v5003_v36, 1  ;;  %v1280_v48 = vmul.f32 %v4981_v24, %v4962_v10  ;;  %v29_v36 = vld [vmem:[%s8859_s0 + $0x48] sm:$0xff] }
   0xc   :  { %v505_v47 = vsel %vm502_vm1, %v503_v37, %v504_v38  ;;  %v5020_v49 = vrot.slane %v236_v11, %v2510_v27  ;;  %v2088_v53 = vrot.slane %v1896_v40, 2  ;;  %v2089_v54 = vrot.slane %v1897_v45, 2  ;;  %v30_v37 = vld [vmem:[%s8859_s0 + $0x50] sm:$0xff] }
   0xd   :  { %v727_v51 = vadd.f32 %v505_v47, %v242_v33  ;;  %v990_v52 = vsel %vm987_vm2, %v988_v39, %v989_v42  ;;  %v2996_v57 = vmul.f32 %v5010_v41, %v4972_v20  ;;  %v5036_v58 = vmul.f32 %v5010_v41, %v5015_v46 }
   0xe   :  { %v2512_v55 = vmul.f32 %v5020_v49, %v4972_v20  ;;  %v5030_v56 = vmul.f32 %v5020_v49, %v5015_v46  ;;  %v1606_v61 = vsel %vm502_vm1, %v1604_v43, %v1605_v44  ;;  %v2380_v62 = vmul.f32 %v4991_v31, %v4972_v20 }
   0xf   :  { %v1212_v60 = vadd.f32 %v990_v52, %v727_v51  ;;  %v130_v0 = vmax.f32 %v22_v50, 0.0  ;;  %v3188_v3 = vrot.slane %v2996_v57, 2  ;;  %v3189_v4 = vrot.slane %v5036_v58, 2 }
  0x10   :  { %v2704_v1 = vrot.slane %v2512_v55, 1  ;;  %v2705_v2 = vrot.slane %v5030_v56, 1  ;;  %v2090_v6 = vsel %vm987_vm2, %v2088_v53, %v2089_v54  ;;  %v5050_v7 = vmax.f32 %v25_v59, 0.0  ;;  %v31_v56 = vld [vmem:[%s8859_s0 + $0x58] sm:$0x3] }
  0x11   :  { %v1344_v5 = vadd.f32 %v1280_v48, %v1212_v60  ;;  %v312_v8 = vmul.f32 %v4977_v22, %v130_v0  ;;  %v5056_v14 = vmax.f32 %v28_v63, 0.0  ;;  %v243_v15 = vmul.f32 %v4975_v21, %v4960_v9 }
  0x12   :  { %v2706_v11 = vsel %vm502_vm1, %v2704_v1, %v2705_v2  ;;  %v797_v16 = vmul.f32 %v4979_v23, %v130_v0  ;;  %v1414_v19 = vmul.f32 %v4983_v25, %v5050_v7  ;;  %v1898_v27 = vmul.f32 %v4985_v26, %v5050_v7 }
  0x13   :  { %v1828_v17 = vadd.f32 %v1606_v61, %v1344_v5  ;;  %v506_v18 = vrot.slane %v312_v8, 1  ;;  %v3190_v28 = vsel %vm987_vm2, %v3188_v3, %v3189_v4  ;;  %v2514_v30 = vmul.f32 %v5020_v49, %v5056_v14 }
  0x14   :  { %v991_v29 = vrot.slane %v797_v16, 2  ;;  %v2998_v9 = vmul.f32 %v5010_v41, %v5056_v14  ;;  %v1607_v34 = vrot.slane %v1414_v19, 1  ;;  %v2091_v35 = vrot.slane %v1898_v27, 2 }
  0x15   :  { %v2312_v32 = vadd.f32 %v2090_v6, %v1828_v17  ;;  %v507_v33 = vsel %vm502_vm1, %v504_v38, %v506_v18  ;;  %v1281_v43 = vmul.f32 %v4981_v24, %v4968_v12  ;;  %v2381_v45 = vmul.f32 %v4991_v31, %v5015_v46 }
  0x16   :  { %v728_v39 = vadd.f32 %v507_v33, %v243_v15  ;;  %v992_v40 = vsel %vm987_vm2, %v989_v42, %v991_v29  ;;  %v1608_v47 = vsel %vm502_vm1, %v1605_v44, %v1607_v34  ;;  %v2707_v48 = vrot.slane %v2514_v30, 1 }
  0x17   :  { %v2444_v38 = vadd.f32 %v2380_v62, %v2312_v32  ;;  %v3191_v50 = vrot.slane %v2998_v9, 2  ;;  %v2092_v52 = vsel %vm987_vm2, %v2089_v54, %v2091_v35  ;;  %v5086_v53 = vmax.f32 %v29_v36, 0.0 }
  0x18   :  { %v1213_v51 = vadd.f32 %v992_v40, %v728_v39  ;;  %v5088_v55 = vmax.f32 %v30_v37, 0.0  ;;  %v244_v42 = vmul.f32 %v4975_v21, %v4962_v10  ;;  %v313_v59 = vmul.f32 %v4977_v22, %v4962_v10 }
  0x19   :  { %v2928_v57 = vadd.f32 %v2706_v11, %v2444_v38  ;;  %v314_v60 = vmul.f32 %v4977_v22, %v4968_v12  ;;  %v798_v61 = vmul.f32 %v4979_v23, %v4962_v10  ;;  %v799_v54 = vmul.f32 %v4979_v23, %v4968_v12 }
  0x1a   :  { %v1345_v44 = vadd.f32 %v1281_v43, %v1213_v51  ;;  %v1282_v62 = vmul.f32 %v4981_v24, %v4972_v20  ;;  %v508_v0 = vrot.slane %v313_v59, 1  ;;  %v1415_v3 = vmul.f32 %v4983_v25, %v4972_v20 }
  0x1b   :  { %v3412_v63 = vadd.f32 %v3190_v28, %v2928_v57  ;;  %v509_v1 = vrot.slane %v314_v60, 1  ;;  %v993_v6 = vrot.slane %v798_v61, 2  ;;  %v994_v8 = vrot.slane %v799_v54, 2 }
  0x1c   :  { %v1829_v5 = vadd.f32 %v1608_v47, %v1345_v44  ;;  %v1416_v11 = vmul.f32 %v4983_v25, %v5015_v46  ;;  %v1609_v15 = vrot.slane %v1415_v3, 1  ;;  %v1899_v16 = vmul.f32 %v4985_v26, %v4972_v20 }
  0x1d   :  { %4805 = vmatprep.mubr.msk.f32.mxu0 %vm3477_vm3, %v3412_v63  ;;  %v510_v10 = vsel %vm502_vm1, %v508_v0, %v509_v1  ;;  %v1900_v17 = vmul.f32 %v4985_v26, %v5015_v46  ;;  %v995_v27 = vsel %vm987_vm2, %v993_v6, %v994_v8  ;;  %v2708_v29 = vsel %vm502_vm1, %v2705_v2, %v2707_v48  ;;  %v32_v6 = vld [vmem:[%s8859_s0 + $0x60] sm:$0xff] }
  0x1e   :  { %v2313_v18 = vadd.f32 %v2092_v52, %v1829_v5  ;;  %v729_v19 = vadd.f32 %v510_v10, %v244_v42  ;;  %v1610_v28 = vrot.slane %v1416_v11, 1  ;;  %v2093_v30 = vrot.slane %v1899_v16, 2 }
  0x1f   :  { %v2094_v9 = vrot.slane %v1900_v17, 2  ;;  %v2515_v32 = vmul.f32 %v5020_v49, %v5086_v53  ;;  %v3192_v34 = vsel %vm987_vm2, %v3189_v4, %v3191_v50  ;;  %v2516_v36 = vmul.f32 %v5020_v49, %v5088_v55 }
  0x20   :  { %v2445_v33 = vadd.f32 %v2381_v45, %v2313_v18  ;;  %v1214_v35 = vadd.f32 %v995_v27, %v729_v19  ;;  %v1611_v2 = vsel %vm502_vm1, %v1609_v15, %v1610_v28  ;;  %v2999_v39 = vmul.f32 %v5010_v41, %v5086_v53 }
  0x21   :  { %v2709_v37 = vrot.slane %v2515_v32, 1  ;;  %v5131_v40 = vmul.f32 %v5010_v41, %v5088_v55  ;;  %v2382_v43 = vmul.f32 %v4991_v31, %v5086_v53  ;;  %v2710_v45 = vrot.slane %v2516_v36, 1 }
  0x22   :  { %v2929_v58 = vadd.f32 %v2708_v29, %v2445_v33  ;;  %v1346_v4 = vadd.f32 %v1282_v62, %v1214_v35  ;;  %v2095_v38 = vsel %vm987_vm2, %v2093_v30, %v2094_v9  ;;  %v3193_v47 = vrot.slane %v2999_v39, 2 }
  0x23   :  { %v5136_v48 = vmax.f32 %v31_v56, 0.0  ;;  %v315_v50 = vmul.f32 %v4977_v22, %v5050_v7  ;;  %v245_v57 = vmul.f32 %v4975_v21, %v4968_v12  ;;  %v800_v42 = vmul.f32 %v4979_v23, %v5050_v7 }
  0x24   :  { %v3413_v51 = vadd.f32 %v3192_v34, %v2929_v58  ;;  %v1830_v52 = vadd.f32 %v1611_v2, %v1346_v4  ;;  %v2711_v59 = vsel %vm502_vm1, %v2709_v37, %v2710_v45  ;;  %v3194_v60 = vrot.slane %v5131_v40, 2 }
  0x25   :  { %v511_v44 = vrot.slane %v315_v50, 1  ;;  %v1417_v61 = vmul.f32 %v4983_v25, %v5056_v14  ;;  %v996_v62 = vrot.slane %v800_v42, 2  ;;  %v1283_v63 = vmul.f32 %v4981_v24, %v5015_v46 }
  0x26   :  { %4806 = vmatmul.mubr.msk.f32.vlgmr.msra.gmra.mxu0 %vm3477_vm3, %v3413_v51  ;;  %v2314_v54 = vadd.f32 %v2095_v38, %v1830_v52  ;;  %v1901_v12 = vmul.f32 %v4985_v26, %v5056_v14  ;;  %v2517_v3 = vmul.f32 %v5020_v49, %v5136_v48  ;;  %v3001_v5 = vmul.f32 %v5010_v41, %v5136_v48 }
  0x27   :  { %v512_v7 = vsel %vm502_vm1, %v509_v1, %v511_v44  ;;  %v1612_v0 = vrot.slane %v1417_v61, 1  ;;  %v997_v15 = vsel %vm987_vm2, %v994_v8, %v996_v62  ;;  %v33_v1 = vld [vmem:[%s8859_s0 + $0x68] sm:$0xff]  ;;  %v3195_v17 = vsel %vm987_vm2, %v3193_v47, %v3194_v60 }
  0x28   :  { %v2446_v11 = vadd.f32 %v2382_v43, %v2314_v54  ;;  %v730_v10 = vadd.f32 %v512_v7, %v245_v57  ;;  %v2096_v16 = vrot.slane %v1901_v12, 2  ;;  %v2383_v19 = vmul.f32 %v4991_v31, %v5088_v55 }
  0x29   :  { %v1613_v18 = vsel %vm502_vm1, %v1610_v28, %v1612_v0  ;;  %v2712_v27 = vrot.slane %v2517_v3, 1  ;;  %v3196_v32 = vrot.slane %v3001_v5, 2  ;;  %v5169_v33 = vmax.f32 %v32_v6, 0.0 }
  0x2a   :  { %v2930_v29 = vadd.f32 %v2711_v59, %v2446_v11  ;;  %v1215_v30 = vadd.f32 %v997_v15, %v730_v10  ;;  %v2097_v8 = vsel %vm987_vm2, %v2094_v9, %v2096_v16  ;;  %v5173_v35 = vmax.f32 %v33_v1, 0.0 }
  0x2b   :  { %v2713_v34 = vsel %vm502_vm1, %v2710_v45, %v2712_v27  ;;  %v316_v36 = vmul.f32 %v4977_v22, %v4972_v20  ;;  %v317_v2 = vmul.f32 %v4977_v22, %v5015_v46  ;;  %v801_v37 = vmul.f32 %v4979_v23, %v4972_v20 }
  0x2c   :  { %v3414_v56 = vadd.f32 %v3195_v17, %v2930_v29  ;;  %v1347_v28 = vadd.f32 %v1283_v63, %v1215_v30  ;;  %v246_v39 = vmul.f32 %v4975_v21, %v4972_v20  ;;  %v802_v9 = vmul.f32 %v4979_v23, %v5015_v46 }
  0x2d   :  { %v513_v40 = vrot.slane %v316_v36, 1  ;;  %v1418_v58 = vmul.f32 %v4983_v25, %v5086_v53  ;;  %v514_v43 = vrot.slane %v317_v2, 1  ;;  %v998_v45 = vrot.slane %v801_v37, 2 }
  0x2e   :  { %4808 = vmatprep.mubr.msk.f32.mxu0 %vm3477_vm3, %v3414_v56  ;;  %v1831_v4 = vadd.f32 %v1613_v18, %v1347_v28  ;;  %v1419_v38 = vmul.f32 %v4983_v25, %v5088_v55  ;;  %v999_v47 = vrot.slane %v802_v9, 2  ;;  %v1284_v50 = vmul.f32 %v4981_v24, %v5086_v53 }
  0x2f   :  { %v1902_v20 = vmul.f32 %v4985_v26, %v5086_v53  ;;  %v1903_v51 = vmul.f32 %v4985_v26, %v5088_v55  ;;  %v515_v57 = vsel %vm502_vm1, %v513_v40, %v514_v43  ;;  %v1614_v42 = vrot.slane %v1418_v58, 1 }
  0x30   :  { %v2315_v52 = vadd.f32 %v2097_v8, %v1831_v4  ;;  %v1615_v59 = vrot.slane %v1419_v38, 1  ;;  %v731_v44 = vadd.f32 %v515_v57, %v246_v39  ;;  %v1000_v61 = vsel %vm987_vm2, %v998_v45, %v999_v47  ;;  %v35_v4 = vld [vmem:[%s8859_s0 + $0x78] sm:$0xff] }
  0x31   :  { %v2098_v54 = vrot.slane %v1902_v20, 2  ;;  %v2099_v62 = vrot.slane %v1903_v51, 2  ;;  %v3197_v12 = vsel %vm987_vm2, %v3194_v60, %v3196_v32  ;;  %v2518_v7 = vmul.f32 %v5020_v49, %v5169_v33  ;;  %v34_v60 = vld [vmem:[%s8859_s0 + $0x70] sm:$0x3]  ;;  %v36_v51 = vld [vmem:[%s8859_s0 + $0x80] sm:$0xff] }
  0x32   :  { %v2447_v63 = vadd.f32 %v2383_v19, %v2315_v52  ;;  %v2519_v0 = vmul.f32 %v5020_v49, %v5173_v35  ;;  %v1216_v3 = vadd.f32 %v1000_v61, %v731_v44  ;;  %v2384_v5 = vmul.f32 %v4991_v31, %v5169_v33 }
  0x33   :  { %v3002_v6 = vmul.f32 %v5010_v41, %v5169_v33  ;;  %v5209_v11 = vmul.f32 %v5010_v41, %v5173_v35  ;;  %v1616_v15 = vsel %vm502_vm1, %v1614_v42, %v1615_v59  ;;  %v2714_v16 = vrot.slane %v2518_v7, 1 }
  0x34   :  { %v2931_v10 = vadd.f32 %v2713_v34, %v2447_v63  ;;  %v2715_v1 = vrot.slane %v2519_v0, 1  ;;  %v1348_v17 = vadd.f32 %v1284_v50, %v1216_v3  ;;  %v2100_v18 = vsel %vm987_vm2, %v2098_v54, %v2099_v62 }
  0x35   :  { %v3198_v19 = vrot.slane %v3002_v6, 2  ;;  %v3199_v27 = vrot.slane %v5209_v11, 2  ;;  %v5217_v30 = vmax.f32 %v34_v60, 0.0  ;;  %v318_v32 = vmul.f32 %v4977_v22, %v5056_v14 }
  0x36   :  { %v3415_v29 = vadd.f32 %v3197_v12, %v2931_v10  ;;  %v803_v8 = vmul.f32 %v4979_v23, %v5056_v14  ;;  %v1832_v34 = vadd.f32 %v1616_v15, %v1348_v17  ;;  %v2716_v36 = vsel %vm502_vm1, %v2714_v16, %v2715_v1 }
  0x37   :  { %v247_v56 = vmul.f32 %v4975_v21, %v5015_v46  ;;  %v1420_v28 = vmul.f32 %v4983_v25, %v5136_v48  ;;  %v3200_v2 = vsel %vm987_vm2, %v3198_v19, %v3199_v27  ;;  %v516_v37 = vrot.slane %v318_v32, 1 }
  0x38   :  { %4809 = vmatmul.mubr.msk.f32.gmra.mxu0 %vm3477_vm3, %v3415_v29  ;;  %v1001_v39 = vrot.slane %v803_v8, 2  ;;  %v1904_v14 = vmul.f32 %v4985_v26, %v5136_v48  ;;  %v2316_v40 = vadd.f32 %v2100_v18, %v1832_v34  ;;  %v2520_v58 = vmul.f32 %v5020_v49, %v5217_v30 }
  0x39   :  { %v1617_v9 = vrot.slane %v1420_v28, 1  ;;  %v3004_v46 = vmul.f32 %v5010_v41, %v5217_v30  ;;  %v517_v45 = vsel %vm502_vm1, %v514_v43, %v516_v37  ;;  %v1285_v50 = vmul.f32 %v4981_v24, %v5088_v55 }
  0x3a   :  { %v1002_v38 = vsel %vm987_vm2, %v999_v47, %v1001_v39  ;;  %v2101_v20 = vrot.slane %v1904_v14, 2  ;;  %v2448_v52 = vadd.f32 %v2384_v5, %v2316_v40  ;;  %v732_v57 = vadd.f32 %v517_v45, %v247_v56 }
  0x3b   :  { %v2385_v42 = vmul.f32 %v4991_v31, %v5173_v35  ;;  %v2717_v44 = vrot.slane %v2520_v58, 1  ;;  %v1618_v61 = vsel %vm502_vm1, %v1615_v59, %v1617_v9  ;;  %v3201_v54 = vrot.slane %v3004_v46, 2 }
  0x3c   :  { %v2102_v43 = vsel %vm987_vm2, %v2099_v62, %v2101_v20  ;;  %v5252_v47 = vmax.f32 %v35_v4, 0.0  ;;  %v2932_v63 = vadd.f32 %v2716_v36, %v2448_v52  ;;  %v1217_v12 = vadd.f32 %v1002_v38, %v732_v57 }
  0x3d   :  { %v5254_v7 = vmax.f32 %v36_v51, 0.0  ;;  %v319_v0 = vmul.f32 %v4977_v22, %v5086_v53  ;;  %v248_v3 = vmul.f32 %v4975_v21, %v5086_v53  ;;  %v320_v5 = vmul.f32 %v4977_v22, %v5088_v55 }
  0x3e   :  { %v804_v59 = vmul.f32 %v4979_v23, %v5086_v53  ;;  %v805_v62 = vmul.f32 %v4979_v23, %v5088_v55  ;;  %v3416_v6 = vadd.f32 %v3200_v2, %v2932_v63  ;;  %v1349_v60 = vadd.f32 %v1285_v50, %v1217_v12  ;;  %v37_v50 = vld [vmem:[%s8859_s0 + $0x88] sm:$0x3] }
  0x3f   :  { %v2718_v10 = vsel %vm502_vm1, %v2715_v1, %v2717_v44  ;;  %v518_v15 = vrot.slane %v319_v0, 1  ;;  %v519_v16 = vrot.slane %v320_v5, 1  ;;  %v1421_v19 = vmul.f32 %v4983_v25, %v5169_v33 }
  0x40   :  { %v1003_v17 = vrot.slane %v804_v59, 2  ;;  %v1004_v18 = vrot.slane %v805_v62, 2  ;;  %4811 = vmatprep.mubr.msk.f32.mxu0 %vm3477_vm3, %v3416_v6  ;;  %v1833_v29 = vadd.f32 %v1618_v61, %v1349_v60  ;;  %v1422_v53 = vmul.f32 %v4983_v25, %v5173_v35 }
  0x41   :  { %v1905_v32 = vmul.f32 %v4985_v26, %v5169_v33  ;;  %v1906_v8 = vmul.f32 %v4985_v26, %v5173_v35  ;;  %v520_v1 = vsel %vm502_vm1, %v518_v15, %v519_v16  ;;  %v1286_v36 = vmul.f32 %v4981_v24, %v5169_v33 }
  0x42   :  { %v1005_v34 = vsel %vm987_vm2, %v1003_v17, %v1004_v18  ;;  %v1619_v56 = vrot.slane %v1421_v19, 1  ;;  %v2317_v28 = vadd.f32 %v2102_v43, %v1833_v29  ;;  %v733_v2 = vadd.f32 %v520_v1, %v248_v3 }
  0x43   :  { %v1620_v37 = vrot.slane %v1422_v53, 1  ;;  %v2103_v39 = vrot.slane %v1905_v32, 2  ;;  %v2104_v14 = vrot.slane %v1906_v8, 2  ;;  %v2521_v40 = vmul.f32 %v5020_v49, %v5252_v47  ;;  %v38_v32 = vld [vmem:[%s8859_s0 + $0x90] sm:$0xff]  ;;  %v39_v8 = vld [vmem:[%s8859_s0 + $0x98] sm:$0xff] }
  0x44   :  { %v2522_v9 = vmul.f32 %v5020_v49, %v5254_v7  ;;  %v3005_v58 = vmul.f32 %v5010_v41, %v5252_v47  ;;  %v2449_v46 = vadd.f32 %v2385_v42, %v2317_v28  ;;  %v3202_v4 = vsel %vm987_vm2, %v3199_v27, %v3201_v54 }
  0x45   :  { %v1218_v45 = vadd.f32 %v1005_v34, %v733_v2  ;;  %v5291_v38 = vmul.f32 %v5010_v41, %v5254_v7  ;;  %v1621_v20 = vsel %vm502_vm1, %v1619_v56, %v1620_v37  ;;  %v2386_v51 = vmul.f32 %v4991_v31, %v5252_v47 }
  0x46   :  { %v2719_v52 = vrot.slane %v2521_v40, 1  ;;  %v2720_v57 = vrot.slane %v2522_v9, 1  ;;  %v2933_v42 = vadd.f32 %v2718_v10, %v2449_v46  ;;  %v3203_v44 = vrot.slane %v3005_v58, 2 }
  0x47   :  { %v1350_v11 = vadd.f32 %v1286_v36, %v1218_v45  ;;  %v3204_v27 = vrot.slane %v5291_v38, 2  ;;  %v2105_v61 = vsel %vm987_vm2, %v2103_v39, %v2104_v14  ;;  %v5301_v43 = vmax.f32 %v37_v50, 0.0 }
  0x48   :  { %v321_v54 = vmul.f32 %v4977_v22, %v5136_v48  ;;  %v806_v63 = vmul.f32 %v4979_v23, %v5136_v48  ;;  %v3417_v12 = vadd.f32 %v3202_v4, %v2933_v42  ;;  %v2721_v3 = vsel %vm502_vm1, %v2719_v52, %v2720_v57 }
  0x49   :  { %v1834_v0 = vadd.f32 %v1621_v20, %v1350_v11  ;;  %v249_v5 = vmul.f32 %v4975_v21, %v5088_v55  ;;  %v1423_v6 = vmul.f32 %v4983_v25, %v5217_v30  ;;  %v1907_v60 = vmul.f32 %v4985_v26, %v5217_v30 }
  0x4a   :  { %v521_v59 = vrot.slane %v321_v54, 1  ;;  %v1006_v62 = vrot.slane %v806_v63, 2  ;;  %4812 = vmatmul.mubr.msk.f32.gmra.mxu0 %vm3477_vm3, %v3417_v12  ;;  %v3205_v48 = vsel %vm987_vm2, %v3203_v44, %v3204_v27  ;;  %v2523_v15 = vmul.f32 %v5020_v49, %v5301_v43 }
  0x4b   :  { %v2318_v10 = vadd.f32 %v2105_v61, %v1834_v0  ;;  %v3007_v55 = vmul.f32 %v5010_v41, %v5301_v43  ;;  %v1622_v29 = vrot.slane %v1423_v6, 1  ;;  %v2106_v53 = vrot.slane %v1907_v60, 2 }
  0x4c   :  { %v522_v17 = vsel %vm502_vm1, %v519_v16, %v521_v59  ;;  %v1007_v19 = vsel %vm987_vm2, %v1004_v18, %v1006_v62  ;;  %v1287_v36 = vmul.f32 %v4981_v24, %v5173_v35  ;;  %v2722_v56 = vrot.slane %v2523_v15, 1 }
  0x4d   :  { %v2450_v1 = vadd.f32 %v2386_v51, %v2318_v10  ;;  %v734_v34 = vadd.f32 %v522_v17, %v249_v5  ;;  %v1623_v16 = vsel %vm502_vm1, %v1620_v37, %v1622_v29  ;;  %v2107_v18 = vsel %vm987_vm2, %v2104_v14, %v2106_v53  ;;  %v40_v53 = vld [vmem:[%s8859_s0 + $0xa0] sm:$0x3] }
  0x4e   :  { %v2387_v28 = vmul.f32 %v4991_v31, %v5254_v7  ;;  %v3206_v2 = vrot.slane %v3007_v55, 2  ;;  %v5336_v9 = vmax.f32 %v38_v32, 0.0  ;;  %v5338_v58 = vmax.f32 %v39_v8, 0.0 }
  0x4f   :  { %v2934_v39 = vadd.f32 %v2721_v3, %v2450_v1  ;;  %v1219_v40 = vadd.f32 %v1007_v19, %v734_v34  ;;  %v2723_v46 = vsel %vm502_vm1, %v2720_v57, %v2722_v56  ;;  %v322_v4 = vmul.f32 %v4977_v22, %v5169_v33 }
  0x50   :  { %v323_v37 = vmul.f32 %v4977_v22, %v5173_v35  ;;  %v807_v14 = vmul.f32 %v4979_v23, %v5169_v33  ;;  %v250_v20 = vmul.f32 %v4975_v21, %v5169_v33  ;;  %v808_v51 = vmul.f32 %v4979_v23, %v5173_v35 }
  0x51   :  { %v3418_v45 = vadd.f32 %v3205_v48, %v2934_v39  ;;  %v1351_v50 = vadd.f32 %v1287_v36, %v1219_v40  ;;  %v523_v52 = vrot.slane %v322_v4, 1  ;;  %v1424_v11 = vmul.f32 %v4983_v25, %v5252_v47 }
  0x52   :  { %v524_v42 = vrot.slane %v323_v37, 1  ;;  %v1008_v57 = vrot.slane %v807_v14, 2  ;;  %v1009_v61 = vrot.slane %v808_v51, 2  ;;  %v1425_v54 = vmul.f32 %v4983_v25, %v5254_v7 }
  0x53   :  { %4814 = vmatprep.mubr.msk.f32.mxu0 %vm3477_vm3, %v3418_v45  ;;  %v1835_v44 = vadd.f32 %v1623_v16, %v1351_v50  ;;  %v1908_v63 = vmul.f32 %v4985_v26, %v5252_v47  ;;  %v1288_v12 = vmul.f32 %v4981_v24, %v5252_v47  ;;  %v1624_v0 = vrot.slane %v1424_v11, 1 }
  0x54   :  { %v525_v33 = vsel %vm502_vm1, %v523_v52, %v524_v42  ;;  %v1909_v3 = vmul.f32 %v4985_v26, %v5254_v7  ;;  %v1010_v62 = vsel %vm987_vm2, %v1008_v57, %v1009_v61  ;;  %v1625_v6 = vrot.slane %v1425_v54, 1  ;;  %v41_v54 = vld [vmem:[%s8859_s0 + $0xa8] sm:$0xff] }
  0x55   :  { %v2319_v5 = vadd.f32 %v2107_v18, %v1835_v44  ;;  %v735_v59 = vadd.f32 %v525_v33, %v250_v20  ;;  %v2108_v60 = vrot.slane %v1908_v63, 2  ;;  %v2524_v48 = vmul.f32 %v5020_v49, %v5336_v9 }
  0x56   :  { %v2109_v10 = vrot.slane %v1909_v3, 2  ;;  %v5368_v15 = vmul.f32 %v5020_v49, %v5338_v58  ;;  %v3207_v17 = vsel %vm987_vm2, %v3204_v27, %v3206_v2  ;;  %v3008_v29 = vmul.f32 %v5010_v41, %v5336_v9 }
  0x57   :  { %v2451_v55 = vadd.f32 %v2387_v28, %v2319_v5  ;;  %v1220_v19 = vadd.f32 %v1010_v62, %v735_v59  ;;  %v1626_v32 = vsel %vm502_vm1, %v1624_v0, %v1625_v6  ;;  %v2724_v8 = vrot.slane %v2524_v48, 1 }
  0x58   :  { %v2725_v1 = vrot.slane %v5368_v15, 1  ;;  %v5382_v34 = vmul.f32 %v5010_v41, %v5338_v58  ;;  %v2110_v27 = vsel %vm987_vm2, %v2108_v60, %v2109_v10  ;;  %v2388_v56 = vmul.f32 %v4991_v31, %v5336_v9  ;;  %v43_v15 = vld [vmem:[%s8859_s0 + $0xb8] sm:$0x3] }
  0x59   :  { %v2935_v38 = vadd.f32 %v2723_v46, %v2451_v55  ;;  %v1352_v36 = vadd.f32 %v1288_v12, %v1220_v19  ;;  %v3208_v16 = vrot.slane %v3008_v29, 2  ;;  %v5388_v28 = vmax.f32 %v40_v53, 0.0 }
  0x5a   :  { %v3209_v18 = vrot.slane %v5382_v34, 2  ;;  %v324_v2 = vmul.f32 %v4977_v22, %v5217_v30  ;;  %v251_v4 = vmul.f32 %v4975_v21, %v5173_v35  ;;  %v809_v46 = vmul.f32 %v4979_v23, %v5217_v30 }
  0x5b   :  { %v3419_v39 = vadd.f32 %v3207_v17, %v2935_v38  ;;  %v1836_v40 = vadd.f32 %v1626_v32, %v1352_v36  ;;  %v2726_v37 = vsel %vm502_vm1, %v2724_v8, %v2725_v1  ;;  %v1426_v45 = vmul.f32 %v4983_v25, %v5301_v43 }
  0x5c   :  { %v526_v14 = vrot.slane %v324_v2, 1  ;;  %v1910_v50 = vmul.f32 %v4985_v26, %v5301_v43  ;;  %v1011_v51 = vrot.slane %v809_v46, 2  ;;  %v1289_v35 = vmul.f32 %v4981_v24, %v5254_v7 }
  0x5d   :  { %4815 = vmatmul.mubr.msk.f32.gmra.mxu0 %vm3477_vm3, %v3419_v39  ;;  %v2320_v20 = vadd.f32 %v2110_v27, %v1836_v40  ;;  %v2526_v30 = vmul.f32 %v5020_v49, %v5388_v28  ;;  %v1627_v57 = vrot.slane %v1426_v45, 1  ;;  %v3010_v44 = vmul.f32 %v5010_v41, %v5388_v28 }
  0x5e   :  { %v527_v52 = vsel %vm502_vm1, %v524_v42, %v526_v14  ;;  %v2111_v11 = vrot.slane %v1910_v50, 2  ;;  %v3210_v33 = vsel %vm987_vm2, %v3208_v16, %v3209_v18  ;;  %v1012_v0 = vsel %vm987_vm2, %v1009_v61, %v1011_v51  ;;  %v42_v42 = vld [vmem:[%s8859_s0 + $0xb0] sm:$0xff] }
  0x5f   :  { %v2452_v63 = vadd.f32 %v2388_v56, %v2320_v20  ;;  %v736_v12 = vadd.f32 %v527_v52, %v251_v4  ;;  %v1628_v3 = vsel %vm502_vm1, %v1625_v6, %v1627_v57  ;;  %v2389_v59 = vmul.f32 %v4991_v31, %v5338_v58 }
  0x60   :  { %v2112_v5 = vsel %vm987_vm2, %v2109_v10, %v2111_v11  ;;  %v2727_v62 = vrot.slane %v2526_v30, 1  ;;  %v3211_v55 = vrot.slane %v3010_v44, 2  ;;  %v5425_v17 = vmax.f32 %v41_v54, 0.0 }
  0x61   :  { %v2936_v60 = vadd.f32 %v2726_v37, %v2452_v63  ;;  %v1221_v48 = vadd.f32 %v1012_v0, %v736_v12  ;;  %v5427_v19 = vmax.f32 %v42_v42, 0.0  ;;  %v252_v61 = vmul.f32 %v4975_v21, %v5252_v47 }
  0x62   :  { %v325_v29 = vmul.f32 %v4977_v22, %v5252_v47  ;;  %v326_v6 = vmul.f32 %v4977_v22, %v5254_v7  ;;  %v810_v32 = vmul.f32 %v4979_v23, %v5252_v47  ;;  %v811_v8 = vmul.f32 %v4979_v23, %v5254_v7 }
  0x63   :  { %v3420_v10 = vadd.f32 %v3210_v33, %v2936_v60  ;;  %v1353_v53 = vadd.f32 %v1289_v35, %v1221_v48  ;;  %v1290_v27 = vmul.f32 %v4981_v24, %v5336_v9  ;;  %v1427_v56 = vmul.f32 %v4983_v25, %v5336_v9 }
  0x64   :  { %v528_v38 = vrot.slane %v325_v29, 1  ;;  %v529_v36 = vrot.slane %v326_v6, 1  ;;  %v1013_v2 = vrot.slane %v810_v32, 2  ;;  %v1014_v39 = vrot.slane %v811_v8, 2 }
  0x65   :  { %4817 = vmatprep.mubr.msk.f32.mxu0 %vm3477_vm3, %v3420_v10  ;;  %v1837_v16 = vadd.f32 %v1628_v3, %v1353_v53  ;;  %v1428_v40 = vmul.f32 %v4983_v25, %v5338_v58  ;;  %v1629_v4 = vrot.slane %v1427_v56, 1  ;;  %v1911_v46 = vmul.f32 %v4985_v26, %v5336_v9 }
  0x66   :  { %v530_v47 = vsel %vm502_vm1, %v528_v38, %v529_v36  ;;  %v1912_v37 = vmul.f32 %v4985_v26, %v5338_v58  ;;  %v1015_v50 = vsel %vm987_vm2, %v1013_v2, %v1014_v39  ;;  %v2728_v51 = vsel %vm502_vm1, %v2725_v1, %v2727_v62  ;;  %v44_v2 = vld [vmem:[%s8859_s0 + $0xc0] sm:$0xff] }
  0x67   :  { %v2321_v14 = vadd.f32 %v2112_v5, %v1837_v16  ;;  %v737_v45 = vadd.f32 %v530_v47, %v252_v61  ;;  %v1630_v20 = vrot.slane %v1428_v40, 1  ;;  %v2113_v35 = vrot.slane %v1911_v46, 2 }
  0x68   :  { %v2114_v30 = vrot.slane %v1912_v37, 2  ;;  %v2527_v52 = vmul.f32 %v5020_v49, %v5425_v17  ;;  %v3212_v11 = vsel %vm987_vm2, %v3209_v18, %v3211_v55  ;;  %v2528_v54 = vmul.f32 %v5020_v49, %v5427_v19 }
  0x69   :  { %v2453_v57 = vadd.f32 %v2389_v59, %v2321_v14  ;;  %v1222_v44 = vadd.f32 %v1015_v50, %v737_v45  ;;  %v1631_v1 = vsel %vm502_vm1, %v1629_v4, %v1630_v20  ;;  %v3011_v33 = vmul.f32 %v5010_v41, %v5425_v17 }
  0x6a   :  { %v2729_v63 = vrot.slane %v2527_v52, 1  ;;  %v5470_v12 = vmul.f32 %v5010_v41, %v5427_v19  ;;  %v2390_v0 = vmul.f32 %v4991_v31, %v5425_v17  ;;  %v2730_v42 = vrot.slane %v2528_v54, 1 }
  0x6b   :  { %v2937_v34 = vadd.f32 %v2728_v51, %v2453_v57  ;;  %v1354_v18 = vadd.f32 %v1290_v27, %v1222_v44  ;;  %v2115_v3 = vsel %vm987_vm2, %v2113_v35, %v2114_v30  ;;  %v3213_v5 = vrot.slane %v3011_v33, 2 }
  0x6c   :  { %v5475_v59 = vmax.f32 %v43_v15, 0.0  ;;  %v327_v62 = vmul.f32 %v4977_v22, %v5301_v43  ;;  %v253_v55 = vmul.f32 %v4975_v21, %v5254_v7  ;;  %v812_v61 = vmul.f32 %v4979_v23, %v5301_v43 }
  0x6d   :  { %v3421_v60 = vadd.f32 %v3212_v11, %v2937_v34  ;;  %v1838_v48 = vadd.f32 %v1631_v1, %v1354_v18  ;;  %v2731_v29 = vsel %vm502_vm1, %v2729_v63, %v2730_v42  ;;  %v3214_v6 = vrot.slane %v5470_v12, 2 }
  0x6e   :  { %v531_v10 = vrot.slane %v327_v62, 1  ;;  %v1429_v53 = vmul.f32 %v4983_v25, %v5388_v28  ;;  %v1016_v8 = vrot.slane %v812_v61, 2  ;;  %v1291_v38 = vmul.f32 %v4981_v24, %v5338_v58 }
  0x6f   :  { %4818 = vmatmul.mubr.msk.f32.gmra.mxu0 %vm3477_vm3, %v3421_v60  ;;  %v2322_v32 = vadd.f32 %v2115_v3, %v1838_v48  ;;  %v1913_v7 = vmul.f32 %v4985_v26, %v5388_v28  ;;  %v2529_v56 = vmul.f32 %v5020_v49, %v5475_v59  ;;  %v3013_v16 = vmul.f32 %v5010_v41, %v5475_v59 }
  0x70   :  { %v532_v43 = vsel %vm502_vm1, %v529_v36, %v531_v10  ;;  %v1632_v27 = vrot.slane %v1429_v53, 1  ;;  %v1017_v4 = vsel %vm987_vm2, %v1014_v39, %v1016_v8  ;;  %v45_v36 = vld [vmem:[%s8859_s0 + $0xc8] sm:$0xff]  ;;  %v3215_v37 = vsel %vm987_vm2, %v3213_v5, %v3214_v6 }
  0x71   :  { %v2454_v40 = vadd.f32 %v2390_v0, %v2322_v32  ;;  %v738_v47 = vadd.f32 %v532_v43, %v253_v55  ;;  %v2116_v46 = vrot.slane %v1913_v7, 2  ;;  %v2391_v45 = vmul.f32 %v4991_v31, %v5427_v19 }
  0x72   :  { %v1633_v14 = vsel %vm502_vm1, %v1630_v20, %v1632_v27  ;;  %v2732_v50 = vrot.slane %v2529_v56, 1  ;;  %v3216_v52 = vrot.slane %v3013_v16, 2  ;;  %v5508_v57 = vmax.f32 %v44_v2, 0.0 }
  0x73   :  { %v2938_v51 = vadd.f32 %v2731_v29, %v2454_v40  ;;  %v1223_v35 = vadd.f32 %v1017_v4, %v738_v47  ;;  %v2117_v39 = vsel %vm987_vm2, %v2114_v30, %v2116_v46  ;;  %v5512_v44 = vmax.f32 %v45_v36, 0.0 }
  0x74   :  { %v2733_v11 = vsel %vm502_vm1, %v2730_v42, %v2732_v50  ;;  %v328_v54 = vmul.f32 %v4977_v22, %v5336_v9  ;;  %v329_v1 = vmul.f32 %v4977_v22, %v5338_v58  ;;  %v813_v63 = vmul.f32 %v4979_v23, %v5336_v9 }
  0x75   :  { %v3422_v15 = vadd.f32 %v3215_v37, %v2938_v51  ;;  %v1355_v20 = vadd.f32 %v1291_v38, %v1223_v35  ;;  %v254_v33 = vmul.f32 %v4975_v21, %v5336_v9  ;;  %v814_v30 = vmul.f32 %v4979_v23, %v5338_v58 }
  0x76   :  { %v533_v12 = vrot.slane %v328_v54, 1  ;;  %v1430_v34 = vmul.f32 %v4983_v25, %v5425_v17  ;;  %v534_v0 = vrot.slane %v329_v1, 1  ;;  %v1018_v42 = vrot.slane %v813_v63, 2 }
  0x77   :  { %4820 = vmatprep.mubr.msk.f32.mxu0 %vm3477_vm3, %v3422_v15  ;;  %v1839_v18 = vadd.f32 %v1633_v14, %v1355_v20  ;;  %v1431_v3 = vmul.f32 %v4983_v25, %v5427_v19  ;;  %v1019_v5 = vrot.slane %v814_v30, 2  ;;  %v1292_v62 = vmul.f32 %v4981_v24, %v5425_v17 }
  0x78   :  { %v1914_v9 = vmul.f32 %v4985_v26, %v5425_v17  ;;  %v1915_v60 = vmul.f32 %v4985_v26, %v5427_v19  ;;  %v535_v55 = vsel %vm502_vm1, %v533_v12, %v534_v0  ;;  %v1634_v61 = vrot.slane %v1430_v34, 1 }
  0x79   :  { %v2323_v48 = vadd.f32 %v2117_v39, %v1839_v18  ;;  %v1635_v29 = vrot.slane %v1431_v3, 1  ;;  %v739_v10 = vadd.f32 %v535_v55, %v254_v33  ;;  %v1020_v53 = vsel %vm987_vm2, %v1018_v42, %v1019_v5  ;;  %v47_v18 = vld [vmem:[%s8859_s0 + $0xd8] sm:$0xff] }
  0x7a   :  { %v2118_v32 = vrot.slane %v1914_v9, 2  ;;  %v2119_v8 = vrot.slane %v1915_v60, 2  ;;  %v3217_v7 = vsel %vm987_vm2, %v3214_v6, %v3216_v52  ;;  %v2530_v43 = vmul.f32 %v5020_v49, %v5508_v57  ;;  %v46_v6 = vld [vmem:[%s8859_s0 + $0xd0] sm:$0x3]  ;;  %v48_v60 = vld [vmem:[%s8859_s0 + $0xe0] sm:$0xff] }
  0x7b   :  { %v2455_v38 = vadd.f32 %v2391_v45, %v2323_v48  ;;  %v2531_v27 = vmul.f32 %v5020_v49, %v5512_v44  ;;  %v1224_v56 = vadd.f32 %v1020_v53, %v739_v10  ;;  %v2392_v16 = vmul.f32 %v4991_v31, %v5508_v57 }
  0x7c   :  { %v3014_v2 = vmul.f32 %v5010_v41, %v5508_v57  ;;  %v5548_v40 = vmul.f32 %v5010_v41, %v5512_v44  ;;  %v1636_v4 = vsel %vm502_vm1, %v1634_v61, %v1635_v29  ;;  %v2734_v46 = vrot.slane %v2530_v43, 1 }
  0x7d   :  { %v2939_v47 = vadd.f32 %v2733_v11, %v2455_v38  ;;  %v2735_v36 = vrot.slane %v2531_v27, 1  ;;  %v1356_v37 = vadd.f32 %v1292_v62, %v1224_v56  ;;  %v2120_v14 = vsel %vm987_vm2, %v2118_v32, %v2119_v8 }
  0x7e   :  { %v3218_v45 = vrot.slane %v3014_v2, 2  ;;  %v3219_v50 = vrot.slane %v5548_v40, 2  ;;  %v5556_v35 = vmax.f32 %v46_v6, 0.0  ;;  %v330_v41 = vmul.f32 %v4977_v22, %v5388_v28 }
  0x7f   :  { %v3423_v51 = vadd.f32 %v3217_v7, %v2939_v47  ;;  %v815_v52 = vmul.f32 %v4979_v23, %v5388_v28  ;;  %v1840_v39 = vadd.f32 %v1636_v4, %v1356_v37  ;;  %v2736_v11 = vsel %vm502_vm1, %v2734_v46, %v2735_v36 }
  0x80   :  { %v255_v54 = vmul.f32 %v4975_v21, %v5338_v58  ;;  %v1432_v15 = vmul.f32 %v4983_v25, %v5475_v59  ;;  %v3220_v20 = vsel %vm987_vm2, %v3218_v45, %v3219_v50  ;;  %v536_v1 = vrot.slane %v330_v41, 1  ;;  %v5578_v58 = vld [vmem:[%s8860_s1 + $0x8] ss:$0 sm:$0xff] }
  0x81   :  { %4821 = vmatmul.mubr.msk.f32.gmra.mxu0 %vm3477_vm3, %v3423_v51  ;;  %v1021_v63 = vrot.slane %v815_v52, 2  ;;  %v1916_v28 = vmul.f32 %v4985_v26, %v5475_v59  ;;  %v2324_v33 = vadd.f32 %v2120_v14, %v1840_v39  ;;  %v2532_v30 = vmul.f32 %v5020_v49, %v5556_v35 }
  0x82   :  { %v1637_v12 = vrot.slane %v1432_v15, 1  ;;  %v3016_v34 = vmul.f32 %v5578_v58, %v5556_v35  ;;  %v537_v42 = vsel %vm502_vm1, %v534_v0, %v536_v1  ;;  %v1293_v62 = vmul.f32 %v4981_v24, %v5427_v19 }
  0x83   :  { %v1022_v3 = vsel %vm987_vm2, %v1019_v5, %v1021_v63  ;;  %v2121_v9 = vrot.slane %v1916_v28, 2  ;;  %v2456_v48 = vadd.f32 %v2392_v16, %v2324_v33  ;;  %v740_v55 = vadd.f32 %v537_v42, %v255_v54 }
  0x84   :  { %v2393_v61 = vmul.f32 %v4991_v31, %v5512_v44  ;;  %v2737_v10 = vrot.slane %v2532_v30, 1  ;;  %v1638_v53 = vsel %vm502_vm1, %v1635_v29, %v1637_v12  ;;  %v3221_v32 = vrot.slane %v3016_v34, 2 }
  0x85   :  { %v2122_v0 = vsel %vm987_vm2, %v2119_v8, %v2121_v9  ;;  %v5596_v5 = vmax.f32 %v47_v18, 0.0  ;;  %v2940_v38 = vadd.f32 %v2736_v11, %v2456_v48  ;;  %v1225_v7 = vadd.f32 %v1022_v3, %v740_v55 }
  0x86   :  { %v5598_v43 = vmax.f32 %v48_v60, 0.0  ;;  %v331_v27 = vmul.f32 %v4977_v22, %v5425_v17  ;;  %v256_v56 = vmul.f32 %v4975_v21, %v5425_v17  ;;  %v332_v16 = vmul.f32 %v4977_v22, %v5427_v19 }
  0x87   :  { %v816_v29 = vmul.f32 %v4979_v23, %v5425_v17  ;;  %v817_v8 = vmul.f32 %v4979_v23, %v5427_v19  ;;  %v3424_v2 = vadd.f32 %v3220_v20, %v2940_v38  ;;  %v1357_v6 = vadd.f32 %v1293_v62, %v1225_v7  ;;  %v49_v62 = vld [vmem:[%s8859_s0 + $0xe8] sm:$0x3] }
  0x88   :  { %v2738_v47 = vsel %vm502_vm1, %v2735_v36, %v2737_v10  ;;  %v538_v4 = vrot.slane %v331_v27, 1  ;;  %v539_v46 = vrot.slane %v332_v16, 1  ;;  %v1433_v45 = vmul.f32 %v4983_v25, %v5508_v57 }
  0x89   :  { %v1023_v37 = vrot.slane %v816_v29, 2  ;;  %v1024_v14 = vrot.slane %v817_v8, 2  ;;  %4823 = vmatprep.mubr.msk.f32.mxu0 %vm3477_vm3, %v3424_v2  ;;  %v1841_v51 = vadd.f32 %v1638_v53, %v1357_v6  ;;  %v1434_v17 = vmul.f32 %v4983_v25, %v5512_v44 }
  0x8a   :  { %v1917_v41 = vmul.f32 %v4985_v26, %v5508_v57  ;;  %v1918_v52 = vmul.f32 %v4985_v26, %v5512_v44  ;;  %v540_v36 = vsel %vm502_vm1, %v538_v4, %v539_v46  ;;  %v1294_v11 = vmul.f32 %v4981_v24, %v5508_v57 }
  0x8b   :  { %v1025_v39 = vsel %vm987_vm2, %v1023_v37, %v1024_v14  ;;  %v1639_v54 = vrot.slane %v1433_v45, 1  ;;  %v2325_v15 = vadd.f32 %v2122_v0, %v1841_v51  ;;  %v741_v20 = vadd.f32 %v540_v36, %v256_v56 }
  0x8c   :  { %v1640_v1 = vrot.slane %v1434_v17, 1  ;;  %v2123_v63 = vrot.slane %v1917_v41, 2  ;;  %v2124_v28 = vrot.slane %v1918_v52, 2  ;;  %v2533_v33 = vmul.f32 %v5020_v49, %v5596_v5  ;;  %v50_v41 = vld [vmem:[%s8859_s0 + $0xf0] sm:$0xff]  ;;  %v51_v52 = vld [vmem:[%s8859_s0 + $0xf8] sm:$0xff] }
  0x8d   :  { %v2534_v12 = vmul.f32 %v5020_v49, %v5598_v43  ;;  %v3017_v30 = vmul.f32 %v5578_v58, %v5596_v5  ;;  %v2457_v34 = vadd.f32 %v2393_v61, %v2325_v15  ;;  %v3222_v18 = vsel %vm987_vm2, %v3219_v50, %v3221_v32 }
  0x8e   :  { %v1226_v42 = vadd.f32 %v1025_v39, %v741_v20  ;;  %v5635_v3 = vmul.f32 %v5578_v58, %v5598_v43  ;;  %v1641_v9 = vsel %vm502_vm1, %v1639_v54, %v1640_v1  ;;  %v2394_v60 = vmul.f32 %v4991_v31, %v5596_v5 }
  0x8f   :  { %v2739_v48 = vrot.slane %v2533_v33, 1  ;;  %v2740_v55 = vrot.slane %v2534_v12, 1  ;;  %v2941_v61 = vadd.f32 %v2738_v47, %v2457_v34  ;;  %v3223_v10 = vrot.slane %v3017_v30, 2 }
  0x90   :  { %v1358_v40 = vadd.f32 %v1294_v11, %v1226_v42  ;;  %v3224_v50 = vrot.slane %v5635_v3, 2  ;;  %v2125_v53 = vsel %vm987_vm2, %v2123_v63, %v2124_v28  ;;  %v5645_v0 = vmax.f32 %v49_v62, 0.0 }
  0x91   :  { %v333_v32 = vmul.f32 %v4977_v22, %v5475_v59  ;;  %v818_v38 = vmul.f32 %v4979_v23, %v5475_v59  ;;  %v3425_v7 = vadd.f32 %v3222_v18, %v2941_v61  ;;  %v2741_v56 = vsel %vm502_vm1, %v2739_v48, %v2740_v55 }
  0x92   :  { %v1842_v27 = vadd.f32 %v1641_v9, %v1358_v40  ;;  %v257_v16 = vmul.f32 %v4975_v21, %v5427_v19  ;;  %v1435_v2 = vmul.f32 %v4983_v25, %v5556_v35  ;;  %v1919_v6 = vmul.f32 %v4985_v26, %v5556_v35 }
  0x93   :  { %v541_v29 = vrot.slane %v333_v32, 1  ;;  %v1026_v8 = vrot.slane %v818_v38, 2  ;;  %4824 = vmatmul.mubr.msk.f32.gmra.mxu0 %vm3477_vm3, %v3425_v7  ;;  %v3225_v59 = vsel %vm987_vm2, %v3223_v10, %v3224_v50  ;;  %v2535_v4 = vmul.f32 %v5020_v49, %v5645_v0 }
  0x94   :  { %v2326_v47 = vadd.f32 %v2125_v53, %v1842_v27  ;;  %v3019_v19 = vmul.f32 %v5578_v58, %v5645_v0  ;;  %v1642_v51 = vrot.slane %v1435_v2, 1  ;;  %v2126_v17 = vrot.slane %v1919_v6, 2 }
  0x95   :  { %v542_v37 = vsel %vm502_vm1, %v539_v46, %v541_v29  ;;  %v1027_v45 = vsel %vm987_vm2, %v1024_v14, %v1026_v8  ;;  %v1295_v11 = vmul.f32 %v4981_v24, %v5512_v44  ;;  %v2742_v54 = vrot.slane %v2535_v4, 1 }
  0x96   :  { %v2458_v36 = vadd.f32 %v2394_v60, %v2326_v47  ;;  %v742_v39 = vadd.f32 %v542_v37, %v257_v16  ;;  %v1643_v46 = vsel %vm502_vm1, %v1640_v1, %v1642_v51  ;;  %v2127_v14 = vsel %vm987_vm2, %v2124_v28, %v2126_v17  ;;  %v52_v17 = vld [vmem:[%s8859_s0 + $0x100] sm:$0x3] }
  0x97   :  { %v2395_v15 = vmul.f32 %v4991_v31, %v5598_v43  ;;  %v3226_v20 = vrot.slane %v3019_v19, 2  ;;  %v5680_v12 = vmax.f32 %v50_v41, 0.0  ;;  %v5682_v30 = vmax.f32 %v51_v52, 0.0 }
  0x98   :  { %v2942_v63 = vadd.f32 %v2741_v56, %v2458_v36  ;;  %v1227_v33 = vadd.f32 %v1027_v45, %v742_v39  ;;  %v2743_v34 = vsel %vm502_vm1, %v2740_v55, %v2742_v54  ;;  %v334_v18 = vmul.f32 %v4977_v22, %v5508_v57 }
  0x99   :  { %v335_v1 = vmul.f32 %v4977_v22, %v5512_v44  ;;  %v819_v28 = vmul.f32 %v4979_v23, %v5508_v57  ;;  %v258_v9 = vmul.f32 %v4975_v21, %v5508_v57  ;;  %v820_v60 = vmul.f32 %v4979_v23, %v5512_v44 }
  0x9a   :  { %v3426_v42 = vadd.f32 %v3225_v59, %v2942_v63  ;;  %v1359_v62 = vadd.f32 %v1295_v11, %v1227_v33  ;;  %v543_v48 = vrot.slane %v334_v18, 1  ;;  %v1436_v40 = vmul.f32 %v4983_v25, %v5596_v5 }
  0x9b   :  { %v544_v61 = vrot.slane %v335_v1, 1  ;;  %v1028_v55 = vrot.slane %v819_v28, 2  ;;  %v1029_v53 = vrot.slane %v820_v60, 2  ;;  %v1437_v32 = vmul.f32 %v4983_v25, %v5598_v43 }
  0x9c   :  { %4826 = vmatprep.mubr.msk.f32.mxu0 %vm3477_vm3, %v3426_v42  ;;  %v1843_v10 = vadd.f32 %v1643_v46, %v1359_v62  ;;  %v1920_v38 = vmul.f32 %v4985_v26, %v5596_v5  ;;  %v1296_v7 = vmul.f32 %v4981_v24, %v5596_v5  ;;  %v1644_v27 = vrot.slane %v1436_v40, 1 }
  0x9d   :  { %v545_v57 = vsel %vm502_vm1, %v543_v48, %v544_v61  ;;  %v1921_v56 = vmul.f32 %v4985_v26, %v5598_v43  ;;  %v1030_v8 = vsel %vm987_vm2, %v1028_v55, %v1029_v53  ;;  %v1645_v2 = vrot.slane %v1437_v32, 1  ;;  %v53_v32 = vld [vmem:[%s8859_s0 + $0x108] sm:$0xff] }
  0x9e   :  { %v2327_v16 = vadd.f32 %v2127_v14, %v1843_v10  ;;  %v743_v29 = vadd.f32 %v545_v57, %v258_v9  ;;  %v2128_v6 = vrot.slane %v1920_v38, 2  ;;  %v2536_v59 = vmul.f32 %v5020_v49, %v5680_v12 }
  0x9f   :  { %v2129_v47 = vrot.slane %v1921_v56, 2  ;;  %v5712_v4 = vmul.f32 %v5020_v49, %v5682_v30  ;;  %v3227_v37 = vsel %vm987_vm2, %v3224_v50, %v3226_v20  ;;  %v3020_v51 = vmul.f32 %v5578_v58, %v5680_v12 }
  0xa0   :  { %v2459_v19 = vadd.f32 %v2395_v15, %v2327_v16  ;;  %v1228_v45 = vadd.f32 %v1030_v8, %v743_v29  ;;  %v1646_v41 = vsel %vm502_vm1, %v1644_v27, %v1645_v2  ;;  %v2744_v52 = vrot.slane %v2536_v59, 1 }
  0xa1   :  { %v2745_v36 = vrot.slane %v5712_v4, 1  ;;  %v5726_v39 = vmul.f32 %v5578_v58, %v5682_v30  ;;  %v2130_v50 = vsel %vm987_vm2, %v2128_v6, %v2129_v47  ;;  %v2396_v54 = vmul.f32 %v4991_v31, %v5680_v12  ;;  %v55_v4 = vld [vmem:[%s8859_s0 + $0x118] sm:$0x3] }
  0xa2   :  { %v2943_v3 = vadd.f32 %v2743_v34, %v2459_v19  ;;  %v1360_v11 = vadd.f32 %v1296_v7, %v1228_v45  ;;  %v3228_v46 = vrot.slane %v3020_v51, 2  ;;  %v5732_v15 = vmax.f32 %v52_v17, 0.0 }
  0xa3   :  { %v3229_v14 = vrot.slane %v5726_v39, 2  ;;  %v336_v20 = vmul.f32 %v4977_v22, %v5556_v35  ;;  %v259_v18 = vmul.f32 %v4975_v21, %v5512_v44  ;;  %v821_v34 = vmul.f32 %v4979_v23, %v5556_v35 }
  0xa4   :  { %v3427_v63 = vadd.f32 %v3227_v37, %v2943_v3  ;;  %v1844_v33 = vadd.f32 %v1646_v41, %v1360_v11  ;;  %v2746_v1 = vsel %vm502_vm1, %v2744_v52, %v2745_v36  ;;  %v1438_v42 = vmul.f32 %v4983_v25, %v5645_v0 }
  0xa5   :  { %v546_v28 = vrot.slane %v336_v20, 1  ;;  %v1922_v62 = vmul.f32 %v4985_v26, %v5645_v0  ;;  %v1031_v60 = vrot.slane %v821_v34, 2  ;;  %v1297_v44 = vmul.f32 %v4981_v24, %v5598_v43 }
  0xa6   :  { %4827 = vmatmul.mubr.msk.f32.gmra.mxu0 %vm3477_vm3, %v3427_v63  ;;  %v2328_v9 = vadd.f32 %v2130_v50, %v1844_v33  ;;  %v2538_v35 = vmul.f32 %v5020_v49, %v5732_v15  ;;  %v1647_v55 = vrot.slane %v1438_v42, 1  ;;  %v3022_v10 = vmul.f32 %v5578_v58, %v5732_v15 }
  0xa7   :  { %v547_v48 = vsel %vm502_vm1, %v544_v61, %v546_v28  ;;  %v2131_v40 = vrot.slane %v1922_v62, 2  ;;  %v3230_v57 = vsel %vm987_vm2, %v3228_v46, %v3229_v14  ;;  %v1032_v27 = vsel %vm987_vm2, %v1029_v53, %v1031_v60  ;;  %v54_v61 = vld [vmem:[%s8859_s0 + $0x110] sm:$0xff] }
  0xa8   :  { %v2460_v38 = vadd.f32 %v2396_v54, %v2328_v9  ;;  %v744_v7 = vadd.f32 %v547_v48, %v259_v18  ;;  %v1648_v56 = vsel %vm502_vm1, %v1645_v2, %v1647_v55  ;;  %v2397_v29 = vmul.f32 %v4991_v31, %v5682_v30 }
  0xa9   :  { %v2132_v16 = vsel %vm987_vm2, %v2129_v47, %v2131_v40  ;;  %v2747_v8 = vrot.slane %v2538_v35, 1  ;;  %v3231_v19 = vrot.slane %v3022_v10, 2  ;;  %v5769_v37 = vmax.f32 %v53_v32, 0.0 }
  0xaa   :  { %v2944_v6 = vadd.f32 %v2746_v1, %v2460_v38  ;;  %v1229_v59 = vadd.f32 %v1032_v27, %v744_v7  ;;  %v5771_v45 = vmax.f32 %v54_v61, 0.0  ;;  %v260_v53 = vmul.f32 %v4975_v21, %v5596_v5 }
  0xab   :  { %v337_v51 = vmul.f32 %v4977_v22, %v5596_v5  ;;  %v338_v2 = vmul.f32 %v4977_v22, %v5598_v43  ;;  %v822_v41 = vmul.f32 %v4979_v23, %v5596_v5  ;;  %v823_v52 = vmul.f32 %v4979_v23, %v5598_v43 }
  0xac   :  { %v3428_v47 = vadd.f32 %v3230_v57, %v2944_v6  ;;  %v1361_v17 = vadd.f32 %v1297_v44, %v1229_v59  ;;  %v1298_v50 = vmul.f32 %v4981_v24, %v5680_v12  ;;  %v1439_v54 = vmul.f32 %v4983_v25, %v5680_v12 }
  0xad   :  { %v548_v3 = vrot.slane %v337_v51, 1  ;;  %v549_v11 = vrot.slane %v338_v2, 1  ;;  %v1033_v20 = vrot.slane %v822_v41, 2  ;;  %v1034_v63 = vrot.slane %v823_v52, 2 }
  0xae   :  { %4829 = vmatprep.mubr.msk.f32.mxu0 %vm3477_vm3, %v3428_v47  ;;  %v1845_v46 = vadd.f32 %v1648_v56, %v1361_v17  ;;  %v1440_v33 = vmul.f32 %v4983_v25, %v5682_v30  ;;  %v1649_v18 = vrot.slane %v1439_v54, 1  ;;  %v1923_v34 = vmul.f32 %v4985_v26, %v5680_v12 }
  0xaf   :  { %v550_v5 = vsel %vm502_vm1, %v548_v3, %v549_v11  ;;  %v1924_v1 = vmul.f32 %v4985_v26, %v5682_v30  ;;  %v1035_v62 = vsel %vm987_vm2, %v1033_v20, %v1034_v63  ;;  %v2748_v60 = vsel %vm502_vm1, %v2745_v36, %v2747_v8  ;;  %v56_v20 = vld [vmem:[%s8859_s0 + $0x120] sm:$0xff] }
  0xb0   :  { %v2329_v28 = vadd.f32 %v2132_v16, %v1845_v46  ;;  %v745_v42 = vadd.f32 %v550_v5, %v260_v53  ;;  %v1650_v9 = vrot.slane %v1440_v33, 1  ;;  %v2133_v44 = vrot.slane %v1923_v34, 2 }
  0xb1   :  { %v2134_v35 = vrot.slane %v1924_v1, 2  ;;  %v2539_v48 = vmul.f32 %v5020_v49, %v5769_v37  ;;  %v3232_v40 = vsel %vm987_vm2, %v3229_v14, %v3231_v19  ;;  %v2540_v32 = vmul.f32 %v5020_v49, %v5771_v45 }
  0xb2   :  { %v2461_v55 = vadd.f32 %v2397_v29, %v2329_v28  ;;  %v1230_v10 = vadd.f32 %v1035_v62, %v745_v42  ;;  %v1651_v36 = vsel %vm502_vm1, %v1649_v18, %v1650_v9  ;;  %v3023_v57 = vmul.f32 %v5578_v58, %v5769_v37 }
  0xb3   :  { %v2749_v38 = vrot.slane %v2539_v48, 1  ;;  %v5814_v7 = vmul.f32 %v5578_v58, %v5771_v45  ;;  %v2398_v27 = vmul.f32 %v4991_v31, %v5769_v37  ;;  %v2750_v61 = vrot.slane %v2540_v32, 1 }
  0xb4   :  { %v2945_v39 = vadd.f32 %v2748_v60, %v2461_v55  ;;  %v1362_v14 = vadd.f32 %v1298_v50, %v1230_v10  ;;  %v2135_v56 = vsel %vm987_vm2, %v2133_v44, %v2134_v35  ;;  %v3233_v16 = vrot.slane %v3023_v57, 2 }
  0xb5   :  { %v5819_v29 = vmax.f32 %v55_v4, 0.0  ;;  %v339_v8 = vmul.f32 %v4977_v22, %v5645_v0  ;;  %v261_v19 = vmul.f32 %v4975_v21, %v5598_v43  ;;  %v824_v53 = vmul.f32 %v4979_v23, %v5645_v0 }
  0xb6   :  { %v3429_v6 = vadd.f32 %v3232_v40, %v2945_v39  ;;  %v1846_v59 = vadd.f32 %v1651_v36, %v1362_v14  ;;  %v2751_v51 = vsel %vm502_vm1, %v2749_v38, %v2750_v61  ;;  %v3234_v2 = vrot.slane %v5814_v7, 2 }
  0xb7   :  { %v551_v47 = vrot.slane %v339_v8, 1  ;;  %v1441_v17 = vmul.f32 %v4983_v25, %v5732_v15  ;;  %v1036_v52 = vrot.slane %v824_v53, 2  ;;  %v1299_v3 = vmul.f32 %v4981_v24, %v5682_v30 }
  0xb8   :  { %4830 = vmatmul.mubr.msk.f32.gmra.mxu0 %vm3477_vm3, %v3429_v6  ;;  %v2330_v41 = vadd.f32 %v2135_v56, %v1846_v59  ;;  %v1925_v43 = vmul.f32 %v4985_v26, %v5732_v15  ;;  %v2541_v54 = vmul.f32 %v5020_v49, %v5819_v29  ;;  %v3025_v46 = vmul.f32 %v5578_v58, %v5819_v29 }
  0xb9   :  { %v552_v0 = vsel %vm502_vm1, %v549_v11, %v551_v47  ;;  %v1652_v50 = vrot.slane %v1441_v17, 1  ;;  %v1037_v18 = vsel %vm987_vm2, %v1034_v63, %v1036_v52  ;;  %v57_v11 = vld [vmem:[%s8859_s0 + $0x128] sm:$0xff]  ;;  %v3235_v1 = vsel %vm987_vm2, %v3233_v16, %v3234_v2 }
  0xba   :  { %v2462_v33 = vadd.f32 %v2398_v27, %v2330_v41  ;;  %v746_v5 = vadd.f32 %v552_v0, %v261_v19  ;;  %v2136_v34 = vrot.slane %v1925_v43, 2  ;;  %v2399_v42 = vmul.f32 %v4991_v31, %v5771_v45 }
  0xbb   :  { %v1653_v28 = vsel %vm502_vm1, %v1650_v9, %v1652_v50  ;;  %v2752_v62 = vrot.slane %v2541_v54, 1  ;;  %v3236_v48 = vrot.slane %v3025_v46, 2  ;;  %v5852_v55 = vmax.f32 %v56_v20, 0.0 }
  0xbc   :  { %v2946_v60 = vadd.f32 %v2751_v51, %v2462_v33  ;;  %v1231_v44 = vadd.f32 %v1037_v18, %v746_v5  ;;  %v2137_v63 = vsel %vm987_vm2, %v2134_v35, %v2136_v34  ;;  %v5856_v10 = vmax.f32 %v57_v11, 0.0 }
  0xbd   :  { %v2753_v40 = vsel %vm502_vm1, %v2750_v61, %v2752_v62  ;;  %v340_v32 = vmul.f32 %v4977_v22, %v5680_v12  ;;  %v341_v36 = vmul.f32 %v4977_v22, %v5682_v30  ;;  %v825_v38 = vmul.f32 %v4979_v23, %v5680_v12 }
  0xbe   :  { %v3430_v4 = vadd.f32 %v3235_v1, %v2946_v60  ;;  %v1363_v9 = vadd.f32 %v1299_v3, %v1231_v44  ;;  %v262_v57 = vmul.f32 %v4975_v21, %v5680_v12  ;;  %v826_v35 = vmul.f32 %v4979_v23, %v5682_v30 }
  0xbf   :  { %v553_v7 = vrot.slane %v340_v32, 1  ;;  %v1442_v39 = vmul.f32 %v4983_v25, %v5769_v37  ;;  %v554_v27 = vrot.slane %v341_v36, 1  ;;  %v1038_v61 = vrot.slane %v825_v38, 2 }
  0xc0   :  { %4832 = vmatprep.mubr.msk.f32.mxu0 %vm3477_vm3, %v3430_v4  ;;  %v1847_v14 = vadd.f32 %v1653_v28, %v1363_v9  ;;  %v1443_v56 = vmul.f32 %v4983_v25, %v5771_v45  ;;  %v1039_v16 = vrot.slane %v826_v35, 2  ;;  %v1300_v8 = vmul.f32 %v4981_v24, %v5769_v37 }
  0xc1   :  { %v1926_v12 = vmul.f32 %v4985_v26, %v5769_v37  ;;  %v1927_v6 = vmul.f32 %v4985_v26, %v5771_v45  ;;  %v555_v19 = vsel %vm502_vm1, %v553_v7, %v554_v27  ;;  %v1654_v53 = vrot.slane %v1442_v39, 1 }
  0xc2   :  { %v2331_v59 = vadd.f32 %v2137_v63, %v1847_v14  ;;  %v1655_v51 = vrot.slane %v1443_v56, 1  ;;  %v747_v47 = vadd.f32 %v555_v19, %v262_v57  ;;  %v1040_v17 = vsel %vm987_vm2, %v1038_v61, %v1039_v16  ;;  %v59_v14 = vld [vmem:[%s8859_s0 + $0x138] sm:$0xff] }
  0xc3   :  { %v2138_v41 = vrot.slane %v1926_v12, 2  ;;  %v2139_v52 = vrot.slane %v1927_v6, 2  ;;  %v3237_v43 = vsel %vm987_vm2, %v3234_v2, %v3236_v48  ;;  %v2542_v0 = vmul.f32 %v5020_v49, %v5852_v55  ;;  %v58_v2 = vld [vmem:[%s8859_s0 + $0x130] sm:$0x3]  ;;  %v60_v6 = vld [vmem:[%s8859_s0 + $0x140] sm:$0xff] }
  0xc4   :  { %v2463_v3 = vadd.f32 %v2399_v42, %v2331_v59  ;;  %v2543_v50 = vmul.f32 %v5020_v49, %v5856_v10  ;;  %v1232_v54 = vadd.f32 %v1040_v17, %v747_v47  ;;  %v2400_v46 = vmul.f32 %v4991_v31, %v5852_v55 }
  0xc5   :  { %v3026_v20 = vmul.f32 %v5578_v58, %v5852_v55  ;;  %v5892_v33 = vmul.f32 %v5578_v58, %v5856_v10  ;;  %v1656_v18 = vsel %vm502_vm1, %v1654_v53, %v1655_v51  ;;  %v2754_v34 = vrot.slane %v2542_v0, 1 }
  0xc6   :  { %v2947_v5 = vadd.f32 %v2753_v40, %v2463_v3  ;;  %v2755_v11 = vrot.slane %v2543_v50, 1  ;;  %v1364_v1 = vadd.f32 %v1300_v8, %v1232_v54  ;;  %v2140_v28 = vsel %vm987_vm2, %v2138_v41, %v2139_v52 }
  0xc7   :  { %v3238_v42 = vrot.slane %v3026_v20, 2  ;;  %v3239_v62 = vrot.slane %v5892_v33, 2  ;;  %v5900_v44 = vmax.f32 %v58_v2, 0.0  ;;  %v342_v48 = vmul.f32 %v4977_v22, %v5732_v15 }
  0xc8   :  { %v3431_v60 = vadd.f32 %v3237_v43, %v2947_v5  ;;  %v827_v63 = vmul.f32 %v4979_v23, %v5732_v15  ;;  %v1848_v40 = vadd.f32 %v1656_v18, %v1364_v1  ;;  %v2756_v32 = vsel %vm502_vm1, %v2754_v34, %v2755_v11 }
  0xc9   :  { %v263_v4 = vmul.f32 %v4975_v21, %v5682_v30  ;;  %v1444_v9 = vmul.f32 %v4983_v25, %v5819_v29  ;;  %v3240_v36 = vsel %vm987_vm2, %v3238_v42, %v3239_v62  ;;  %v556_v38 = vrot.slane %v342_v48, 1 }
  0xca   :  { %4833 = vmatmul.mubr.msk.f32.gmra.mxu0 %vm3477_vm3, %v3431_v60  ;;  %v1041_v57 = vrot.slane %v827_v63, 2  ;;  %v1928_v15 = vmul.f32 %v4985_v26, %v5819_v29  ;;  %v2332_v7 = vadd.f32 %v2140_v28, %v1848_v40  ;;  %v2544_v39 = vmul.f32 %v5020_v49, %v5900_v44 }
  0xcb   :  { %v1657_v35 = vrot.slane %v1444_v9, 1  ;;  %v3028_v30 = vmul.f32 %v5578_v58, %v5900_v44  ;;  %v557_v61 = vsel %vm502_vm1, %v554_v27, %v556_v38  ;;  %v1301_v8 = vmul.f32 %v4981_v24, %v5771_v45 }
  0xcc   :  { %v1042_v56 = vsel %vm987_vm2, %v1039_v16, %v1041_v57  ;;  %v2141_v12 = vrot.slane %v1928_v15, 2  ;;  %v2464_v59 = vadd.f32 %v2400_v46, %v2332_v7  ;;  %v748_v19 = vadd.f32 %v557_v61, %v263_v4 }
  0xcd   :  { %v2401_v53 = vmul.f32 %v4991_v31, %v5856_v10  ;;  %v2757_v47 = vrot.slane %v2544_v39, 1  ;;  %v1658_v17 = vsel %vm502_vm1, %v1655_v51, %v1657_v35  ;;  %v3241_v41 = vrot.slane %v3028_v30, 2 }
  0xce   :  { %v2142_v27 = vsel %vm987_vm2, %v2139_v52, %v2141_v12  ;;  %v5935_v16 = vmax.f32 %v59_v14, 0.0  ;;  %v2948_v3 = vadd.f32 %v2756_v32, %v2464_v59  ;;  %v1233_v43 = vadd.f32 %v1042_v56, %v748_v19 }
  0xcf   :  { %v5937_v0 = vmax.f32 %v60_v6, 0.0  ;;  %v343_v50 = vmul.f32 %v4977_v22, %v5769_v37  ;;  %v264_v54 = vmul.f32 %v4975_v21, %v5769_v37  ;;  %v344_v46 = vmul.f32 %v4977_v22, %v5771_v45 }
  0xd0   :  { %v828_v51 = vmul.f32 %v4979_v23, %v5769_v37  ;;  %v829_v52 = vmul.f32 %v4979_v23, %v5771_v45  ;;  %v3432_v20 = vadd.f32 %v3240_v36, %v2948_v3  ;;  %v1365_v2 = vadd.f32 %v1301_v8, %v1233_v43  ;;  %v61_v8 = vld [vmem:[%s8859_s0 + $0x148] sm:$0x3] }
  0xd1   :  { %v2758_v5 = vsel %vm502_vm1, %v2755_v11, %v2757_v47  ;;  %v558_v18 = vrot.slane %v343_v50, 1  ;;  %v559_v34 = vrot.slane %v344_v46, 1  ;;  %v1445_v42 = vmul.f32 %v4983_v25, %v5852_v55 }
  0xd2   :  { %v1043_v1 = vrot.slane %v828_v51, 2  ;;  %v1044_v28 = vrot.slane %v829_v52, 2  ;;  %4835 = vmatprep.mubr.msk.f32.mxu0 %vm3477_vm3, %v3432_v20  ;;  %v1849_v60 = vadd.f32 %v1658_v17, %v1365_v2  ;;  %v1446_v37 = vmul.f32 %v4983_v25, %v5856_v10 }
  0xd3   :  { %v1929_v48 = vmul.f32 %v4985_v26, %v5852_v55  ;;  %v1930_v63 = vmul.f32 %v4985_v26, %v5856_v10  ;;  %v560_v11 = vsel %vm502_vm1, %v558_v18, %v559_v34  ;;  %v1302_v32 = vmul.f32 %v4981_v24, %v5852_v55 }
  0xd4   :  { %v1045_v40 = vsel %vm987_vm2, %v1043_v1, %v1044_v28  ;;  %v1659_v4 = vrot.slane %v1445_v42, 1  ;;  %v2333_v9 = vadd.f32 %v2142_v27, %v1849_v60  ;;  %v749_v36 = vadd.f32 %v560_v11, %v264_v54 }
  0xd5   :  { %v1660_v38 = vrot.slane %v1446_v37, 1  ;;  %v2143_v57 = vrot.slane %v1929_v48, 2  ;;  %v2144_v15 = vrot.slane %v1930_v63, 2  ;;  %v2545_v7 = vmul.f32 %v5020_v49, %v5935_v16  ;;  %v62_v48 = vld [vmem:[%s8859_s0 + $0x150] sm:$0xff]  ;;  %v63_v63 = vld [vmem:[%s8859_s0 + $0x158] sm:$0xff] }
  0xd6   :  { %v2546_v35 = vmul.f32 %v5020_v49, %v5937_v0  ;;  %v3029_v39 = vmul.f32 %v5578_v58, %v5935_v16  ;;  %v2465_v30 = vadd.f32 %v2401_v53, %v2333_v9  ;;  %v3242_v14 = vsel %vm987_vm2, %v3239_v62, %v3241_v41 }
  0xd7   :  { %v1234_v61 = vadd.f32 %v1045_v40, %v749_v36  ;;  %v5974_v56 = vmul.f32 %v5578_v58, %v5937_v0  ;;  %v1661_v12 = vsel %vm502_vm1, %v1659_v4, %v1660_v38  ;;  %v2402_v6 = vmul.f32 %v4991_v31, %v5935_v16 }
  0xd8   :  { %v2759_v59 = vrot.slane %v2545_v7, 1  ;;  %v2760_v19 = vrot.slane %v2546_v35, 1  ;;  %v2949_v53 = vadd.f32 %v2758_v5, %v2465_v30  ;;  %v3243_v47 = vrot.slane %v3029_v39, 2 }
  0xd9   :  { %v1366_v33 = vadd.f32 %v1302_v32, %v1234_v61  ;;  %v3244_v62 = vrot.slane %v5974_v56, 2  ;;  %v2145_v17 = vsel %vm987_vm2, %v2143_v57, %v2144_v15  ;;  %v5984_v27 = vmax.f32 %v61_v8, 0.0 }
  0xda   :  { %v345_v41 = vmul.f32 %v4977_v22, %v5819_v29  ;;  %v830_v3 = vmul.f32 %v4979_v23, %v5819_v29  ;;  %v3433_v43 = vadd.f32 %v3242_v14, %v2949_v53  ;;  %v2761_v54 = vsel %vm502_vm1, %v2759_v59, %v2760_v19 }
  0xdb   :  { %v1850_v50 = vadd.f32 %v1661_v12, %v1366_v33  ;;  %v265_v46 = vmul.f32 %v4975_v21, %v5771_v45  ;;  %v1447_v20 = vmul.f32 %v4983_v25, %v5900_v44  ;;  %v1931_v2 = vmul.f32 %v4985_v26, %v5900_v44 }
  0xdc   :  { %v561_v51 = vrot.slane %v345_v41, 1  ;;  %v1046_v52 = vrot.slane %v830_v3, 2  ;;  %4836 = vmatmul.mubr.msk.f32.gmra.mxu0 %vm3477_vm3, %v3433_v43  ;;  %v3245_v29 = vsel %vm987_vm2, %v3243_v47, %v3244_v62  ;;  %v2547_v18 = vmul.f32 %v5020_v49, %v5984_v27 }
  0xdd   :  { %v2334_v5 = vadd.f32 %v2145_v17, %v1850_v50  ;;  %v3031_v45 = vmul.f32 %v5578_v58, %v5984_v27  ;;  %v1662_v60 = vrot.slane %v1447_v20, 1  ;;  %v2146_v37 = vrot.slane %v1931_v2, 2 }
  0xde   :  { %v562_v1 = vsel %vm502_vm1, %v559_v34, %v561_v51  ;;  %v1047_v42 = vsel %vm987_vm2, %v1044_v28, %v1046_v52  ;;  %v1303_v32 = vmul.f32 %v4981_v24, %v5856_v10  ;;  %v2762_v4 = vrot.slane %v2547_v18, 1 }
  0xdf   :  { %v2466_v11 = vadd.f32 %v2402_v6, %v2334_v5  ;;  %v750_v40 = vadd.f32 %v562_v1, %v265_v46  ;;  %v1663_v34 = vsel %vm502_vm1, %v1660_v38, %v1662_v60  ;;  %v2147_v28 = vsel %vm987_vm2, %v2144_v15, %v2146_v37  ;;  %v64_v37 = vld [vmem:[%s8859_s0 + $0x160] sm:$0x3] }
  0xe0   :  { %v2403_v9 = vmul.f32 %v4991_v31, %v5937_v0  ;;  %v3246_v36 = vrot.slane %v3031_v45, 2  ;;  %v6019_v35 = vmax.f32 %v62_v48, 0.0  ;;  %v6021_v39 = vmax.f32 %v63_v63, 0.0 }
  0xe1   :  { %v2950_v57 = vadd.f32 %v2761_v54, %v2466_v11  ;;  %v1235_v7 = vadd.f32 %v1047_v42, %v750_v40  ;;  %v2763_v30 = vsel %vm502_vm1, %v2760_v19, %v2762_v4  ;;  %v346_v14 = vmul.f32 %v4977_v22, %v5852_v55 }
  0xe2   :  { %v347_v38 = vmul.f32 %v4977_v22, %v5856_v10  ;;  %v831_v15 = vmul.f32 %v4979_v23, %v5852_v55  ;;  %v266_v12 = vmul.f32 %v4975_v21, %v5852_v55  ;;  %v832_v6 = vmul.f32 %v4979_v23, %v5856_v10 }
  0xe3   :  { %v3434_v61 = vadd.f32 %v3245_v29, %v2950_v57  ;;  %v1367_v8 = vadd.f32 %v1303_v32, %v1235_v7  ;;  %v563_v59 = vrot.slane %v346_v14, 1  ;;  %v1448_v33 = vmul.f32 %v4983_v25, %v5935_v16 }
  0xe4   :  { %v564_v53 = vrot.slane %v347_v38, 1  ;;  %v1048_v19 = vrot.slane %v831_v15, 2  ;;  %v1049_v17 = vrot.slane %v832_v6, 2  ;;  %v1449_v41 = vmul.f32 %v4983_v25, %v5937_v0 }
  0xe5   :  { %4838 = vmatprep.mubr.msk.f32.mxu0 %vm3477_vm3, %v3434_v61  ;;  %v1851_v47 = vadd.f32 %v1663_v34, %v1367_v8  ;;  %v1932_v3 = vmul.f32 %v4985_v26, %v5935_v16  ;;  %v1304_v43 = vmul.f32 %v4981_v24, %v5935_v16  ;;  %v1664_v50 = vrot.slane %v1448_v33, 1 }
  0xe6   :  { %v565_v55 = vsel %vm502_vm1, %v563_v59, %v564_v53  ;;  %v1933_v54 = vmul.f32 %v4985_v26, %v5937_v0  ;;  %v1050_v52 = vsel %vm987_vm2, %v1048_v19, %v1049_v17  ;;  %v1665_v20 = vrot.slane %v1449_v41, 1  ;;  %v65_v41 = vld [vmem:[%s8859_s0 + $0x168] sm:$0xff] }
  0xe7   :  { %v2335_v46 = vadd.f32 %v2147_v28, %v1851_v47  ;;  %v751_v51 = vadd.f32 %v565_v55, %v266_v12  ;;  %v2148_v2 = vrot.slane %v1932_v3, 2  ;;  %v2548_v29 = vmul.f32 %v5020_v49, %v6019_v35 }
  0xe8   :  { %v2149_v5 = vrot.slane %v1933_v54, 2  ;;  %v6051_v18 = vmul.f32 %v5020_v49, %v6021_v39  ;;  %v3247_v1 = vsel %vm987_vm2, %v3244_v62, %v3246_v36  ;;  %v3032_v60 = vmul.f32 %v5578_v58, %v6019_v35 }
  0xe9   :  { %v2467_v45 = vadd.f32 %v2403_v9, %v2335_v46  ;;  %v1236_v42 = vadd.f32 %v1050_v52, %v751_v51  ;;  %v1666_v48 = vsel %vm502_vm1, %v1664_v50, %v1665_v20  ;;  %v2764_v63 = vrot.slane %v2548_v29, 1 }
  0xea   :  { %v2765_v11 = vrot.slane %v6051_v18, 1  ;;  %v6065_v40 = vmul.f32 %v5578_v58, %v6021_v39  ;;  %v2150_v62 = vsel %vm987_vm2, %v2148_v2, %v2149_v5  ;;  %v2404_v4 = vmul.f32 %v4991_v31, %v6019_v35  ;;  %v67_v18 = vld [vmem:[%s8859_s0 + $0x178] sm:$0x3] }
  0xeb   :  { %v2951_v56 = vadd.f32 %v2763_v30, %v2467_v45  ;;  %v1368_v32 = vadd.f32 %v1304_v43, %v1236_v42  ;;  %v3248_v34 = vrot.slane %v3032_v60, 2  ;;  %v6071_v9 = vmax.f32 %v64_v37, 0.0 }
  0xec   :  { %v3249_v28 = vrot.slane %v6065_v40, 2  ;;  %v348_v36 = vmul.f32 %v4977_v22, %v5900_v44  ;;  %v267_v14 = vmul.f32 %v4975_v21, %v5856_v10  ;;  %v833_v30 = vmul.f32 %v4979_v23, %v5900_v44 }
  0xed   :  { %v3435_v57 = vadd.f32 %v3247_v1, %v2951_v56  ;;  %v1852_v7 = vadd.f32 %v1666_v48, %v1368_v32  ;;  %v2766_v38 = vsel %vm502_vm1, %v2764_v63, %v2765_v11  ;;  %v1450_v61 = vmul.f32 %v4983_v25, %v5984_v27 }
  0xee   :  { %v566_v15 = vrot.slane %v348_v36, 1  ;;  %v1934_v8 = vmul.f32 %v4985_v26, %v5984_v27  ;;  %v1051_v6 = vrot.slane %v833_v30, 2  ;;  %v1305_v10 = vmul.f32 %v4981_v24, %v5937_v0 }
  0xef   :  { %4839 = vmatmul.mubr.msk.f32.gmra.mxu0 %vm3477_vm3, %v3435_v57  ;;  %v2336_v12 = vadd.f32 %v2150_v62, %v1852_v7  ;;  %v2550_v44 = vmul.f32 %v5020_v49, %v6071_v9  ;;  %v1667_v19 = vrot.slane %v1450_v61, 1  ;;  %v3034_v47 = vmul.f32 %v5578_v58, %v6071_v9 }
  0xf0   :  { %v567_v59 = vsel %vm502_vm1, %v564_v53, %v566_v15  ;;  %v2151_v33 = vrot.slane %v1934_v8, 2  ;;  %v3250_v55 = vsel %vm987_vm2, %v3248_v34, %v3249_v28  ;;  %v1052_v50 = vsel %vm987_vm2, %v1049_v17, %v1051_v6  ;;  %v66_v53 = vld [vmem:[%s8859_s0 + $0x170] sm:$0xff] }
  0xf1   :  { %v2468_v3 = vadd.f32 %v2404_v4, %v2336_v12  ;;  %v752_v43 = vadd.f32 %v567_v59, %v267_v14  ;;  %v1668_v54 = vsel %vm502_vm1, %v1665_v20, %v1667_v19  ;;  %v2405_v46 = vmul.f32 %v4991_v31, %v6021_v39 }
  0xf2   :  { %v2152_v58 = vsel %vm987_vm2, %v2149_v5, %v2151_v33  ;;  %v2767_v51 = vrot.slane %v2550_v44, 1  ;;  %v3251_v29 = vrot.slane %v3034_v47, 2  ;;  %v6108_v45 = vmax.f32 %v65_v41, 0.0 }
  0xf3   :  { %v2952_v52 = vadd.f32 %v2766_v38, %v2468_v3  ;;  %v1237_v2 = vadd.f32 %v1052_v50, %v752_v43  ;;  %v6110_v1 = vmax.f32 %v66_v53, 0.0  ;;  %v268_v17 = vmul.f32 %v4975_v21, %v5935_v16  ;;  %v6152_v3 = vld [vmem:[%s8860_s1 + $0x8] ss:$0 sm:$0xff] }
  0xf4   :  { %v349_v42 = vmul.f32 %v4977_v22, %v5935_v16  ;;  %v350_v20 = vmul.f32 %v4977_v22, %v5937_v0  ;;  %v834_v37 = vmul.f32 %v4979_v23, %v5935_v16  ;;  %v835_v48 = vmul.f32 %v4979_v23, %v5937_v0 }
  0xf5   :  { %v3436_v5 = vadd.f32 %v3250_v55, %v2952_v52  ;;  %v1369_v60 = vadd.f32 %v1305_v10, %v1237_v2  ;;  %v1306_v32 = vmul.f32 %v4981_v24, %v6019_v35  ;;  %v1451_v62 = vmul.f32 %v4983_v25, %v6019_v35 }
  0xf6   :  { %v568_v63 = vrot.slane %v349_v42, 1  ;;  %v569_v56 = vrot.slane %v350_v20, 1  ;;  %v1053_v34 = vrot.slane %v834_v37, 2  ;;  %v1054_v36 = vrot.slane %v835_v48, 2 }
  0xf7   :  { %4841 = vmatprep.mubr.msk.f32.mxu0 %vm3477_vm3, %v3436_v5  ;;  %v1853_v4 = vadd.f32 %v1668_v54, %v1369_v60  ;;  %v1452_v57 = vmul.f32 %v4983_v25, %v6021_v39  ;;  %v1669_v7 = vrot.slane %v1451_v62, 1  ;;  %v1935_v14 = vmul.f32 %v4985_v26, %v6019_v35 }
  0xf8   :  { %v570_v16 = vsel %vm502_vm1, %v568_v63, %v569_v56  ;;  %v1936_v30 = vmul.f32 %v4985_v26, %v6021_v39  ;;  %v1055_v61 = vsel %vm987_vm2, %v1053_v34, %v1054_v36  ;;  %v2768_v12 = vsel %vm502_vm1, %v2765_v11, %v2767_v51  ;;  %v68_v34 = vld [vmem:[%s8859_s0 + $0x180] sm:$0xff] }
  0xf9   :  { %v2337_v38 = vadd.f32 %v2152_v58, %v1853_v4  ;;  %v753_v15 = vadd.f32 %v570_v16, %v268_v17  ;;  %v1670_v8 = vrot.slane %v1452_v57, 1  ;;  %v2153_v6 = vrot.slane %v1935_v14, 2 }
  0xfa   :  { %v2154_v10 = vrot.slane %v1936_v30, 2  ;;  %v2551_v44 = vmul.f32 %v5020_v49, %v6108_v45  ;;  %v3252_v19 = vsel %vm987_vm2, %v3249_v28, %v3251_v29  ;;  %v2552_v47 = vmul.f32 %v5020_v49, %v6110_v1 }
  0xfb   :  { %v2469_v59 = vadd.f32 %v2405_v46, %v2337_v38  ;;  %v1238_v33 = vadd.f32 %v1055_v61, %v753_v15  ;;  %v1671_v11 = vsel %vm502_vm1, %v1669_v7, %v1670_v8  ;;  %v3035_v40 = vmul.f32 %v6152_v3, %v6108_v45 }
  0xfc   :  { %v2769_v41 = vrot.slane %v2551_v44, 1  ;;  %v6158_v28 = vmul.f32 %v6152_v3, %v6110_v1  ;;  %v2406_v50 = vmul.f32 %v4991_v31, %v6108_v45  ;;  %v2770_v53 = vrot.slane %v2552_v47, 1 }
  0xfd   :  { %v2953_v55 = vadd.f32 %v2768_v12, %v2469_v59  ;;  %v1370_v43 = vadd.f32 %v1306_v32, %v1238_v33  ;;  %v2155_v54 = vsel %vm987_vm2, %v2153_v6, %v2154_v10  ;;  %v3253_v58 = vrot.slane %v3035_v40, 2 }
  0xfe   :  { %v6163_v46 = vmax.f32 %v67_v18, 0.0  ;;  %v351_v51 = vmul.f32 %v4977_v22, %v5984_v27  ;;  %v269_v29 = vmul.f32 %v4975_v21, %v5937_v0  ;;  %v836_v17 = vmul.f32 %v4979_v23, %v5984_v27 }
  0xff   :  { %v3437_v52 = vadd.f32 %v3252_v19, %v2953_v55  ;;  %v1854_v2 = vadd.f32 %v1671_v11, %v1370_v43  ;;  %v2771_v42 = vsel %vm502_vm1, %v2769_v41, %v2770_v53  ;;  %v3254_v20 = vrot.slane %v6158_v28, 2 }
 0x100   :  { %v571_v5 = vrot.slane %v351_v51, 1  ;;  %v1453_v60 = vmul.f32 %v4983_v25, %v6071_v9  ;;  %v1056_v48 = vrot.slane %v836_v17, 2  ;;  %v1307_v63 = vmul.f32 %v4981_v24, %v6021_v39 }
 0x101   :  { %4842 = vmatmul.mubr.msk.f32.gmra.mxu0 %vm3477_vm3, %v3437_v52  ;;  %v2338_v37 = vadd.f32 %v2155_v54, %v1854_v2  ;;  %v1937_v0 = vmul.f32 %v4985_v26, %v6071_v9  ;;  %v2553_v62 = vmul.f32 %v5020_v49, %v6163_v46  ;;  %v3037_v4 = vmul.f32 %v6152_v3, %v6163_v46 }
 0x102   :  { %v572_v27 = vsel %vm502_vm1, %v569_v56, %v571_v5  ;;  %v1672_v32 = vrot.slane %v1453_v60, 1  ;;  %v1057_v7 = vsel %vm987_vm2, %v1054_v36, %v1056_v48  ;;  %v69_v56 = vld [vmem:[%s8859_s0 + $0x188] sm:$0xff]  ;;  %v3255_v30 = vsel %vm987_vm2, %v3253_v58, %v3254_v20 }
 0x103   :  { %v2470_v57 = vadd.f32 %v2406_v50, %v2338_v37  ;;  %v754_v16 = vadd.f32 %v572_v27, %v269_v29  ;;  %v2156_v14 = vrot.slane %v1937_v0, 2  ;;  %v2407_v15 = vmul.f32 %v4991_v31, %v6110_v1 }
 0x104   :  { %v1673_v38 = vsel %vm502_vm1, %v1670_v8, %v1672_v32  ;;  %v2772_v61 = vrot.slane %v2553_v62, 1  ;;  %v3256_v44 = vrot.slane %v3037_v4, 2  ;;  %v6196_v59 = vmax.f32 %v68_v34, 0.0 }
 0x105   :  { %v2954_v12 = vadd.f32 %v2771_v42, %v2470_v57  ;;  %v1239_v6 = vadd.f32 %v1057_v7, %v754_v16  ;;  %v2157_v36 = vsel %vm987_vm2, %v2154_v10, %v2156_v14  ;;  %v6200_v33 = vmax.f32 %v69_v56, 0.0 }
 0x106   :  { %v2773_v19 = vsel %vm502_vm1, %v2770_v53, %v2772_v61  ;;  %v352_v47 = vmul.f32 %v4977_v22, %v6019_v35  ;;  %v353_v11 = vmul.f32 %v4977_v22, %v6021_v39  ;;  %v837_v41 = vmul.f32 %v4979_v23, %v6019_v35 }
 0x107   :  { %v3438_v18 = vadd.f32 %v3255_v30, %v2954_v12  ;;  %v1371_v8 = vadd.f32 %v1307_v63, %v1239_v6  ;;  %v270_v40 = vmul.f32 %v4975_v21, %v6019_v35  ;;  %v838_v10 = vmul.f32 %v4979_v23, %v6021_v39 }
 0x108   :  { %v573_v28 = vrot.slane %v352_v47, 1  ;;  %v1454_v55 = vmul.f32 %v4983_v25, %v6108_v45  ;;  %v574_v50 = vrot.slane %v353_v11, 1  ;;  %v1058_v53 = vrot.slane %v837_v41, 2 }
 0x109   :  { %4844 = vmatprep.mubr.msk.f32.mxu0 %vm3477_vm3, %v3438_v18  ;;  %v1855_v43 = vadd.f32 %v1673_v38, %v1371_v8  ;;  %v1455_v54 = vmul.f32 %v4983_v25, %v6110_v1  ;;  %v1059_v58 = vrot.slane %v838_v10, 2  ;;  %v1308_v51 = vmul.f32 %v4981_v24, %v6108_v45 }
 0x10a   :  { %v1938_v35 = vmul.f32 %v4985_v26, %v6108_v45  ;;  %v1939_v52 = vmul.f32 %v4985_v26, %v6110_v1  ;;  %v575_v29 = vsel %vm502_vm1, %v573_v28, %v574_v50  ;;  %v1674_v17 = vrot.slane %v1454_v55, 1 }
 0x10b   :  { %v2339_v2 = vadd.f32 %v2157_v36, %v1855_v43  ;;  %v1675_v42 = vrot.slane %v1455_v54, 1  ;;  %v755_v5 = vadd.f32 %v575_v29, %v270_v40  ;;  %v1060_v60 = vsel %vm987_vm2, %v1058_v53, %v1059_v58  ;;  %v71_v43 = vld [vmem:[%s8859_s0 + $0x198] sm:$0xff] }
 0x10c   :  { %v2158_v37 = vrot.slane %v1938_v35, 2  ;;  %v2159_v48 = vrot.slane %v1939_v52, 2  ;;  %v3257_v0 = vsel %vm987_vm2, %v3254_v20, %v3256_v44  ;;  %v2554_v27 = vmul.f32 %v5020_v49, %v6196_v59  ;;  %v70_v20 = vld [vmem:[%s8859_s0 + $0x190] sm:$0x3]  ;;  %v72_v52 = vld [vmem:[%s8859_s0 + $0x1a0] sm:$0xff] }
 0x10d   :  { %v2471_v63 = vadd.f32 %v2407_v15, %v2339_v2  ;;  %v2555_v32 = vmul.f32 %v5020_v49, %v6200_v33  ;;  %v1240_v62 = vadd.f32 %v1060_v60, %v755_v5  ;;  %v2408_v4 = vmul.f32 %v4991_v31, %v6196_v59 }
 0x10e   :  { %v3038_v34 = vmul.f32 %v6152_v3, %v6196_v59  ;;  %v6236_v57 = vmul.f32 %v6152_v3, %v6200_v33  ;;  %v1676_v7 = vsel %vm502_vm1, %v1674_v17, %v1675_v42  ;;  %v2774_v14 = vrot.slane %v2554_v27, 1 }
 0x10f   :  { %v2955_v16 = vadd.f32 %v2773_v19, %v2471_v63  ;;  %v2775_v56 = vrot.slane %v2555_v32, 1  ;;  %v1372_v30 = vadd.f32 %v1308_v51, %v1240_v62  ;;  %v2160_v38 = vsel %vm987_vm2, %v2158_v37, %v2159_v48 }
 0x110   :  { %v3258_v15 = vrot.slane %v3038_v34, 2  ;;  %v3259_v61 = vrot.slane %v6236_v57, 2  ;;  %v6244_v6 = vmax.f32 %v70_v20, 0.0  ;;  %v354_v44 = vmul.f32 %v4977_v22, %v6071_v9 }
 0x111   :  { %v3439_v12 = vadd.f32 %v3257_v0, %v2955_v16  ;;  %v839_v36 = vmul.f32 %v4979_v23, %v6071_v9  ;;  %v1856_v19 = vadd.f32 %v1676_v7, %v1372_v30  ;;  %v2776_v47 = vsel %vm502_vm1, %v2774_v14, %v2775_v56 }
 0x112   :  { %v271_v18 = vmul.f32 %v4975_v21, %v6021_v39  ;;  %v1456_v8 = vmul.f32 %v4983_v25, %v6163_v46  ;;  %v3260_v11 = vsel %vm987_vm2, %v3258_v15, %v3259_v61  ;;  %v576_v41 = vrot.slane %v354_v44, 1 }
 0x113   :  { %4845 = vmatmul.mubr.msk.f32.gmra.mxu0 %vm3477_vm3, %v3439_v12  ;;  %v1061_v40 = vrot.slane %v839_v36, 2  ;;  %v1940_v9 = vmul.f32 %v4985_v26, %v6163_v46  ;;  %v2340_v28 = vadd.f32 %v2160_v38, %v1856_v19  ;;  %v2556_v55 = vmul.f32 %v5020_v49, %v6244_v6 }
 0x114   :  { %v1677_v10 = vrot.slane %v1456_v8, 1  ;;  %v3040_v39 = vmul.f32 %v6152_v3, %v6244_v6  ;;  %v577_v53 = vsel %vm502_vm1, %v574_v50, %v576_v41  ;;  %v1309_v51 = vmul.f32 %v4981_v24, %v6110_v1 }
 0x115   :  { %v1062_v54 = vsel %vm987_vm2, %v1059_v58, %v1061_v40  ;;  %v2161_v35 = vrot.slane %v1940_v9, 2  ;;  %v2472_v2 = vadd.f32 %v2408_v4, %v2340_v28  ;;  %v756_v29 = vadd.f32 %v577_v53, %v271_v18 }
 0x116   :  { %v2409_v17 = vmul.f32 %v4991_v31, %v6200_v33  ;;  %v2777_v5 = vrot.slane %v2556_v55, 1  ;;  %v1678_v60 = vsel %vm502_vm1, %v1675_v42, %v1677_v10  ;;  %v3261_v37 = vrot.slane %v3040_v39, 2  ;;  %v73_v39 = vld [vmem:[%s8859_s0 + $0x1a8] sm:$0x3] }
 0x117   :  { %v2162_v50 = vsel %vm987_vm2, %v2159_v48, %v2161_v35  ;;  %v179_v58 = vmax.f32 %v71_v43, 0.0  ;;  %v2956_v63 = vadd.f32 %v2776_v47, %v2472_v2  ;;  %v1241_v0 = vadd.f32 %v1062_v54, %v756_v29 }
 0x118   :  { %v6279_v27 = vmax.f32 %v72_v52, 0.0  ;;  %v355_v32 = vmul.f32 %v4977_v22, %v6108_v45  ;;  %v272_v62 = vmul.f32 %v4975_v21, %v6108_v45  ;;  %v356_v4 = vmul.f32 %v4977_v22, %v6110_v1 }
 0x119   :  { %v840_v42 = vmul.f32 %v4979_v23, %v6108_v45  ;;  %v841_v48 = vmul.f32 %v4979_v23, %v6110_v1  ;;  %v3440_v34 = vadd.f32 %v3260_v11, %v2956_v63  ;;  %v1373_v20 = vadd.f32 %v1309_v51, %v1241_v0 }
 0x11a   :  { %v2778_v16 = vsel %vm502_vm1, %v2775_v56, %v2777_v5  ;;  %v578_v7 = vrot.slane %v355_v32, 1  ;;  %v579_v14 = vrot.slane %v356_v4, 1  ;;  %v1457_v15 = vmul.f32 %v4983_v25, %v6196_v59 }
 0x11b   :  { %v1063_v30 = vrot.slane %v840_v42, 2  ;;  %v1064_v38 = vrot.slane %v841_v48, 2  ;;  %4847 = vmatprep.mubr.msk.f32.mxu0 %vm3477_vm3, %v3440_v34  ;;  %v1857_v12 = vadd.f32 %v1678_v60, %v1373_v20  ;;  %v6297_v45 = vmul.f32 %v4983_v25, %v6200_v33 }
 0x11c   :  { %v1941_v44 = vmul.f32 %v4985_v26, %v6196_v59  ;;  %v6303_v56 = vmul.f32 %v4985_v26, %v6200_v33  ;;  %v580_v36 = vsel %vm502_vm1, %v578_v7, %v579_v14  ;;  %v1310_v47 = vmul.f32 %v4981_v24, %v6196_v59  ;;  %v75_v7 = vld [vmem:[%s8859_s0 + $0x1b8] sm:$0xff] }
 0x11d   :  { %v1065_v19 = vsel %vm987_vm2, %v1063_v30, %v1064_v38  ;;  %v1679_v18 = vrot.slane %v1457_v15, 1  ;;  %v2341_v8 = vadd.f32 %v2162_v50, %v1857_v12  ;;  %v757_v11 = vadd.f32 %v580_v36, %v272_v62  ;;  %v77_v36 = vld [vmem:[%s8859_s0 + $0x1c8] sm:$0xff] }
 0x11e   :  { %v1680_v41 = vrot.slane %v6297_v45, 1  ;;  %v2163_v40 = vrot.slane %v1941_v44, 2  ;;  %v2164_v9 = vrot.slane %v6303_v56, 2  ;;  %v2557_v28 = vmul.f32 %v5020_v49, %v179_v58 }
 0x11f   :  { %v2558_v10 = vmul.f32 %v5020_v49, %v6279_v27  ;;  %v3041_v55 = vmul.f32 %v6152_v3, %v179_v58  ;;  %v2473_v59 = vadd.f32 %v2409_v17, %v2341_v8  ;;  %v3262_v43 = vsel %vm987_vm2, %v3259_v61, %v3261_v37 }
 0x120   :  { %v1242_v53 = vadd.f32 %v1065_v19, %v757_v11  ;;  %v3042_v54 = vmul.f32 %v6152_v3, %v6279_v27  ;;  %v1681_v51 = vsel %vm502_vm1, %v1679_v18, %v1680_v41  ;;  %v2410_v35 = vmul.f32 %v4991_v31, %v179_v58  ;;  %v78_v19 = vld [vmem:[%s8859_s0 + $0x1d0] sm:$0xff] }
 0x121   :  { %v2779_v52 = vrot.slane %v2557_v28, 1  ;;  %v2780_v2 = vrot.slane %v2558_v10, 1  ;;  %v2957_v29 = vadd.f32 %v2778_v16, %v2473_v59  ;;  %v2165_v60 = vsel %vm987_vm2, %v2163_v40, %v2164_v9 }
 0x122   :  { %v1374_v5 = vadd.f32 %v1310_v47, %v1242_v53  ;;  %v181_v50 = vmax.f32 %v73_v39, 0.0  ;;  %v3263_v17 = vrot.slane %v3041_v55, 2  ;;  %v3264_v63 = vrot.slane %v3042_v54, 2 }
 0x123   :  { %v357_v57 = vmul.f32 %v4977_v22, %v6163_v46  ;;  %v842_v61 = vmul.f32 %v4979_v23, %v6163_v46  ;;  %v3441_v37 = vadd.f32 %v3262_v43, %v2957_v29  ;;  %v2781_v32 = vsel %vm502_vm1, %v2779_v52, %v2780_v2  ;;  %v81_v29 = vld [vmem:[%s8859_s0 + $0x1e8] sm:$0xff] }
 0x124   :  { %v1858_v0 = vadd.f32 %v1681_v51, %v1374_v5  ;;  %v273_v58 = vmul.f32 %v4975_v21, %v6110_v1  ;;  %v1459_v42 = vmul.f32 %v4983_v25, %v6244_v6  ;;  %v1943_v48 = vmul.f32 %v4985_v26, %v6244_v6  ;;  %v74_v1 = vld [vmem:[%s8859_s0 + $0x1b0] sm:$0xff] }
 0x125   :  { %v581_v62 = vrot.slane %v357_v57, 1  ;;  %v1066_v4 = vrot.slane %v842_v61, 2  ;;  %4848 = vmatmul.mubr.msk.f32.gmra.mxu0 %vm3477_vm3, %v3441_v37  ;;  %v1311_v46 = vmul.f32 %v4981_v24, %v6200_v33  ;;  %v2559_v20 = vmul.f32 %v5020_v49, %v181_v50 }
 0x126   :  { %v2342_v34 = vadd.f32 %v2165_v60, %v1858_v0  ;;  %v3043_v16 = vmul.f32 %v6152_v3, %v181_v50  ;;  %v1682_v15 = vrot.slane %v1459_v42, 1  ;;  %v2166_v12 = vrot.slane %v1943_v48, 2 }
 0x127   :  { %v582_v6 = vsel %vm502_vm1, %v579_v14, %v581_v62  ;;  %v1067_v30 = vsel %vm987_vm2, %v1064_v38, %v1066_v4  ;;  %v2782_v44 = vrot.slane %v2559_v20, 1  ;;  %v3265_v47 = vsel %vm987_vm2, %v3263_v17, %v3264_v63  ;;  %v80_v38 = vld [vmem:[%s8859_s0 + $0x1e0] sm:$0xff] }
 0x128   :  { %v2474_v45 = vadd.f32 %v2410_v35, %v2342_v34  ;;  %v758_v33 = vadd.f32 %v582_v6, %v273_v58  ;;  %v3266_v56 = vrot.slane %v3043_v16, 2  ;;  %v2411_v14 = vmul.f32 %v4991_v31, %v6279_v27  ;;  %v76_v34 = vld [vmem:[%s8859_s0 + $0x1c0] sm:$0x3] }
 0x129   :  { %v182_v18 = vmax.f32 %v74_v1, 0.0  ;;  %v6362_v8 = vmax.f32 %v75_v7, 0.0  ;;  %v1683_v28 = vsel %vm502_vm1, %v1680_v41, %v1682_v15  ;;  %v2167_v10 = vsel %vm987_vm2, %v2164_v9, %v2166_v12  ;;  %v79_v12 = vld [vmem:[%s8859_s0 + $0x1d8] sm:$0x3] }
 0x12a   :  { %v2958_v11 = vadd.f32 %v2781_v32, %v2474_v45  ;;  %v1243_v40 = vadd.f32 %v1067_v30, %v758_v33  ;;  %v2783_v55 = vsel %vm502_vm1, %v2780_v2, %v2782_v44  ;;  %v3267_v39 = vsel %vm987_vm2, %v3264_v63, %v3266_v56  ;;  %v82_v56 = vld [vmem:[%s8859_s0 + $0x1f0] sm:$0x3] }
 0x12b   :  { %v6368_v59 = vmax.f32 %v77_v36, 0.0  ;;  %v6370_v27 = vmax.f32 %v78_v19, 0.0  ;;  %v6372_v54 = vmax.f32 %v80_v38, 0.0  ;;  %v358_v51 = vmul.f32 %v4977_v22, %v182_v18 }
 0x12c   :  { %v3442_v43 = vadd.f32 %v3265_v47, %v2958_v11  ;;  %v1375_v53 = vadd.f32 %v1311_v46, %v1243_v40  ;;  %v274_v35 = vmul.f32 %v4975_v21, %v182_v18  ;;  %v6378_v41 = vmul.f32 %v4977_v22, %v6362_v8 }
 0x12d   :  { %v843_v9 = vmul.f32 %v4979_v23, %v182_v18  ;;  %v6383_v52 = vmul.f32 %v4979_v23, %v6362_v8  ;;  %v583_v5 = vrot.slane %v358_v51, 1  ;;  %v1460_v60 = vmul.f32 %v4983_v25, %v6368_v59 }
 0x12e   :  { %4850 = vmatprep.mubr.msk.f32.mxu0 %vm3477_vm3, %v3442_v43  ;;  %v1859_v2 = vadd.f32 %v1683_v28, %v1375_v53  ;;  %v6393_v50 = vmul.f32 %v4983_v25, %v6370_v27  ;;  %v584_v17 = vrot.slane %v6378_v41, 1  ;;  %v1944_v61 = vmul.f32 %v4985_v26, %v6368_v59 }
 0x12f   :  { %v1068_v63 = vrot.slane %v843_v9, 2  ;;  %v1069_v57 = vrot.slane %v6383_v52, 2  ;;  %v1684_v0 = vrot.slane %v1460_v60, 1  ;;  %v1945_v58 = vmul.f32 %v4985_v26, %v6370_v27 }
 0x130   :  { %v2343_v37 = vadd.f32 %v2167_v10, %v1859_v2  ;;  %v1685_v32 = vrot.slane %v6393_v50, 1  ;;  %v6402_v62 = vmax.f32 %v81_v29, 0.0  ;;  %v585_v4 = vsel %vm502_vm1, %v583_v5, %v584_v17 }
 0x131   :  { %v1070_v42 = vsel %vm987_vm2, %v1068_v63, %v1069_v57  ;;  %v1312_v48 = vmul.f32 %v4981_v24, %v6368_v59  ;;  %v759_v20 = vadd.f32 %v585_v4, %v274_v35  ;;  %v2168_v16 = vrot.slane %v1944_v61, 2  ;;  %v83_v63 = vld [vmem:[%s8859_s0 + $0x1f8] sm:$0xff] }
 0x132   :  { %v2475_v46 = vadd.f32 %v2411_v14, %v2343_v37  ;;  %v2169_v1 = vrot.slane %v1945_v58, 2  ;;  %v2560_v7 = vmul.f32 %v5020_v49, %v6372_v54  ;;  %v2561_v6 = vmul.f32 %v5020_v49, %v6402_v62 }
 0x133   :  { %v3044_v30 = vmul.f32 %v6152_v3, %v6372_v54  ;;  %v6419_v15 = vmul.f32 %v6152_v3, %v6402_v62  ;;  %v1244_v33 = vadd.f32 %v1070_v42, %v759_v20  ;;  %v1686_v44 = vsel %vm502_vm1, %v1684_v0, %v1685_v32 }
 0x134   :  { %v2959_v45 = vadd.f32 %v2783_v55, %v2475_v46  ;;  %v184_v36 = vmax.f32 %v76_v34, 0.0  ;;  %v2784_v19 = vrot.slane %v2560_v7, 1  ;;  %v2785_v47 = vrot.slane %v2561_v6, 1  ;;  %v84_v46 = vld [vmem:[%s8859_s0 + $0x200] sm:$0xff] }
 0x135   :  { %v3268_v14 = vrot.slane %v3044_v30, 2  ;;  %v3269_v38 = vrot.slane %v6419_v15, 2  ;;  %v1376_v11 = vadd.f32 %v1312_v48, %v1244_v33  ;;  %v2412_v40 = vmul.f32 %v4991_v31, %v6372_v54 }
 0x136   :  { %v3443_v18 = vadd.f32 %v3267_v39, %v2959_v45  ;;  %v6431_v28 = vmax.f32 %v79_v12, 0.0  ;;  %v2170_v10 = vsel %vm987_vm2, %v2168_v16, %v2169_v1  ;;  %v2786_v55 = vsel %vm502_vm1, %v2784_v19, %v2785_v47 }
 0x137   :  { %v6435_v43 = vmax.f32 %v82_v56, 0.0  ;;  %v360_v53 = vmul.f32 %v4977_v22, %v184_v36  ;;  %v1860_v51 = vadd.f32 %v1686_v44, %v1376_v11  ;;  %v275_v39 = vmul.f32 %v4975_v21, %v6362_v8 }
 0x138   :  { %4851 = vmatmul.mubr.msk.f32.gmra.mxu0 %vm3477_vm3, %v3443_v18  ;;  %v845_v35 = vmul.f32 %v4979_v23, %v184_v36  ;;  %v1462_v41 = vmul.f32 %v4983_v25, %v6431_v28  ;;  %v3270_v9 = vsel %vm987_vm2, %v3268_v14, %v3269_v38  ;;  %v1946_v2 = vmul.f32 %v4985_v26, %v6431_v28 }
 0x139   :  { %v586_v52 = vrot.slane %v360_v53, 1  ;;  %v2562_v29 = vmul.f32 %v5020_v49, %v6435_v43  ;;  %v2344_v5 = vadd.f32 %v2170_v10, %v1860_v51  ;;  %v3046_v8 = vmul.f32 %v6152_v3, %v6435_v43 }
 0x13a   :  { %v1071_v60 = vrot.slane %v845_v35, 2  ;;  %v1687_v50 = vrot.slane %v1462_v41, 1  ;;  %v1313_v37 = vmul.f32 %v4981_v24, %v6370_v27  ;;  %v2171_v0 = vrot.slane %v1946_v2, 2 }
 0x13b   :  { %v587_v61 = vsel %vm502_vm1, %v584_v17, %v586_v52  ;;  %v2787_v58 = vrot.slane %v2562_v29, 1  ;;  %v2476_v4 = vadd.f32 %v2412_v40, %v2344_v5  ;;  %v2413_v34 = vmul.f32 %v4991_v31, %v6402_v62 }
 0x13c   :  { %v760_v42 = vadd.f32 %v587_v61, %v275_v39  ;;  %v1072_v48 = vsel %vm987_vm2, %v1069_v57, %v1071_v60  ;;  %v1688_v20 = vsel %vm502_vm1, %v1685_v32, %v1687_v50  ;;  %v2172_v17 = vsel %vm987_vm2, %v2169_v1, %v2171_v0  ;;  %v85_v0 = vld [vmem:[%s8859_s0 + $0x208] sm:$0x3] }
 0x13d   :  { %v2788_v16 = vsel %vm502_vm1, %v2785_v47, %v2787_v58  ;;  %v6468_v7 = vmax.f32 %v83_v63, 0.0  ;;  %v2960_v6 = vadd.f32 %v2786_v55, %v2476_v4  ;;  %v3271_v12 = vrot.slane %v3046_v8, 2 }
 0x13e   :  { %v1245_v30 = vadd.f32 %v1072_v48, %v760_v42  ;;  %v361_v57 = vmul.f32 %v4977_v22, %v6368_v59  ;;  %v6472_v45 = vmax.f32 %v84_v46, 0.0  ;;  %v362_v33 = vmul.f32 %v4977_v22, %v6370_v27 }
 0x13f   :  { %v846_v32 = vmul.f32 %v4979_v23, %v6368_v59  ;;  %v847_v1 = vmul.f32 %v4979_v23, %v6370_v27  ;;  %v3444_v44 = vadd.f32 %v3270_v9, %v2960_v6  ;;  %v276_v36 = vmul.f32 %v4975_v21, %v6368_v59 }
 0x140   :  { %v1377_v56 = vadd.f32 %v1313_v37, %v1245_v30  ;;  %v588_v19 = vrot.slane %v361_v57, 1  ;;  %v589_v47 = vrot.slane %v362_v33, 1  ;;  %v1463_v11 = vmul.f32 %v4983_v25, %v6372_v54 }
 0x141   :  { %v1073_v14 = vrot.slane %v846_v32, 2  ;;  %v1074_v18 = vrot.slane %v847_v1, 2  ;;  %4853 = vmatprep.mubr.msk.f32.mxu1 %vm3477_vm3, %v3444_v44  ;;  %v1464_v10 = vmul.f32 %v4983_v25, %v6402_v62  ;;  %v1947_v55 = vmul.f32 %v4985_v26, %v6372_v54 }
 0x142   :  { %v1861_v40 = vadd.f32 %v1688_v20, %v1377_v56  ;;  %v1948_v53 = vmul.f32 %v4985_v26, %v6402_v62  ;;  %v590_v59 = vsel %vm502_vm1, %v588_v19, %v589_v47  ;;  %v1314_v39 = vmul.f32 %v4981_v24, %v6372_v54 }
 0x143   :  { %v1075_v51 = vsel %vm987_vm2, %v1073_v14, %v1074_v18  ;;  %v1689_v35 = vrot.slane %v1463_v11, 1  ;;  %v761_v9 = vadd.f32 %v590_v59, %v276_v36  ;;  %v1690_v52 = vrot.slane %v1464_v10, 1 }
 0x144   :  { %v2345_v41 = vadd.f32 %v2172_v17, %v1861_v40  ;;  %v2173_v2 = vrot.slane %v1947_v55, 2  ;;  %v2174_v29 = vrot.slane %v1948_v53, 2  ;;  %v2563_v5 = vmul.f32 %v5020_v49, %v6468_v7  ;;  %v86_v55 = vld [vmem:[%s8859_s0 + $0x210] sm:$0xff]  ;;  %v87_v53 = vld [vmem:[%s8859_s0 + $0x218] sm:$0xff] }
 0x145   :  { %v2564_v60 = vmul.f32 %v5020_v49, %v6472_v45  ;;  %v3047_v50 = vmul.f32 %v6152_v3, %v6468_v7  ;;  %v3272_v63 = vsel %vm987_vm2, %v3269_v38, %v3271_v12  ;;  %v1246_v61 = vadd.f32 %v1075_v51, %v761_v9 }
 0x146   :  { %v2477_v8 = vadd.f32 %v2413_v34, %v2345_v41  ;;  %v6506_v37 = vmul.f32 %v6152_v3, %v6472_v45  ;;  %v1691_v58 = vsel %vm502_vm1, %v1689_v35, %v1690_v52  ;;  %v2414_v4 = vmul.f32 %v4991_v31, %v6468_v7 }
 0x147   :  { %v2789_v42 = vrot.slane %v2563_v5, 1  ;;  %v2790_v48 = vrot.slane %v2564_v60, 1  ;;  %v1378_v15 = vadd.f32 %v1314_v39, %v1246_v61  ;;  %v3273_v46 = vrot.slane %v3047_v50, 2 }
 0x148   :  { %v2961_v34 = vadd.f32 %v2788_v16, %v2477_v8  ;;  %v3274_v38 = vrot.slane %v6506_v37, 2  ;;  %v2175_v20 = vsel %vm987_vm2, %v2173_v2, %v2174_v29  ;;  %v6516_v17 = vmax.f32 %v85_v0, 0.0 }
 0x149   :  { %v363_v6 = vmul.f32 %v4977_v22, %v6431_v28  ;;  %v848_v30 = vmul.f32 %v4979_v23, %v6431_v28  ;;  %v1862_v57 = vadd.f32 %v1691_v58, %v1378_v15  ;;  %v2791_v33 = vsel %vm502_vm1, %v2789_v42, %v2790_v48 }
 0x14a   :  { %v3445_v12 = vadd.f32 %v3272_v63, %v2961_v34  ;;  %v277_v16 = vmul.f32 %v4975_v21, %v6370_v27  ;;  %v1465_v44 = vmul.f32 %v4983_v25, %v6435_v43  ;;  %v1949_v56 = vmul.f32 %v4985_v26, %v6435_v43 }
 0x14b   :  { %v591_v32 = vrot.slane %v363_v6, 1  ;;  %v1076_v1 = vrot.slane %v848_v30, 2  ;;  %v2346_v36 = vadd.f32 %v2175_v20, %v1862_v57  ;;  %v3275_v28 = vsel %vm987_vm2, %v3273_v46, %v3274_v38 }
 0x14c   :  { %4854 = vmatmul.mubr.msk.f32.vlgmr.msra.gmra.mxu1 %vm3477_vm3, %v3445_v12  ;;  %v2565_v19 = vmul.f32 %v5020_v49, %v6516_v17  ;;  %v3049_v27 = vmul.f32 %v6152_v3, %v6516_v17  ;;  %v1692_v40 = vrot.slane %v1465_v44, 1  ;;  %v2176_v10 = vrot.slane %v1949_v56, 2 }
 0x14d   :  { %v592_v14 = vsel %vm502_vm1, %v589_v47, %v591_v32  ;;  %v1077_v11 = vsel %vm987_vm2, %v1074_v18, %v1076_v1  ;;  %v2478_v59 = vadd.f32 %v2414_v4, %v2346_v36  ;;  %v1315_v39 = vmul.f32 %v4981_v24, %v6402_v62 }
 0x14e   :  { %v762_v51 = vadd.f32 %v592_v14, %v277_v16  ;;  %v2792_v35 = vrot.slane %v2565_v19, 1  ;;  %v1693_v47 = vsel %vm502_vm1, %v1690_v52, %v1692_v40  ;;  %v2177_v18 = vsel %vm987_vm2, %v2174_v29, %v2176_v10  ;;  %v88_v10 = vld [vmem:[%s8859_s0 + $0x220] sm:$0x3] }
 0x14f   :  { %v2415_v41 = vmul.f32 %v4991_v31, %v6472_v45  ;;  %v3276_v9 = vrot.slane %v3049_v27, 2  ;;  %v2962_v2 = vadd.f32 %v2791_v33, %v2478_v59  ;;  %v6551_v60 = vmax.f32 %v86_v55, 0.0 }
 0x150   :  { %v1247_v5 = vadd.f32 %v1077_v11, %v762_v51  ;;  %v6553_v50 = vmax.f32 %v87_v53, 0.0  ;;  %v2793_v8 = vsel %vm502_vm1, %v2790_v48, %v2792_v35  ;;  %v364_v63 = vmul.f32 %v4977_v22, %v6372_v54 }
 0x151   :  { %v365_v52 = vmul.f32 %v4977_v22, %v6402_v62  ;;  %v849_v29 = vmul.f32 %v4979_v23, %v6372_v54  ;;  %v3446_v61 = vadd.f32 %v3275_v28, %v2962_v2  ;;  %v278_v58 = vmul.f32 %v4975_v21, %v6372_v54 }
 0x152   :  { %v1379_v0 = vadd.f32 %v1315_v39, %v1247_v5  ;;  %v850_v4 = vmul.f32 %v4979_v23, %v6402_v62  ;;  %v593_v42 = vrot.slane %v364_v63, 1  ;;  %v1466_v15 = vmul.f32 %v4983_v25, %v6468_v7 }
 0x153   :  { %v594_v34 = vrot.slane %v365_v52, 1  ;;  %v1078_v48 = vrot.slane %v849_v29, 2  ;;  %4856 = vmatprep.mubr.msk.f32.mxu1 %vm3477_vm3, %v3446_v61  ;;  %v1467_v6 = vmul.f32 %v4983_v25, %v6472_v45  ;;  %v1950_v30 = vmul.f32 %v4985_v26, %v6468_v7 }
 0x154   :  { %v1863_v46 = vadd.f32 %v1693_v47, %v1379_v0  ;;  %v1079_v20 = vrot.slane %v850_v4, 2  ;;  %v1316_v12 = vmul.f32 %v4981_v24, %v6468_v7  ;;  %v1694_v57 = vrot.slane %v1466_v15, 1 }
 0x155   :  { %v595_v54 = vsel %vm502_vm1, %v593_v42, %v594_v34  ;;  %v1951_v33 = vmul.f32 %v4985_v26, %v6472_v45  ;;  %v1695_v44 = vrot.slane %v1467_v6, 1  ;;  %v2178_v56 = vrot.slane %v1950_v30, 2  ;;  %v89_v6 = vld [vmem:[%s8859_s0 + $0x228] sm:$0xff] }
 0x156   :  { %v2347_v16 = vadd.f32 %v2177_v18, %v1863_v46  ;;  %v763_v32 = vadd.f32 %v595_v54, %v278_v58  ;;  %v1080_v1 = vsel %vm987_vm2, %v1078_v48, %v1079_v20  ;;  %v2566_v28 = vmul.f32 %v5020_v49, %v6551_v60 }
 0x157   :  { %v2179_v36 = vrot.slane %v1951_v33, 2  ;;  %v6583_v19 = vmul.f32 %v5020_v49, %v6553_v50  ;;  %v3277_v14 = vsel %vm987_vm2, %v3274_v38, %v3276_v9  ;;  %v3050_v40 = vmul.f32 %v6152_v3, %v6551_v60 }
 0x158   :  { %v2479_v27 = vadd.f32 %v2415_v41, %v2347_v16  ;;  %v1248_v11 = vadd.f32 %v1080_v1, %v763_v32  ;;  %v1696_v55 = vsel %vm502_vm1, %v1694_v57, %v1695_v44  ;;  %v2794_v53 = vrot.slane %v2566_v28, 1 }
 0x159   :  { %v2795_v59 = vrot.slane %v6583_v19, 1  ;;  %v6597_v51 = vmul.f32 %v6152_v3, %v6553_v50  ;;  %v2180_v38 = vsel %vm987_vm2, %v2178_v56, %v2179_v36  ;;  %v2416_v35 = vmul.f32 %v4991_v31, %v6551_v60  ;;  %v91_v19 = vld [vmem:[%s8859_s0 + $0x238] sm:$0x3] }
 0x15a   :  { %v2963_v37 = vadd.f32 %v2793_v8, %v2479_v27  ;;  %v1380_v39 = vadd.f32 %v1316_v12, %v1248_v11  ;;  %v3278_v47 = vrot.slane %v3050_v40, 2  ;;  %v6603_v41 = vmax.f32 %v88_v10, 0.0 }
 0x15b   :  { %v3279_v18 = vrot.slane %v6597_v51, 2  ;;  %v366_v9 = vmul.f32 %v4977_v22, %v6435_v43  ;;  %v279_v63 = vmul.f32 %v4975_v21, %v6402_v62  ;;  %v851_v8 = vmul.f32 %v4979_v23, %v6435_v43 }
 0x15c   :  { %v3447_v2 = vadd.f32 %v3277_v14, %v2963_v37  ;;  %v1864_v5 = vadd.f32 %v1696_v55, %v1380_v39  ;;  %v2796_v52 = vsel %vm502_vm1, %v2794_v53, %v2795_v59  ;;  %v1468_v61 = vmul.f32 %v4983_v25, %v6516_v17 }
 0x15d   :  { %v596_v29 = vrot.slane %v366_v9, 1  ;;  %v1952_v0 = vmul.f32 %v4985_v26, %v6516_v17  ;;  %v1081_v4 = vrot.slane %v851_v8, 2  ;;  %v1317_v62 = vmul.f32 %v4981_v24, %v6472_v45 }
 0x15e   :  { %4857 = vmatmul.mubr.msk.f32.gmra.mxu1 %vm3477_vm3, %v3447_v2  ;;  %v2348_v58 = vadd.f32 %v2180_v38, %v1864_v5  ;;  %v2568_v43 = vmul.f32 %v5020_v49, %v6603_v41  ;;  %v1697_v48 = vrot.slane %v1468_v61, 1  ;;  %v3052_v46 = vmul.f32 %v6152_v3, %v6603_v41 }
 0x15f   :  { %v597_v42 = vsel %vm502_vm1, %v594_v34, %v596_v29  ;;  %v2181_v15 = vrot.slane %v1952_v0, 2  ;;  %v3280_v54 = vsel %vm987_vm2, %v3278_v47, %v3279_v18  ;;  %v1082_v57 = vsel %vm987_vm2, %v1079_v20, %v1081_v4  ;;  %v90_v34 = vld [vmem:[%s8859_s0 + $0x230] sm:$0xff] }
 0x160   :  { %v2480_v30 = vadd.f32 %v2416_v35, %v2348_v58  ;;  %v764_v12 = vadd.f32 %v597_v42, %v279_v63  ;;  %v1698_v33 = vsel %vm502_vm1, %v1695_v44, %v1697_v48  ;;  %v2417_v32 = vmul.f32 %v4991_v31, %v6553_v50 }
 0x161   :  { %v2182_v16 = vsel %vm987_vm2, %v2179_v36, %v2181_v15  ;;  %v2797_v1 = vrot.slane %v2568_v43, 1  ;;  %v3281_v27 = vrot.slane %v3052_v46, 2  ;;  %v6640_v14 = vmax.f32 %v89_v6, 0.0 }
 0x162   :  { %v2964_v56 = vadd.f32 %v2796_v52, %v2480_v30  ;;  %v1249_v28 = vadd.f32 %v1082_v57, %v764_v12  ;;  %v6642_v11 = vmax.f32 %v90_v34, 0.0  ;;  %v280_v20 = vmul.f32 %v4975_v21, %v6468_v7 }
 0x163   :  { %v367_v40 = vmul.f32 %v4977_v22, %v6468_v7  ;;  %v368_v44 = vmul.f32 %v4977_v22, %v6472_v45  ;;  %v852_v55 = vmul.f32 %v4979_v23, %v6468_v7  ;;  %v853_v53 = vmul.f32 %v4979_v23, %v6472_v45 }
 0x164   :  { %v3448_v36 = vadd.f32 %v3280_v54, %v2964_v56  ;;  %v1381_v10 = vadd.f32 %v1317_v62, %v1249_v28  ;;  %v1318_v38 = vmul.f32 %v4981_v24, %v6551_v60  ;;  %v1469_v35 = vmul.f32 %v4983_v25, %v6551_v60 }
 0x165   :  { %v598_v37 = vrot.slane %v367_v40, 1  ;;  %v599_v39 = vrot.slane %v368_v44, 1  ;;  %v1083_v9 = vrot.slane %v852_v55, 2  ;;  %v1084_v2 = vrot.slane %v853_v53, 2 }
 0x166   :  { %4859 = vmatprep.mubr.msk.f32.mxu1 %vm3477_vm3, %v3448_v36  ;;  %v1865_v47 = vadd.f32 %v1698_v33, %v1381_v10  ;;  %v1470_v5 = vmul.f32 %v4983_v25, %v6553_v50  ;;  %v1699_v63 = vrot.slane %v1469_v35, 1  ;;  %v1953_v8 = vmul.f32 %v4985_v26, %v6551_v60 }
 0x167   :  { %v600_v7 = vsel %vm502_vm1, %v598_v37, %v599_v39  ;;  %v1954_v52 = vmul.f32 %v4985_v26, %v6553_v50  ;;  %v1085_v0 = vsel %vm987_vm2, %v1083_v9, %v1084_v2  ;;  %v2798_v4 = vsel %vm502_vm1, %v2795_v59, %v2797_v1  ;;  %v92_v9 = vld [vmem:[%s8859_s0 + $0x240] sm:$0xff] }
 0x168   :  { %v2349_v29 = vadd.f32 %v2182_v16, %v1865_v47  ;;  %v765_v61 = vadd.f32 %v600_v7, %v280_v20  ;;  %v1700_v58 = vrot.slane %v1470_v5, 1  ;;  %v2183_v62 = vrot.slane %v1953_v8, 2 }
 0x169   :  { %v2184_v43 = vrot.slane %v1954_v52, 2  ;;  %v2569_v42 = vmul.f32 %v5020_v49, %v6640_v14  ;;  %v3282_v15 = vsel %vm987_vm2, %v3279_v18, %v3281_v27  ;;  %v2570_v6 = vmul.f32 %v5020_v49, %v6642_v11 }
 0x16a   :  { %v2481_v48 = vadd.f32 %v2417_v32, %v2349_v29  ;;  %v1250_v46 = vadd.f32 %v1085_v0, %v765_v61  ;;  %v1701_v59 = vsel %vm502_vm1, %v1699_v63, %v1700_v58  ;;  %v3053_v54 = vmul.f32 %v6152_v3, %v6640_v14 }
 0x16b   :  { %v2799_v30 = vrot.slane %v2569_v42, 1  ;;  %v6685_v12 = vmul.f32 %v6152_v3, %v6642_v11  ;;  %v2418_v57 = vmul.f32 %v4991_v31, %v6640_v14  ;;  %v2800_v34 = vrot.slane %v2570_v6, 1 }
 0x16c   :  { %v2965_v51 = vadd.f32 %v2798_v4, %v2481_v48  ;;  %v1382_v18 = vadd.f32 %v1318_v38, %v1250_v46  ;;  %v2185_v33 = vsel %vm987_vm2, %v2183_v62, %v2184_v43  ;;  %v3283_v16 = vrot.slane %v3053_v54, 2 }
 0x16d   :  { %v6690_v32 = vmax.f32 %v91_v19, 0.0  ;;  %v369_v1 = vmul.f32 %v4977_v22, %v6516_v17  ;;  %v281_v27 = vmul.f32 %v4975_v21, %v6472_v45  ;;  %v854_v20 = vmul.f32 %v4979_v23, %v6516_v17 }
 0x16e   :  { %v3449_v56 = vadd.f32 %v3282_v15, %v2965_v51  ;;  %v1866_v28 = vadd.f32 %v1701_v59, %v1382_v18  ;;  %v2801_v40 = vsel %vm502_vm1, %v2799_v30, %v2800_v34  ;;  %v3284_v44 = vrot.slane %v6685_v12, 2 }
 0x16f   :  { %v601_v36 = vrot.slane %v369_v1, 1  ;;  %v1471_v10 = vmul.f32 %v4983_v25, %v6603_v41  ;;  %v1086_v53 = vrot.slane %v854_v20, 2  ;;  %v1319_v37 = vmul.f32 %v4981_v24, %v6553_v50 }
 0x170   :  { %4860 = vmatmul.mubr.msk.f32.gmra.mxu1 %vm3477_vm3, %v3449_v56  ;;  %v2350_v55 = vadd.f32 %v2185_v33, %v1866_v28  ;;  %v1955_v45 = vmul.f32 %v4985_v26, %v6603_v41  ;;  %v2571_v35 = vmul.f32 %v5020_v49, %v6690_v32  ;;  %v3055_v47 = vmul.f32 %v6152_v3, %v6690_v32 }
 0x171   :  { %v602_v17 = vsel %vm502_vm1, %v599_v39, %v601_v36  ;;  %v1702_v38 = vrot.slane %v1471_v10, 1  ;;  %v1087_v63 = vsel %vm987_vm2, %v1084_v2, %v1086_v53  ;;  %v93_v39 = vld [vmem:[%s8859_s0 + $0x248] sm:$0xff]  ;;  %v3285_v52 = vsel %vm987_vm2, %v3283_v16, %v3284_v44 }
 0x172   :  { %v2482_v5 = vadd.f32 %v2418_v57, %v2350_v55  ;;  %v766_v7 = vadd.f32 %v602_v17, %v281_v27  ;;  %v2186_v8 = vrot.slane %v1955_v45, 2  ;;  %v2419_v3 = vmul.f32 %v4991_v31, %v6642_v11 }
 0x173   :  { %v1703_v29 = vsel %vm502_vm1, %v1700_v58, %v1702_v38  ;;  %v2802_v61 = vrot.slane %v2571_v35, 1  ;;  %v3286_v62 = vrot.slane %v3055_v47, 2  ;;  %v6723_v42 = vmax.f32 %v92_v9, 0.0  ;;  %v6762_v47 = vld [vmem:[%s8860_s1 + $0x8] ss:$0 sm:$0xff] }
 0x174   :  { %v2966_v0 = vadd.f32 %v2801_v40, %v2482_v5  ;;  %v1251_v4 = vadd.f32 %v1087_v63, %v766_v7  ;;  %v2187_v2 = vsel %vm987_vm2, %v2184_v43, %v2186_v8  ;;  %v6727_v15 = vmax.f32 %v93_v39, 0.0  ;;  %v94_v5 = vld [vmem:[%s8859_s0 + $0x250] sm:$0x3] }
 0x175   :  { %v2803_v48 = vsel %vm502_vm1, %v2800_v34, %v2802_v61  ;;  %v370_v46 = vmul.f32 %v4977_v22, %v6551_v60  ;;  %v371_v19 = vmul.f32 %v4977_v22, %v6553_v50  ;;  %v855_v59 = vmul.f32 %v4979_v23, %v6551_v60 }
 0x176   :  { %v3450_v6 = vadd.f32 %v3285_v52, %v2966_v0  ;;  %v1383_v58 = vadd.f32 %v1319_v37, %v1251_v4  ;;  %v282_v30 = vmul.f32 %v4975_v21, %v6551_v60  ;;  %v856_v43 = vmul.f32 %v4979_v23, %v6553_v50 }
 0x177   :  { %v603_v54 = vrot.slane %v370_v46, 1  ;;  %v1472_v12 = vmul.f32 %v4983_v25, %v6640_v14  ;;  %v604_v18 = vrot.slane %v371_v19, 1  ;;  %v1088_v57 = vrot.slane %v855_v59, 2 }
 0x178   :  { %4862 = vmatprep.mubr.msk.f32.mxu1 %vm3477_vm3, %v3450_v6  ;;  %v1867_v51 = vadd.f32 %v1703_v29, %v1383_v58  ;;  %v1473_v34 = vmul.f32 %v4983_v25, %v6642_v11  ;;  %v1089_v33 = vrot.slane %v856_v43, 2  ;;  %v1320_v16 = vmul.f32 %v4981_v24, %v6640_v14 }
 0x179   :  { %v1956_v60 = vmul.f32 %v4985_v26, %v6640_v14  ;;  %v1957_v1 = vmul.f32 %v4985_v26, %v6642_v11  ;;  %v605_v28 = vsel %vm502_vm1, %v603_v54, %v604_v18  ;;  %v1704_v27 = vrot.slane %v1472_v12, 1 }
 0x17a   :  { %v2351_v56 = vadd.f32 %v2187_v2, %v1867_v51  ;;  %v1705_v20 = vrot.slane %v1473_v34, 1  ;;  %v767_v40 = vadd.f32 %v605_v28, %v282_v30  ;;  %v1090_v36 = vsel %vm987_vm2, %v1088_v57, %v1089_v33  ;;  %v95_v51 = vld [vmem:[%s8859_s0 + $0x258] sm:$0xff] }
 0x17b   :  { %v2188_v10 = vrot.slane %v1956_v60, 2  ;;  %v2189_v55 = vrot.slane %v1957_v1, 2  ;;  %v3287_v37 = vsel %vm987_vm2, %v3284_v44, %v3286_v62  ;;  %v2572_v45 = vmul.f32 %v5020_v49, %v6723_v42  ;;  %v96_v1 = vld [vmem:[%s8859_s0 + $0x260] sm:$0xff] }
 0x17c   :  { %v2483_v53 = vadd.f32 %v2419_v3, %v2351_v56  ;;  %v2573_v17 = vmul.f32 %v5020_v49, %v6727_v15  ;;  %v1252_v38 = vadd.f32 %v1090_v36, %v767_v40  ;;  %v2420_v35 = vmul.f32 %v4991_v31, %v6723_v42 }
 0x17d   :  { %v3056_v9 = vmul.f32 %v6762_v47, %v6723_v42  ;;  %v6768_v44 = vmul.f32 %v6762_v47, %v6727_v15  ;;  %v1706_v63 = vsel %vm502_vm1, %v1704_v27, %v1705_v20  ;;  %v2804_v8 = vrot.slane %v2572_v45, 1 }
 0x17e   :  { %v2967_v7 = vadd.f32 %v2803_v48, %v2483_v53  ;;  %v2805_v39 = vrot.slane %v2573_v17, 1  ;;  %v1384_v52 = vadd.f32 %v1320_v16, %v1252_v38  ;;  %v2190_v29 = vsel %vm987_vm2, %v2188_v10, %v2189_v55 }
 0x17f   :  { %v3288_v3 = vrot.slane %v3056_v9, 2  ;;  %v3289_v61 = vrot.slane %v6768_v44, 2  ;;  %v6776_v4 = vmax.f32 %v94_v5, 0.0  ;;  %v372_v62 = vmul.f32 %v4977_v22, %v6603_v41 }
 0x180   :  { %v3451_v0 = vadd.f32 %v3287_v37, %v2967_v7  ;;  %v857_v2 = vmul.f32 %v4979_v23, %v6603_v41  ;;  %v1868_v48 = vadd.f32 %v1706_v63, %v1384_v52  ;;  %v2806_v46 = vsel %vm502_vm1, %v2804_v8, %v2805_v39 }
 0x181   :  { %v283_v6 = vmul.f32 %v4975_v21, %v6553_v50  ;;  %v1474_v58 = vmul.f32 %v4983_v25, %v6690_v32  ;;  %v3290_v19 = vsel %vm987_vm2, %v3288_v3, %v3289_v61  ;;  %v606_v59 = vrot.slane %v372_v62, 1 }
 0x182   :  { %4863 = vmatmul.mubr.msk.f32.gmra.mxu1 %vm3477_vm3, %v3451_v0  ;;  %v1091_v30 = vrot.slane %v857_v2, 2  ;;  %v1958_v41 = vmul.f32 %v4985_v26, %v6690_v32  ;;  %v2352_v54 = vadd.f32 %v2190_v29, %v1868_v48  ;;  %v2574_v12 = vmul.f32 %v5020_v49, %v6776_v4 }
 0x183   :  { %v1707_v43 = vrot.slane %v1474_v58, 1  ;;  %v3058_v50 = vmul.f32 %v6762_v47, %v6776_v4  ;;  %v607_v57 = vsel %vm502_vm1, %v604_v18, %v606_v59  ;;  %v1321_v16 = vmul.f32 %v4981_v24, %v6642_v11 }
 0x184   :  { %v1092_v34 = vsel %vm987_vm2, %v1089_v33, %v1091_v30  ;;  %v2191_v60 = vrot.slane %v1958_v41, 2  ;;  %v2484_v56 = vadd.f32 %v2420_v35, %v2352_v54  ;;  %v768_v28 = vadd.f32 %v607_v57, %v283_v6 }
 0x185   :  { %v2421_v27 = vmul.f32 %v4991_v31, %v6727_v15  ;;  %v2807_v40 = vrot.slane %v2574_v12, 1  ;;  %v1708_v36 = vsel %vm502_vm1, %v1705_v20, %v1707_v43  ;;  %v3291_v10 = vrot.slane %v3058_v50, 2 }
 0x186   :  { %v2192_v18 = vsel %vm987_vm2, %v2189_v55, %v2191_v60  ;;  %v6811_v33 = vmax.f32 %v95_v51, 0.0  ;;  %v2968_v53 = vadd.f32 %v2806_v46, %v2484_v56  ;;  %v1253_v37 = vadd.f32 %v1092_v34, %v768_v28 }
 0x187   :  { %v6813_v45 = vmax.f32 %v96_v1, 0.0  ;;  %v373_v17 = vmul.f32 %v4977_v22, %v6640_v14  ;;  %v284_v38 = vmul.f32 %v4975_v21, %v6640_v14  ;;  %v374_v35 = vmul.f32 %v4977_v22, %v6642_v11 }
 0x188   :  { %v858_v20 = vmul.f32 %v4979_v23, %v6640_v14  ;;  %v859_v55 = vmul.f32 %v4979_v23, %v6642_v11  ;;  %v3452_v9 = vadd.f32 %v3290_v19, %v2968_v53  ;;  %v1385_v5 = vadd.f32 %v1321_v16, %v1253_v37  ;;  %v97_v16 = vld [vmem:[%s8859_s0 + $0x268] sm:$0x3] }
 0x189   :  { %v2808_v7 = vsel %vm502_vm1, %v2805_v39, %v2807_v40  ;;  %v608_v63 = vrot.slane %v373_v17, 1  ;;  %v609_v8 = vrot.slane %v374_v35, 1  ;;  %v1475_v3 = vmul.f32 %v4983_v25, %v6723_v42 }
 0x18a   :  { %v1093_v52 = vrot.slane %v858_v20, 2  ;;  %v1094_v29 = vrot.slane %v859_v55, 2  ;;  %4865 = vmatprep.mubr.msk.f32.mxu1 %vm3477_vm3, %v3452_v9  ;;  %v1869_v0 = vadd.f32 %v1708_v36, %v1385_v5  ;;  %v1476_v14 = vmul.f32 %v4983_v25, %v6727_v15 }
 0x18b   :  { %v1959_v62 = vmul.f32 %v4985_v26, %v6723_v42  ;;  %v1960_v2 = vmul.f32 %v4985_v26, %v6727_v15  ;;  %v610_v39 = vsel %vm502_vm1, %v608_v63, %v609_v8  ;;  %v1322_v46 = vmul.f32 %v4981_v24, %v6723_v42 }
 0x18c   :  { %v1095_v48 = vsel %vm987_vm2, %v1093_v52, %v1094_v29  ;;  %v1709_v6 = vrot.slane %v1475_v3, 1  ;;  %v2353_v58 = vadd.f32 %v2192_v18, %v1869_v0  ;;  %v769_v19 = vadd.f32 %v610_v39, %v284_v38 }
 0x18d   :  { %v1710_v59 = vrot.slane %v1476_v14, 1  ;;  %v2193_v30 = vrot.slane %v1959_v62, 2  ;;  %v2194_v41 = vrot.slane %v1960_v2, 2  ;;  %v2575_v54 = vmul.f32 %v5020_v49, %v6811_v33  ;;  %v98_v62 = vld [vmem:[%s8859_s0 + $0x270] sm:$0xff]  ;;  %v99_v2 = vld [vmem:[%s8859_s0 + $0x278] sm:$0xff] }
 0x18e   :  { %v2576_v43 = vmul.f32 %v5020_v49, %v6813_v45  ;;  %v3059_v12 = vmul.f32 %v6762_v47, %v6811_v33  ;;  %v2485_v50 = vadd.f32 %v2421_v27, %v2353_v58  ;;  %v3292_v51 = vsel %vm987_vm2, %v3289_v61, %v3291_v10 }
 0x18f   :  { %v1254_v57 = vadd.f32 %v1095_v48, %v769_v19  ;;  %v6850_v34 = vmul.f32 %v6762_v47, %v6813_v45  ;;  %v1711_v60 = vsel %vm502_vm1, %v1709_v6, %v1710_v59  ;;  %v2422_v1 = vmul.f32 %v4991_v31, %v6811_v33 }
 0x190   :  { %v2809_v56 = vrot.slane %v2575_v54, 1  ;;  %v2810_v28 = vrot.slane %v2576_v43, 1  ;;  %v2969_v27 = vadd.f32 %v2808_v7, %v2485_v50  ;;  %v3293_v40 = vrot.slane %v3059_v12, 2 }
 0x191   :  { %v1386_v44 = vadd.f32 %v1322_v46, %v1254_v57  ;;  %v3294_v61 = vrot.slane %v6850_v34, 2  ;;  %v2195_v36 = vsel %vm987_vm2, %v2193_v30, %v2194_v41  ;;  %v6860_v18 = vmax.f32 %v97_v16, 0.0 }
 0x192   :  { %v375_v10 = vmul.f32 %v4977_v22, %v6690_v32  ;;  %v860_v53 = vmul.f32 %v4979_v23, %v6690_v32  ;;  %v3453_v37 = vadd.f32 %v3292_v51, %v2969_v27  ;;  %v2811_v38 = vsel %vm502_vm1, %v2809_v56, %v2810_v28 }
 0x193   :  { %v1870_v17 = vadd.f32 %v1711_v60, %v1386_v44  ;;  %v285_v35 = vmul.f32 %v4975_v21, %v6642_v11  ;;  %v1477_v9 = vmul.f32 %v4983_v25, %v6776_v4  ;;  %v1961_v5 = vmul.f32 %v4985_v26, %v6776_v4 }
 0x194   :  { %v611_v20 = vrot.slane %v375_v10, 1  ;;  %v1096_v55 = vrot.slane %v860_v53, 2  ;;  %4866 = vmatmul.mubr.msk.f32.gmra.mxu1 %vm3477_vm3, %v3453_v37  ;;  %v3295_v32 = vsel %vm987_vm2, %v3293_v40, %v3294_v61  ;;  %v2577_v63 = vmul.f32 %v5020_v49, %v6860_v18 }
 0x195   :  { %v2354_v7 = vadd.f32 %v2195_v36, %v1870_v17  ;;  %v3061_v11 = vmul.f32 %v6762_v47, %v6860_v18  ;;  %v1712_v0 = vrot.slane %v1477_v9, 1  ;;  %v2196_v14 = vrot.slane %v1961_v5, 2 }
 0x196   :  { %v612_v52 = vsel %vm502_vm1, %v609_v8, %v611_v20  ;;  %v1097_v3 = vsel %vm987_vm2, %v1094_v29, %v1096_v55  ;;  %v1323_v46 = vmul.f32 %v4981_v24, %v6727_v15  ;;  %v2812_v6 = vrot.slane %v2577_v63, 1 }
 0x197   :  { %v2486_v39 = vadd.f32 %v2422_v1, %v2354_v7  ;;  %v770_v48 = vadd.f32 %v612_v52, %v285_v35  ;;  %v1713_v8 = vsel %vm502_vm1, %v1710_v59, %v1712_v0  ;;  %v2197_v29 = vsel %vm987_vm2, %v2194_v41, %v2196_v14  ;;  %v100_v14 = vld [vmem:[%s8859_s0 + $0x280] sm:$0x3] }
 0x198   :  { %v2423_v58 = vmul.f32 %v4991_v31, %v6813_v45  ;;  %v3296_v19 = vrot.slane %v3061_v11, 2  ;;  %v6895_v43 = vmax.f32 %v98_v62, 0.0  ;;  %v6897_v12 = vmax.f32 %v99_v2, 0.0 }
 0x199   :  { %v2970_v30 = vadd.f32 %v2811_v38, %v2486_v39  ;;  %v1255_v54 = vadd.f32 %v1097_v3, %v770_v48  ;;  %v2813_v50 = vsel %vm502_vm1, %v2810_v28, %v2812_v6  ;;  %v376_v51 = vmul.f32 %v4977_v22, %v6723_v42 }
 0x19a   :  { %v377_v59 = vmul.f32 %v4977_v22, %v6727_v15  ;;  %v861_v41 = vmul.f32 %v4979_v23, %v6723_v42  ;;  %v286_v60 = vmul.f32 %v4975_v21, %v6723_v42  ;;  %v862_v1 = vmul.f32 %v4979_v23, %v6727_v15 }
 0x19b   :  { %v3454_v57 = vadd.f32 %v3295_v32, %v2970_v30  ;;  %v1387_v16 = vadd.f32 %v1323_v46, %v1255_v54  ;;  %v613_v56 = vrot.slane %v376_v51, 1  ;;  %v1478_v44 = vmul.f32 %v4983_v25, %v6811_v33 }
 0x19c   :  { %v614_v27 = vrot.slane %v377_v59, 1  ;;  %v1098_v28 = vrot.slane %v861_v41, 2  ;;  %v1099_v36 = vrot.slane %v862_v1, 2  ;;  %v1479_v10 = vmul.f32 %v4983_v25, %v6813_v45 }
 0x19d   :  { %4868 = vmatprep.mubr.msk.f32.mxu1 %vm3477_vm3, %v3454_v57  ;;  %v1871_v40 = vadd.f32 %v1713_v8, %v1387_v16  ;;  %v1962_v53 = vmul.f32 %v4985_v26, %v6811_v33  ;;  %v1324_v37 = vmul.f32 %v4981_v24, %v6811_v33  ;;  %v1714_v17 = vrot.slane %v1478_v44, 1 }
 0x19e   :  { %v615_v42 = vsel %vm502_vm1, %v613_v56, %v614_v27  ;;  %v1963_v38 = vmul.f32 %v4985_v26, %v6813_v45  ;;  %v1100_v55 = vsel %vm987_vm2, %v1098_v28, %v1099_v36  ;;  %v1715_v9 = vrot.slane %v1479_v10, 1  ;;  %v101_v10 = vld [vmem:[%s8859_s0 + $0x288] sm:$0xff] }
 0x19f   :  { %v2355_v35 = vadd.f32 %v2197_v29, %v1871_v40  ;;  %v771_v20 = vadd.f32 %v615_v42, %v286_v60  ;;  %v2198_v5 = vrot.slane %v1962_v53, 2  ;;  %v2578_v32 = vmul.f32 %v5020_v49, %v6895_v43 }
 0x1a0   :  { %v2199_v7 = vrot.slane %v1963_v38, 2  ;;  %v6927_v63 = vmul.f32 %v5020_v49, %v6897_v12  ;;  %v3297_v52 = vsel %vm987_vm2, %v3294_v61, %v3296_v19  ;;  %v3062_v0 = vmul.f32 %v6762_v47, %v6895_v43 }
 0x1a1   :  { %v2487_v11 = vadd.f32 %v2423_v58, %v2355_v35  ;;  %v1256_v3 = vadd.f32 %v1100_v55, %v771_v20  ;;  %v1716_v62 = vsel %vm502_vm1, %v1714_v17, %v1715_v9  ;;  %v2814_v2 = vrot.slane %v2578_v32, 1 }
 0x1a2   :  { %v2815_v39 = vrot.slane %v6927_v63, 1  ;;  %v6941_v48 = vmul.f32 %v6762_v47, %v6897_v12  ;;  %v2200_v61 = vsel %vm987_vm2, %v2198_v5, %v2199_v7  ;;  %v2424_v6 = vmul.f32 %v4991_v31, %v6895_v43  ;;  %v103_v63 = vld [vmem:[%s8859_s0 + $0x298] sm:$0x3] }
 0x1a3   :  { %v2971_v34 = vadd.f32 %v2813_v50, %v2487_v11  ;;  %v1388_v46 = vadd.f32 %v1324_v37, %v1256_v3  ;;  %v3298_v8 = vrot.slane %v3062_v0, 2  ;;  %v6947_v58 = vmax.f32 %v100_v14, 0.0 }
 0x1a4   :  { %v3299_v29 = vrot.slane %v6941_v48, 2  ;;  %v378_v19 = vmul.f32 %v4977_v22, %v6776_v4  ;;  %v287_v51 = vmul.f32 %v4975_v21, %v6727_v15  ;;  %v863_v50 = vmul.f32 %v4979_v23, %v6776_v4 }
 0x1a5   :  { %v3455_v30 = vadd.f32 %v3297_v52, %v2971_v34  ;;  %v1872_v54 = vadd.f32 %v1716_v62, %v1388_v46  ;;  %v2816_v59 = vsel %vm502_vm1, %v2814_v2, %v2815_v39  ;;  %v1480_v57 = vmul.f32 %v4983_v25, %v6860_v18 }
 0x1a6   :  { %v616_v41 = vrot.slane %v378_v19, 1  ;;  %v1964_v16 = vmul.f32 %v4985_v26, %v6860_v18  ;;  %v1101_v1 = vrot.slane %v863_v50, 2  ;;  %v1325_v15 = vmul.f32 %v4981_v24, %v6813_v45 }
 0x1a7   :  { %4869 = vmatmul.mubr.msk.f32.gmra.mxu1 %vm3477_vm3, %v3455_v30  ;;  %v2356_v60 = vadd.f32 %v2200_v61, %v1872_v54  ;;  %v2580_v4 = vmul.f32 %v5020_v49, %v6947_v58  ;;  %v1717_v28 = vrot.slane %v1480_v57, 1  ;;  %v3064_v40 = vmul.f32 %v6762_v47, %v6947_v58 }
 0x1a8   :  { %v617_v56 = vsel %vm502_vm1, %v614_v27, %v616_v41  ;;  %v2201_v44 = vrot.slane %v1964_v16, 2  ;;  %v3300_v42 = vsel %vm987_vm2, %v3298_v8, %v3299_v29  ;;  %v1102_v17 = vsel %vm987_vm2, %v1099_v36, %v1101_v1  ;;  %v102_v27 = vld [vmem:[%s8859_s0 + $0x290] sm:$0xff] }
 0x1a9   :  { %v2488_v53 = vadd.f32 %v2424_v6, %v2356_v60  ;;  %v772_v37 = vadd.f32 %v617_v56, %v287_v51  ;;  %v1718_v38 = vsel %vm502_vm1, %v1715_v9, %v1717_v28  ;;  %v2425_v20 = vmul.f32 %v4991_v31, %v6897_v12 }
 0x1aa   :  { %v2202_v35 = vsel %vm987_vm2, %v2199_v7, %v2201_v44  ;;  %v2817_v55 = vrot.slane %v2580_v4, 1  ;;  %v3301_v11 = vrot.slane %v3064_v40, 2  ;;  %v6984_v52 = vmax.f32 %v101_v10, 0.0 }
 0x1ab   :  { %v2972_v5 = vadd.f32 %v2816_v59, %v2488_v53  ;;  %v1257_v32 = vadd.f32 %v1102_v17, %v772_v37  ;;  %v6986_v3 = vmax.f32 %v102_v27, 0.0  ;;  %v288_v36 = vmul.f32 %v4975_v21, %v6811_v33 }
 0x1ac   :  { %v379_v0 = vmul.f32 %v4977_v22, %v6811_v33  ;;  %v380_v9 = vmul.f32 %v4977_v22, %v6813_v45  ;;  %v864_v62 = vmul.f32 %v4979_v23, %v6811_v33  ;;  %v865_v2 = vmul.f32 %v4979_v23, %v6813_v45 }
 0x1ad   :  { %v3456_v7 = vadd.f32 %v3300_v42, %v2972_v5  ;;  %v1389_v14 = vadd.f32 %v1325_v15, %v1257_v32  ;;  %v1326_v61 = vmul.f32 %v4981_v24, %v6895_v43  ;;  %v1481_v6 = vmul.f32 %v4983_v25, %v6895_v43 }
 0x1ae   :  { %v618_v34 = vrot.slane %v379_v0, 1  ;;  %v619_v46 = vrot.slane %v380_v9, 1  ;;  %v1103_v19 = vrot.slane %v864_v62, 2  ;;  %v1104_v30 = vrot.slane %v865_v2, 2 }
 0x1af   :  { %4871 = vmatprep.mubr.msk.f32.mxu1 %vm3477_vm3, %v3456_v7  ;;  %v1873_v8 = vadd.f32 %v1718_v38, %v1389_v14  ;;  %v1482_v54 = vmul.f32 %v4983_v25, %v6897_v12  ;;  %v1719_v51 = vrot.slane %v1481_v6, 1  ;;  %v1965_v50 = vmul.f32 %v4985_v26, %v6895_v43 }
 0x1b0   :  { %v620_v33 = vsel %vm502_vm1, %v618_v34, %v619_v46  ;;  %v1966_v59 = vmul.f32 %v4985_v26, %v6897_v12  ;;  %v1105_v16 = vsel %vm987_vm2, %v1103_v19, %v1104_v30  ;;  %v2818_v1 = vsel %vm502_vm1, %v2815_v39, %v2817_v55  ;;  %v104_v19 = vld [vmem:[%s8859_s0 + $0x2a0] sm:$0xff] }
 0x1b1   :  { %v2357_v41 = vadd.f32 %v2202_v35, %v1873_v8  ;;  %v773_v57 = vadd.f32 %v620_v33, %v288_v36  ;;  %v1720_v60 = vrot.slane %v1482_v54, 1  ;;  %v2203_v15 = vrot.slane %v1965_v50, 2 }
 0x1b2   :  { %v2204_v4 = vrot.slane %v1966_v59, 2  ;;  %v2581_v56 = vmul.f32 %v5020_v49, %v6984_v52  ;;  %v3302_v44 = vsel %vm987_vm2, %v3299_v29, %v3301_v11  ;;  %v2582_v10 = vmul.f32 %v5020_v49, %v6986_v3 }
 0x1b3   :  { %v2489_v28 = vadd.f32 %v2425_v20, %v2357_v41  ;;  %v1258_v40 = vadd.f32 %v1105_v16, %v773_v57  ;;  %v1721_v39 = vsel %vm502_vm1, %v1719_v51, %v1720_v60  ;;  %v3065_v42 = vmul.f32 %v6762_v47, %v6984_v52 }
 0x1b4   :  { %v2819_v53 = vrot.slane %v2581_v56, 1  ;;  %v7029_v37 = vmul.f32 %v6762_v47, %v6986_v3  ;;  %v2426_v17 = vmul.f32 %v4991_v31, %v6984_v52  ;;  %v2820_v27 = vrot.slane %v2582_v10, 1 }
 0x1b5   :  { %v2973_v48 = vadd.f32 %v2818_v1, %v2489_v28  ;;  %v1390_v29 = vadd.f32 %v1326_v61, %v1258_v40  ;;  %v2205_v38 = vsel %vm987_vm2, %v2203_v15, %v2204_v4  ;;  %v3303_v35 = vrot.slane %v3065_v42, 2 }
 0x1b6   :  { %v7034_v20 = vmax.f32 %v103_v63, 0.0  ;;  %v381_v55 = vmul.f32 %v4977_v22, %v6860_v18  ;;  %v289_v11 = vmul.f32 %v4975_v21, %v6813_v45  ;;  %v866_v36 = vmul.f32 %v4979_v23, %v6860_v18 }
 0x1b7   :  { %v3457_v5 = vadd.f32 %v3302_v44, %v2973_v48  ;;  %v1874_v32 = vadd.f32 %v1721_v39, %v1390_v29  ;;  %v2821_v0 = vsel %vm502_vm1, %v2819_v53, %v2820_v27  ;;  %v3304_v9 = vrot.slane %v7029_v37, 2 }
 0x1b8   :  { %v621_v7 = vrot.slane %v381_v55, 1  ;;  %v1483_v14 = vmul.f32 %v4983_v25, %v6947_v58  ;;  %v1106_v2 = vrot.slane %v866_v36, 2  ;;  %v1327_v34 = vmul.f32 %v4981_v24, %v6897_v12 }
 0x1b9   :  { %4872 = vmatmul.mubr.msk.f32.gmra.mxu1 %vm3477_vm3, %v3457_v5  ;;  %v2358_v62 = vadd.f32 %v2205_v38, %v1874_v32  ;;  %v1967_v45 = vmul.f32 %v4985_v26, %v6947_v58  ;;  %v2583_v6 = vmul.f32 %v5020_v49, %v7034_v20  ;;  %v3067_v8 = vmul.f32 %v6762_v47, %v7034_v20 }
 0x1ba   :  { %v622_v18 = vsel %vm502_vm1, %v619_v46, %v621_v7  ;;  %v1722_v61 = vrot.slane %v1483_v14, 1  ;;  %v1107_v51 = vsel %vm987_vm2, %v1104_v30, %v1106_v2  ;;  %v105_v46 = vld [vmem:[%s8859_s0 + $0x2a8] sm:$0xff]  ;;  %v3305_v59 = vsel %vm987_vm2, %v3303_v35, %v3304_v9 }
 0x1bb   :  { %v2490_v54 = vadd.f32 %v2426_v17, %v2358_v62  ;;  %v774_v33 = vadd.f32 %v622_v18, %v289_v11  ;;  %v2206_v50 = vrot.slane %v1967_v45, 2  ;;  %v2427_v57 = vmul.f32 %v4991_v31, %v6986_v3 }
 0x1bc   :  { %v1723_v41 = vsel %vm502_vm1, %v1720_v60, %v1722_v61  ;;  %v2822_v16 = vrot.slane %v2583_v6, 1  ;;  %v3306_v56 = vrot.slane %v3067_v8, 2  ;;  %v7067_v28 = vmax.f32 %v104_v19, 0.0 }
 0x1bd   :  { %v2974_v1 = vadd.f32 %v2821_v0, %v2490_v54  ;;  %v1259_v15 = vadd.f32 %v1107_v51, %v774_v33  ;;  %v2207_v30 = vsel %vm987_vm2, %v2204_v4, %v2206_v50  ;;  %v7071_v40 = vmax.f32 %v105_v46, 0.0 }
 0x1be   :  { %v2823_v44 = vsel %vm502_vm1, %v2820_v27, %v2822_v16  ;;  %v382_v10 = vmul.f32 %v4977_v22, %v6895_v43  ;;  %v383_v39 = vmul.f32 %v4977_v22, %v6897_v12  ;;  %v867_v53 = vmul.f32 %v4979_v23, %v6895_v43 }
 0x1bf   :  { %v3458_v63 = vadd.f32 %v3305_v59, %v2974_v1  ;;  %v1391_v60 = vadd.f32 %v1327_v34, %v1259_v15  ;;  %v290_v42 = vmul.f32 %v4975_v21, %v6895_v43  ;;  %v868_v4 = vmul.f32 %v4979_v23, %v6897_v12 }
 0x1c0   :  { %v623_v37 = vrot.slane %v382_v10, 1  ;;  %v1484_v48 = vmul.f32 %v4983_v25, %v6984_v52  ;;  %v624_v17 = vrot.slane %v383_v39, 1  ;;  %v1108_v27 = vrot.slane %v867_v53, 2 }
 0x1c1   :  { %4874 = vmatprep.mubr.msk.f32.mxu1 %vm3477_vm3, %v3458_v63  ;;  %v1875_v29 = vadd.f32 %v1723_v41, %v1391_v60  ;;  %v1485_v38 = vmul.f32 %v4983_v25, %v6986_v3  ;;  %v1109_v35 = vrot.slane %v868_v4, 2  ;;  %v1328_v55 = vmul.f32 %v4981_v24, %v6984_v52 }
 0x1c2   :  { %v1968_v43 = vmul.f32 %v4985_v26, %v6984_v52  ;;  %v1969_v5 = vmul.f32 %v4985_v26, %v6986_v3  ;;  %v625_v11 = vsel %vm502_vm1, %v623_v37, %v624_v17  ;;  %v1724_v36 = vrot.slane %v1484_v48, 1 }
 0x1c3   :  { %v2359_v32 = vadd.f32 %v2207_v30, %v1875_v29  ;;  %v1725_v0 = vrot.slane %v1485_v38, 1  ;;  %v775_v7 = vadd.f32 %v625_v11, %v290_v42  ;;  %v1110_v14 = vsel %vm987_vm2, %v1108_v27, %v1109_v35  ;;  %v107_v29 = vld [vmem:[%s8859_s0 + $0x2b8] sm:$0xff] }
 0x1c4   :  { %v2208_v62 = vrot.slane %v1968_v43, 2  ;;  %v2209_v2 = vrot.slane %v1969_v5, 2  ;;  %v3307_v45 = vsel %vm987_vm2, %v3304_v9, %v3306_v56  ;;  %v2584_v18 = vmul.f32 %v5020_v49, %v7067_v28  ;;  %v106_v9 = vld [vmem:[%s8859_s0 + $0x2b0] sm:$0x3]  ;;  %v108_v5 = vld [vmem:[%s8859_s0 + $0x2c0] sm:$0xff] }
 0x1c5   :  { %v2491_v34 = vadd.f32 %v2427_v57, %v2359_v32  ;;  %v2585_v61 = vmul.f32 %v5020_v49, %v7071_v40  ;;  %v1260_v6 = vadd.f32 %v1110_v14, %v775_v7  ;;  %v2428_v8 = vmul.f32 %v4991_v31, %v7067_v28 }
 0x1c6   :  { %v3068_v19 = vmul.f32 %v6762_v47, %v7067_v28  ;;  %v7107_v54 = vmul.f32 %v6762_v47, %v7071_v40  ;;  %v1726_v51 = vsel %vm502_vm1, %v1724_v36, %v1725_v0  ;;  %v2824_v50 = vrot.slane %v2584_v18, 1 }
 0x1c7   :  { %v2975_v33 = vadd.f32 %v2823_v44, %v2491_v34  ;;  %v2825_v46 = vrot.slane %v2585_v61, 1  ;;  %v1392_v59 = vadd.f32 %v1328_v55, %v1260_v6  ;;  %v2210_v41 = vsel %vm987_vm2, %v2208_v62, %v2209_v2 }
 0x1c8   :  { %v3308_v57 = vrot.slane %v3068_v19, 2  ;;  %v3309_v16 = vrot.slane %v7107_v54, 2  ;;  %v7115_v15 = vmax.f32 %v106_v9, 0.0  ;;  %v384_v56 = vmul.f32 %v4977_v22, %v6947_v58 }
 0x1c9   :  { %v3459_v1 = vadd.f32 %v3307_v45, %v2975_v33  ;;  %v869_v30 = vmul.f32 %v4979_v23, %v6947_v58  ;;  %v1876_v44 = vadd.f32 %v1726_v51, %v1392_v59  ;;  %v2826_v10 = vsel %vm502_vm1, %v2824_v50, %v2825_v46 }
 0x1ca   :  { %v291_v63 = vmul.f32 %v4975_v21, %v6897_v12  ;;  %v1486_v60 = vmul.f32 %v4983_v25, %v7034_v20  ;;  %v3310_v39 = vsel %vm987_vm2, %v3308_v57, %v3309_v16  ;;  %v626_v53 = vrot.slane %v384_v56, 1 }
 0x1cb   :  { %4875 = vmatmul.mubr.msk.f32.gmra.mxu1 %vm3477_vm3, %v3459_v1  ;;  %v1111_v42 = vrot.slane %v869_v30, 2  ;;  %v1970_v58 = vmul.f32 %v4985_v26, %v7034_v20  ;;  %v2360_v37 = vadd.f32 %v2210_v41, %v1876_v44  ;;  %v2586_v48 = vmul.f32 %v5020_v49, %v7115_v15 }
 0x1cc   :  { %v1727_v4 = vrot.slane %v1486_v60, 1  ;;  %v3070_v12 = vmul.f32 %v6762_v47, %v7115_v15  ;;  %v627_v27 = vsel %vm502_vm1, %v624_v17, %v626_v53  ;;  %v1329_v55 = vmul.f32 %v4981_v24, %v6986_v3 }
 0x1cd   :  { %v1112_v38 = vsel %vm987_vm2, %v1109_v35, %v1111_v42  ;;  %v2211_v43 = vrot.slane %v1970_v58, 2  ;;  %v2492_v32 = vadd.f32 %v2428_v8, %v2360_v37  ;;  %v776_v11 = vadd.f32 %v627_v27, %v291_v63 }
 0x1ce   :  { %v2429_v36 = vmul.f32 %v4991_v31, %v7071_v40  ;;  %v2827_v7 = vrot.slane %v2586_v48, 1  ;;  %v1728_v14 = vsel %vm502_vm1, %v1725_v0, %v1727_v4  ;;  %v3311_v62 = vrot.slane %v3070_v12, 2 }
 0x1cf   :  { %v2212_v17 = vsel %vm987_vm2, %v2209_v2, %v2211_v43  ;;  %v7150_v35 = vmax.f32 %v107_v29, 0.0  ;;  %v2976_v34 = vadd.f32 %v2826_v10, %v2492_v32  ;;  %v1261_v45 = vadd.f32 %v1112_v38, %v776_v11 }
 0x1d0   :  { %v7152_v18 = vmax.f32 %v108_v5, 0.0  ;;  %v385_v61 = vmul.f32 %v4977_v22, %v6984_v52  ;;  %v292_v6 = vmul.f32 %v4975_v21, %v6984_v52  ;;  %v386_v8 = vmul.f32 %v4977_v22, %v6986_v3 }
 0x1d1   :  { %v870_v0 = vmul.f32 %v4979_v23, %v6984_v52  ;;  %v871_v2 = vmul.f32 %v4979_v23, %v6986_v3  ;;  %v3460_v19 = vadd.f32 %v3310_v39, %v2976_v34  ;;  %v1393_v9 = vadd.f32 %v1329_v55, %v1261_v45  ;;  %v109_v55 = vld [vmem:[%s8859_s0 + $0x2c8] sm:$0x3] }
 0x1d2   :  { %v2828_v33 = vsel %vm502_vm1, %v2825_v46, %v2827_v7  ;;  %v628_v51 = vrot.slane %v385_v61, 1  ;;  %v629_v50 = vrot.slane %v386_v8, 1  ;;  %v1487_v57 = vmul.f32 %v4983_v25, %v7067_v28 }
 0x1d3   :  { %v1113_v59 = vrot.slane %v870_v0, 2  ;;  %v1114_v41 = vrot.slane %v871_v2, 2  ;;  %4877 = vmatprep.mubr.msk.f32.mxu1 %vm3477_vm3, %v3460_v19  ;;  %v1877_v1 = vadd.f32 %v1728_v14, %v1393_v9  ;;  %v1488_v52 = vmul.f32 %v4983_v25, %v7071_v40 }
 0x1d4   :  { %v1971_v56 = vmul.f32 %v4985_v26, %v7067_v28  ;;  %v1972_v30 = vmul.f32 %v4985_v26, %v7071_v40  ;;  %v630_v46 = vsel %vm502_vm1, %v628_v51, %v629_v50  ;;  %v1330_v10 = vmul.f32 %v4981_v24, %v7067_v28 }
 0x1d5   :  { %v1115_v44 = vsel %vm987_vm2, %v1113_v59, %v1114_v41  ;;  %v1729_v63 = vrot.slane %v1487_v57, 1  ;;  %v2361_v60 = vadd.f32 %v2212_v17, %v1877_v1  ;;  %v777_v39 = vadd.f32 %v630_v46, %v292_v6 }
 0x1d6   :  { %v1730_v53 = vrot.slane %v1488_v52, 1  ;;  %v2213_v42 = vrot.slane %v1971_v56, 2  ;;  %v2214_v58 = vrot.slane %v1972_v30, 2  ;;  %v2587_v37 = vmul.f32 %v5020_v49, %v7150_v35  ;;  %v110_v56 = vld [vmem:[%s8859_s0 + $0x2d0] sm:$0xff]  ;;  %v111_v30 = vld [vmem:[%s8859_s0 + $0x2d8] sm:$0xff] }
 0x1d7   :  { %v2588_v4 = vmul.f32 %v5020_v49, %v7152_v18  ;;  %v3071_v48 = vmul.f32 %v6762_v47, %v7150_v35  ;;  %v2493_v12 = vadd.f32 %v2429_v36, %v2361_v60  ;;  %v3312_v29 = vsel %vm987_vm2, %v3309_v16, %v3311_v62 }
 0x1d8   :  { %v1262_v27 = vadd.f32 %v1115_v44, %v777_v39  ;;  %v7189_v38 = vmul.f32 %v6762_v47, %v7152_v18  ;;  %v1731_v43 = vsel %vm502_vm1, %v1729_v63, %v1730_v53  ;;  %v2430_v5 = vmul.f32 %v4991_v31, %v7150_v35 }
 0x1d9   :  { %v2829_v32 = vrot.slane %v2587_v37, 1  ;;  %v2830_v11 = vrot.slane %v2588_v4, 1  ;;  %v2977_v36 = vadd.f32 %v2828_v33, %v2493_v12  ;;  %v3313_v7 = vrot.slane %v3071_v48, 2 }
 0x1da   :  { %v1394_v54 = vadd.f32 %v1330_v10, %v1262_v27  ;;  %v3314_v16 = vrot.slane %v7189_v38, 2  ;;  %v2215_v14 = vsel %vm987_vm2, %v2213_v42, %v2214_v58  ;;  %v7199_v17 = vmax.f32 %v109_v55, 0.0 }
 0x1db   :  { %v387_v62 = vmul.f32 %v4977_v22, %v7034_v20  ;;  %v872_v34 = vmul.f32 %v4979_v23, %v7034_v20  ;;  %v3461_v45 = vadd.f32 %v3312_v29, %v2977_v36  ;;  %v2831_v6 = vsel %vm502_vm1, %v2829_v32, %v2830_v11 }
 0x1dc   :  { %v1878_v61 = vadd.f32 %v1731_v43, %v1394_v54  ;;  %v293_v8 = vmul.f32 %v4975_v21, %v6986_v3  ;;  %v1489_v19 = vmul.f32 %v4983_v25, %v7115_v15  ;;  %v1973_v9 = vmul.f32 %v4985_v26, %v7115_v15 }
 0x1dd   :  { %v631_v0 = vrot.slane %v387_v62, 1  ;;  %v1116_v2 = vrot.slane %v872_v34, 2  ;;  %4878 = vmatmul.mubr.msk.f32.gmra.mxu1 %vm3477_vm3, %v3461_v45  ;;  %v3315_v20 = vsel %vm987_vm2, %v3313_v7, %v3314_v16  ;;  %v2589_v51 = vmul.f32 %v5020_v49, %v7199_v17 }
 0x1de   :  { %v2362_v33 = vadd.f32 %v2215_v14, %v1878_v61  ;;  %v3073_v3 = vmul.f32 %v6762_v47, %v7199_v17  ;;  %v1732_v1 = vrot.slane %v1489_v19, 1  ;;  %v2216_v52 = vrot.slane %v1973_v9, 2 }
 0x1df   :  { %v632_v59 = vsel %vm502_vm1, %v629_v50, %v631_v0  ;;  %v1117_v57 = vsel %vm987_vm2, %v1114_v41, %v1116_v2  ;;  %v1331_v10 = vmul.f32 %v4981_v24, %v7071_v40  ;;  %v2832_v63 = vrot.slane %v2589_v51, 1 }
 0x1e0   :  { %v2494_v46 = vadd.f32 %v2430_v5, %v2362_v33  ;;  %v778_v44 = vadd.f32 %v632_v59, %v293_v8  ;;  %v1733_v50 = vsel %vm502_vm1, %v1730_v53, %v1732_v1  ;;  %v2217_v41 = vsel %vm987_vm2, %v2214_v58, %v2216_v52  ;;  %v112_v52 = vld [vmem:[%s8859_s0 + $0x2e0] sm:$0x3] }
 0x1e1   :  { %v2431_v60 = vmul.f32 %v4991_v31, %v7152_v18  ;;  %v3316_v39 = vrot.slane %v3073_v3, 2  ;;  %v7234_v4 = vmax.f32 %v110_v56, 0.0  ;;  %v7236_v48 = vmax.f32 %v111_v30, 0.0 }
 0x1e2   :  { %v2978_v42 = vadd.f32 %v2831_v6, %v2494_v46  ;;  %v1263_v37 = vadd.f32 %v1117_v57, %v778_v44  ;;  %v2833_v12 = vsel %vm502_vm1, %v2830_v11, %v2832_v63  ;;  %v388_v29 = vmul.f32 %v4977_v22, %v7067_v28 }
 0x1e3   :  { %v389_v53 = vmul.f32 %v4977_v22, %v7071_v40  ;;  %v873_v58 = vmul.f32 %v4979_v23, %v7067_v28  ;;  %v294_v43 = vmul.f32 %v4975_v21, %v7067_v28  ;;  %v874_v5 = vmul.f32 %v4979_v23, %v7071_v40 }
 0x1e4   :  { %v3462_v27 = vadd.f32 %v3315_v20, %v2978_v42  ;;  %v1395_v55 = vadd.f32 %v1331_v10, %v1263_v37  ;;  %v633_v32 = vrot.slane %v388_v29, 1  ;;  %v1490_v54 = vmul.f32 %v4983_v25, %v7150_v35 }
 0x1e5   :  { %v634_v36 = vrot.slane %v389_v53, 1  ;;  %v1118_v11 = vrot.slane %v873_v58, 2  ;;  %v1119_v14 = vrot.slane %v874_v5, 2  ;;  %v1491_v62 = vmul.f32 %v4983_v25, %v7152_v18 }
 0x1e6   :  { %4880 = vmatprep.mubr.msk.f32.mxu1 %vm3477_vm3, %v3462_v27  ;;  %v1879_v7 = vadd.f32 %v1733_v50, %v1395_v55  ;;  %v1974_v34 = vmul.f32 %v4985_v26, %v7150_v35  ;;  %v1332_v45 = vmul.f32 %v4981_v24, %v7150_v35  ;;  %v1734_v61 = vrot.slane %v1490_v54, 1 }
 0x1e7   :  { %v635_v28 = vsel %vm502_vm1, %v633_v32, %v634_v36  ;;  %v1975_v6 = vmul.f32 %v4985_v26, %v7152_v18  ;;  %v1120_v2 = vsel %vm987_vm2, %v1118_v11, %v1119_v14  ;;  %v1735_v19 = vrot.slane %v1491_v62, 1  ;;  %v113_v62 = vld [vmem:[%s8859_s0 + $0x2e8] sm:$0xff] }
 0x1e8   :  { %v2363_v8 = vadd.f32 %v2217_v41, %v1879_v7  ;;  %v779_v0 = vadd.f32 %v635_v28, %v294_v43  ;;  %v2218_v9 = vrot.slane %v1974_v34, 2  ;;  %v2590_v20 = vmul.f32 %v5020_v49, %v7234_v4 }
 0x1e9   :  { %v2219_v33 = vrot.slane %v1975_v6, 2  ;;  %v7266_v51 = vmul.f32 %v5020_v49, %v7236_v48  ;;  %v3317_v59 = vsel %vm987_vm2, %v3314_v16, %v3316_v39  ;;  %v3074_v1 = vmul.f32 %v6762_v47, %v7234_v4 }
 0x1ea   :  { %v2495_v3 = vadd.f32 %v2431_v60, %v2363_v8  ;;  %v1264_v57 = vadd.f32 %v1120_v2, %v779_v0  ;;  %v1736_v56 = vsel %vm502_vm1, %v1734_v61, %v1735_v19  ;;  %v2834_v30 = vrot.slane %v2590_v20, 1 }
 0x1eb   :  { %v2835_v46 = vrot.slane %v7266_v51, 1  ;;  %v7280_v44 = vmul.f32 %v6762_v47, %v7236_v48  ;;  %v2220_v16 = vsel %vm987_vm2, %v2218_v9, %v2219_v33  ;;  %v2432_v63 = vmul.f32 %v4991_v31, %v7234_v4  ;;  %v115_v51 = vld [vmem:[%s8859_s0 + $0x2f8] sm:$0x3] }
 0x1ec   :  { %v2979_v38 = vadd.f32 %v2833_v12, %v2495_v3  ;;  %v1396_v10 = vadd.f32 %v1332_v45, %v1264_v57  ;;  %v3318_v50 = vrot.slane %v3074_v1, 2  ;;  %v7286_v60 = vmax.f32 %v112_v52, 0.0 }
 0x1ed   :  { %v3319_v41 = vrot.slane %v7280_v44, 2  ;;  %v390_v39 = vmul.f32 %v4977_v22, %v7115_v15  ;;  %v295_v29 = vmul.f32 %v4975_v21, %v7071_v40  ;;  %v875_v12 = vmul.f32 %v4979_v23, %v7115_v15 }
 0x1ee   :  { %v3463_v42 = vadd.f32 %v3317_v59, %v2979_v38  ;;  %v1880_v37 = vadd.f32 %v1736_v56, %v1396_v10  ;;  %v2836_v53 = vsel %vm502_vm1, %v2834_v30, %v2835_v46  ;;  %v1492_v27 = vmul.f32 %v4983_v25, %v7199_v17 }
 0x1ef   :  { %v636_v58 = vrot.slane %v390_v39, 1  ;;  %v1976_v55 = vmul.f32 %v4985_v26, %v7199_v17  ;;  %v1121_v5 = vrot.slane %v875_v12, 2  ;;  %v1333_v40 = vmul.f32 %v4981_v24, %v7152_v18 }
 0x1f0   :  { %4881 = vmatmul.mubr.msk.f32.gmra.mxu1 %vm3477_vm3, %v3463_v42  ;;  %v2364_v43 = vadd.f32 %v2220_v16, %v1880_v37  ;;  %v2592_v15 = vmul.f32 %v5020_v49, %v7286_v60  ;;  %v1737_v11 = vrot.slane %v1492_v27, 1  ;;  %v3076_v7 = vmul.f32 %v6762_v47, %v7286_v60 }
 0x1f1   :  { %v637_v32 = vsel %vm502_vm1, %v634_v36, %v636_v58  ;;  %v2221_v54 = vrot.slane %v1976_v55, 2  ;;  %v3320_v28 = vsel %vm987_vm2, %v3318_v50, %v3319_v41  ;;  %v1122_v61 = vsel %vm987_vm2, %v1119_v14, %v1121_v5  ;;  %v114_v36 = vld [vmem:[%s8859_s0 + $0x2f0] sm:$0xff] }
 0x1f2   :  { %v2496_v34 = vadd.f32 %v2432_v63, %v2364_v43  ;;  %v780_v45 = vadd.f32 %v637_v32, %v295_v29  ;;  %v1738_v6 = vsel %vm502_vm1, %v1735_v19, %v1737_v11  ;;  %v2433_v8 = vmul.f32 %v4991_v31, %v7236_v48 }
 0x1f3   :  { %v2222_v47 = vsel %vm987_vm2, %v2219_v33, %v2221_v54  ;;  %v2837_v0 = vrot.slane %v2592_v15, 1  ;;  %v3321_v20 = vrot.slane %v3076_v7, 2  ;;  %v7323_v3 = vmax.f32 %v113_v62, 0.0 }
 0x1f4   :  { %v2980_v2 = vadd.f32 %v2836_v53, %v2496_v34  ;;  %v1265_v9 = vadd.f32 %v1122_v61, %v780_v45  ;;  %v7325_v59 = vmax.f32 %v114_v36, 0.0  ;;  %v296_v14 = vmul.f32 %v4975_v21, %v7150_v35  ;;  %v7367_v34 = vld [vmem:[%s8860_s1 + $0x8] ss:$0 sm:$0xff] }
 0x1f5   :  { %v391_v57 = vmul.f32 %v4977_v22, %v7150_v35  ;;  %v392_v19 = vmul.f32 %v4977_v22, %v7152_v18  ;;  %v876_v52 = vmul.f32 %v4979_v23, %v7150_v35  ;;  %v877_v56 = vmul.f32 %v4979_v23, %v7152_v18 }
 0x1f6   :  { %v3464_v33 = vadd.f32 %v3320_v28, %v2980_v2  ;;  %v1397_v1 = vadd.f32 %v1333_v40, %v1265_v9  ;;  %v1334_v10 = vmul.f32 %v4981_v24, %v7234_v4  ;;  %v1493_v16 = vmul.f32 %v4983_v25, %v7234_v4 }
 0x1f7   :  { %v638_v30 = vrot.slane %v391_v57, 1  ;;  %v639_v38 = vrot.slane %v392_v19, 1  ;;  %v1123_v50 = vrot.slane %v876_v52, 2  ;;  %v1124_v39 = vrot.slane %v877_v56, 2 }
 0x1f8   :  { %4883 = vmatprep.mubr.msk.f32.mxu1 %vm3477_vm3, %v3464_v33  ;;  %v1881_v63 = vadd.f32 %v1738_v6, %v1397_v1  ;;  %v1494_v42 = vmul.f32 %v4983_v25, %v7236_v48  ;;  %v1739_v37 = vrot.slane %v1493_v16, 1  ;;  %v1977_v29 = vmul.f32 %v4985_v26, %v7234_v4 }
 0x1f9   :  { %v640_v35 = vsel %vm502_vm1, %v638_v30, %v639_v38  ;;  %v1978_v12 = vmul.f32 %v4985_v26, %v7236_v48  ;;  %v1125_v27 = vsel %vm987_vm2, %v1123_v50, %v1124_v39  ;;  %v2838_v43 = vsel %vm502_vm1, %v2835_v46, %v2837_v0  ;;  %v116_v50 = vld [vmem:[%s8859_s0 + $0x300] sm:$0xff] }
 0x1fa   :  { %v2365_v53 = vadd.f32 %v2222_v47, %v1881_v63  ;;  %v781_v58 = vadd.f32 %v640_v35, %v296_v14  ;;  %v1740_v55 = vrot.slane %v1494_v42, 1  ;;  %v2223_v5 = vrot.slane %v1977_v29, 2 }
 0x1fb   :  { %v2224_v40 = vrot.slane %v1978_v12, 2  ;;  %v2593_v15 = vmul.f32 %v5020_v49, %v7323_v3  ;;  %v3322_v11 = vsel %vm987_vm2, %v3319_v41, %v3321_v20  ;;  %v2594_v7 = vmul.f32 %v5020_v49, %v7325_v59 }
 0x1fc   :  { %v2497_v32 = vadd.f32 %v2433_v8, %v2365_v53  ;;  %v1266_v54 = vadd.f32 %v1125_v27, %v781_v58  ;;  %v1741_v46 = vsel %vm502_vm1, %v1739_v37, %v1740_v55  ;;  %v3077_v44 = vmul.f32 %v7367_v34, %v7323_v3 }
 0x1fd   :  { %v2839_v62 = vrot.slane %v2593_v15, 1  ;;  %v7373_v41 = vmul.f32 %v7367_v34, %v7325_v59  ;;  %v2434_v61 = vmul.f32 %v4991_v31, %v7323_v3  ;;  %v2840_v36 = vrot.slane %v2594_v7, 1 }
 0x1fe   :  { %v2981_v28 = vadd.f32 %v2838_v43, %v2497_v32  ;;  %v1398_v45 = vadd.f32 %v1334_v10, %v1266_v54  ;;  %v2225_v6 = vsel %vm987_vm2, %v2223_v5, %v2224_v40  ;;  %v3323_v47 = vrot.slane %v3077_v44, 2 }
 0x1ff   :  { %v7378_v8 = vmax.f32 %v115_v51, 0.0  ;;  %v393_v0 = vmul.f32 %v4977_v22, %v7199_v17  ;;  %v297_v20 = vmul.f32 %v4975_v21, %v7152_v18  ;;  %v878_v14 = vmul.f32 %v4979_v23, %v7199_v17 }
 0x200   :  { %v3465_v2 = vadd.f32 %v3322_v11, %v2981_v28  ;;  %v1882_v9 = vadd.f32 %v1741_v46, %v1398_v45  ;;  %v2841_v57 = vsel %vm502_vm1, %v2839_v62, %v2840_v36  ;;  %v3324_v19 = vrot.slane %v7373_v41, 2 }
 0x201   :  { %v641_v33 = vrot.slane %v393_v0, 1  ;;  %v1495_v1 = vmul.f32 %v4983_v25, %v7286_v60  ;;  %v1126_v56 = vrot.slane %v878_v14, 2  ;;  %v1335_v30 = vmul.f32 %v4981_v24, %v7236_v48 }
 0x202   :  { %4884 = vmatmul.mubr.msk.f32.gmra.mxu1 %vm3477_vm3, %v3465_v2  ;;  %v2366_v52 = vadd.f32 %v2225_v6, %v1882_v9  ;;  %v1979_v18 = vmul.f32 %v4985_v26, %v7286_v60  ;;  %v2595_v16 = vmul.f32 %v5020_v49, %v7378_v8  ;;  %v3079_v63 = vmul.f32 %v7367_v34, %v7378_v8 }
 0x203   :  { %v642_v17 = vsel %vm502_vm1, %v639_v38, %v641_v33  ;;  %v1742_v10 = vrot.slane %v1495_v1, 1  ;;  %v1127_v37 = vsel %vm987_vm2, %v1124_v39, %v1126_v56  ;;  %v117_v38 = vld [vmem:[%s8859_s0 + $0x308] sm:$0xff]  ;;  %v3325_v12 = vsel %vm987_vm2, %v3323_v47, %v3324_v19 }
 0x204   :  { %v2498_v42 = vadd.f32 %v2434_v61, %v2366_v52  ;;  %v782_v35 = vadd.f32 %v642_v17, %v297_v20  ;;  %v2226_v29 = vrot.slane %v1979_v18, 2  ;;  %v2435_v58 = vmul.f32 %v4991_v31, %v7325_v59 }
 0x205   :  { %v1743_v53 = vsel %vm502_vm1, %v1740_v55, %v1742_v10  ;;  %v2842_v27 = vrot.slane %v2595_v16, 1  ;;  %v3326_v15 = vrot.slane %v3079_v63, 2  ;;  %v7411_v32 = vmax.f32 %v116_v50, 0.0 }
 0x206   :  { %v2982_v43 = vadd.f32 %v2841_v57, %v2498_v42  ;;  %v1267_v5 = vadd.f32 %v1127_v37, %v782_v35  ;;  %v2227_v39 = vsel %vm987_vm2, %v2224_v40, %v2226_v29  ;;  %v7415_v54 = vmax.f32 %v117_v38, 0.0 }
 0x207   :  { %v2843_v11 = vsel %vm502_vm1, %v2840_v36, %v2842_v27  ;;  %v394_v7 = vmul.f32 %v4977_v22, %v7234_v4  ;;  %v395_v46 = vmul.f32 %v4977_v22, %v7236_v48  ;;  %v879_v62 = vmul.f32 %v4979_v23, %v7234_v4 }
 0x208   :  { %v3466_v51 = vadd.f32 %v3325_v12, %v2982_v43  ;;  %v1399_v55 = vadd.f32 %v1335_v30, %v1267_v5  ;;  %v298_v44 = vmul.f32 %v4975_v21, %v7234_v4  ;;  %v880_v40 = vmul.f32 %v4979_v23, %v7236_v48 }
 0x209   :  { %v643_v41 = vrot.slane %v394_v7, 1  ;;  %v1496_v28 = vmul.f32 %v4983_v25, %v7323_v3  ;;  %v644_v61 = vrot.slane %v395_v46, 1  ;;  %v1128_v36 = vrot.slane %v879_v62, 2 }
 0x20a   :  { %4886 = vmatprep.mubr.msk.f32.mxu1 %vm3477_vm3, %v3466_v51  ;;  %v1883_v45 = vadd.f32 %v1743_v53, %v1399_v55  ;;  %v1497_v6 = vmul.f32 %v4983_v25, %v7325_v59  ;;  %v1129_v47 = vrot.slane %v880_v40, 2  ;;  %v1336_v0 = vmul.f32 %v4981_v24, %v7323_v3 }
 0x20b   :  { %v1980_v4 = vmul.f32 %v4985_v26, %v7323_v3  ;;  %v1981_v2 = vmul.f32 %v4985_v26, %v7325_v59  ;;  %v645_v20 = vsel %vm502_vm1, %v643_v41, %v644_v61  ;;  %v1744_v14 = vrot.slane %v1496_v28, 1 }
 0x20c   :  { %v2367_v9 = vadd.f32 %v2227_v39, %v1883_v45  ;;  %v1745_v57 = vrot.slane %v1497_v6, 1  ;;  %v783_v33 = vadd.f32 %v645_v20, %v298_v44  ;;  %v1130_v1 = vsel %vm987_vm2, %v1128_v36, %v1129_v47  ;;  %v119_v45 = vld [vmem:[%s8859_s0 + $0x318] sm:$0xff] }
 0x20d   :  { %v2228_v52 = vrot.slane %v1980_v4, 2  ;;  %v2229_v56 = vrot.slane %v1981_v2, 2  ;;  %v3327_v18 = vsel %vm987_vm2, %v3324_v19, %v3326_v15  ;;  %v2596_v17 = vmul.f32 %v5020_v49, %v7411_v32  ;;  %v118_v19 = vld [vmem:[%s8859_s0 + $0x310] sm:$0x3]  ;;  %v120_v2 = vld [vmem:[%s8859_s0 + $0x320] sm:$0xff] }
 0x20e   :  { %v2499_v30 = vadd.f32 %v2435_v58, %v2367_v9  ;;  %v2597_v10 = vmul.f32 %v5020_v49, %v7415_v54  ;;  %v1268_v16 = vadd.f32 %v1130_v1, %v783_v33  ;;  %v2436_v63 = vmul.f32 %v4991_v31, %v7411_v32 }
 0x20f   :  { %v3080_v50 = vmul.f32 %v7367_v34, %v7411_v32  ;;  %v7451_v42 = vmul.f32 %v7367_v34, %v7415_v54  ;;  %v1746_v37 = vsel %vm502_vm1, %v1744_v14, %v1745_v57  ;;  %v2844_v29 = vrot.slane %v2596_v17, 1 }
 0x210   :  { %v2983_v35 = vadd.f32 %v2843_v11, %v2499_v30  ;;  %v2845_v38 = vrot.slane %v2597_v10, 1  ;;  %v1400_v12 = vadd.f32 %v1336_v0, %v1268_v16  ;;  %v2230_v53 = vsel %vm987_vm2, %v2228_v52, %v2229_v56 }
 0x211   :  { %v3328_v58 = vrot.slane %v3080_v50, 2  ;;  %v3329_v27 = vrot.slane %v7451_v42, 2  ;;  %v7459_v5 = vmax.f32 %v118_v19, 0.0  ;;  %v396_v15 = vmul.f32 %v4977_v22, %v7286_v60 }
 0x212   :  { %v3467_v43 = vadd.f32 %v3327_v18, %v2983_v35  ;;  %v881_v39 = vmul.f32 %v4979_v23, %v7286_v60  ;;  %v1884_v11 = vadd.f32 %v1746_v37, %v1400_v12  ;;  %v2846_v7 = vsel %vm502_vm1, %v2844_v29, %v2845_v38 }
 0x213   :  { %v299_v51 = vmul.f32 %v4975_v21, %v7236_v48  ;;  %v1498_v55 = vmul.f32 %v4983_v25, %v7378_v8  ;;  %v3330_v46 = vsel %vm987_vm2, %v3328_v58, %v3329_v27  ;;  %v646_v62 = vrot.slane %v396_v15, 1 }
 0x214   :  { %4887 = vmatmul.mubr.msk.f32.gmra.mxu1 %vm3477_vm3, %v3467_v43  ;;  %v1131_v44 = vrot.slane %v881_v39, 2  ;;  %v1982_v60 = vmul.f32 %v4985_v26, %v7378_v8  ;;  %v2368_v41 = vadd.f32 %v2230_v53, %v1884_v11  ;;  %v2598_v28 = vmul.f32 %v5020_v49, %v7459_v5 }
 0x215   :  { %v1747_v40 = vrot.slane %v1498_v55, 1  ;;  %v3082_v48 = vmul.f32 %v7367_v34, %v7459_v5  ;;  %v647_v36 = vsel %vm502_vm1, %v644_v61, %v646_v62  ;;  %v1337_v0 = vmul.f32 %v4981_v24, %v7325_v59 }
 0x216   :  { %v1132_v6 = vsel %vm987_vm2, %v1129_v47, %v1131_v44  ;;  %v2231_v4 = vrot.slane %v1982_v60, 2  ;;  %v2500_v9 = vadd.f32 %v2436_v63, %v2368_v41  ;;  %v784_v20 = vadd.f32 %v647_v36, %v299_v51 }
 0x217   :  { %v2437_v14 = vmul.f32 %v4991_v31, %v7415_v54  ;;  %v2847_v33 = vrot.slane %v2598_v28, 1  ;;  %v1748_v1 = vsel %vm502_vm1, %v1745_v57, %v1747_v40  ;;  %v3331_v52 = vrot.slane %v3082_v48, 2 }
 0x218   :  { %v2232_v61 = vsel %vm987_vm2, %v2229_v56, %v2231_v4  ;;  %v7494_v47 = vmax.f32 %v119_v45, 0.0  ;;  %v2984_v30 = vadd.f32 %v2846_v7, %v2500_v9  ;;  %v1269_v18 = vadd.f32 %v1132_v6, %v784_v20 }
 0x219   :  { %v7496_v17 = vmax.f32 %v120_v2, 0.0  ;;  %v397_v10 = vmul.f32 %v4977_v22, %v7323_v3  ;;  %v300_v16 = vmul.f32 %v4975_v21, %v7323_v3  ;;  %v398_v63 = vmul.f32 %v4977_v22, %v7325_v59 }
 0x21a   :  { %v882_v57 = vmul.f32 %v4979_v23, %v7323_v3  ;;  %v883_v56 = vmul.f32 %v4979_v23, %v7325_v59  ;;  %v3468_v50 = vadd.f32 %v3330_v46, %v2984_v30  ;;  %v1401_v19 = vadd.f32 %v1337_v0, %v1269_v18  ;;  %v121_v0 = vld [vmem:[%s8859_s0 + $0x328] sm:$0x3] }
 0x21b   :  { %v2848_v35 = vsel %vm502_vm1, %v2845_v38, %v2847_v33  ;;  %v648_v37 = vrot.slane %v397_v10, 1  ;;  %v649_v29 = vrot.slane %v398_v63, 1  ;;  %v1499_v58 = vmul.f32 %v4983_v25, %v7411_v32 }
 0x21c   :  { %v1133_v12 = vrot.slane %v882_v57, 2  ;;  %v1134_v53 = vrot.slane %v883_v56, 2  ;;  %4889 = vmatprep.mubr.msk.f32.mxu1 %vm3477_vm3, %v3468_v50  ;;  %v1885_v43 = vadd.f32 %v1748_v1, %v1401_v19  ;;  %v1500_v3 = vmul.f32 %v4983_v25, %v7415_v54  ;;  %v7552_v57 = vpop.f32.mrf.mxu0 }
 0x21d   :  { %v1983_v15 = vmul.f32 %v4985_v26, %v7411_v32  ;;  %v1984_v39 = vmul.f32 %v4985_v26, %v7415_v54  ;;  %v650_v38 = vsel %vm502_vm1, %v648_v37, %v649_v29  ;;  %v1338_v7 = vmul.f32 %v4981_v24, %v7411_v32 }
 0x21e   :  { %v1135_v11 = vsel %vm987_vm2, %v1133_v12, %v1134_v53  ;;  %v1749_v51 = vrot.slane %v1499_v58, 1  ;;  %v2369_v55 = vadd.f32 %v2232_v61, %v1885_v43  ;;  %v785_v46 = vadd.f32 %v650_v38, %v300_v16  ;;  %v123_v38 = vld [vmem:[%s8859_s0 + $0x338] sm:$0xff] }
 0x21f   :  { %v1750_v62 = vrot.slane %v1500_v3, 1  ;;  %v2233_v44 = vrot.slane %v1983_v15, 2  ;;  %v2234_v60 = vrot.slane %v1984_v39, 2  ;;  %v2599_v41 = vmul.f32 %v5020_v49, %v7494_v47  ;;  %v122_v39 = vld [vmem:[%s8859_s0 + $0x330] sm:$0xff] }
 0x220   :  { %v2600_v40 = vmul.f32 %v5020_v49, %v7496_v17  ;;  %v3083_v28 = vmul.f32 %v7367_v34, %v7494_v47  ;;  %v2501_v48 = vadd.f32 %v2437_v14, %v2369_v55  ;;  %v3332_v45 = vsel %vm987_vm2, %v3329_v27, %v3331_v52 }
 0x221   :  { %v1270_v36 = vadd.f32 %v1135_v11, %v785_v46  ;;  %v7533_v6 = vmul.f32 %v7367_v34, %v7496_v17  ;;  %v1751_v4 = vsel %vm502_vm1, %v1749_v51, %v1750_v62  ;;  %v2438_v2 = vmul.f32 %v4991_v31, %v7494_v47  ;;  %v7576_v46 = vpop.f32.mrf.mxu0 }
 0x222   :  { %v2849_v9 = vrot.slane %v2599_v41, 1  ;;  %v2850_v20 = vrot.slane %v2600_v40, 1  ;;  %v2985_v14 = vadd.f32 %v2848_v35, %v2501_v48  ;;  %v3333_v33 = vrot.slane %v3083_v28, 2 }
 0x223   :  { %v1402_v42 = vadd.f32 %v1338_v7, %v1270_v36  ;;  %v3334_v27 = vrot.slane %v7533_v6, 2  ;;  %v2235_v1 = vsel %vm987_vm2, %v2233_v44, %v2234_v60  ;;  %v7543_v61 = vmax.f32 %v121_v0, 0.0 }
 0x224   :  { %v399_v52 = vmul.f32 %v4977_v22, %v7378_v8  ;;  %v884_v30 = vmul.f32 %v4979_v23, %v7378_v8  ;;  %v3469_v18 = vadd.f32 %v3332_v45, %v2985_v14  ;;  %v2851_v16 = vsel %vm502_vm1, %v2849_v9, %v2850_v20 }
 0x225   :  { %v1886_v10 = vadd.f32 %v1751_v4, %v1402_v42  ;;  %v301_v63 = vmul.f32 %v4975_v21, %v7325_v59  ;;  %v1501_v19 = vmul.f32 %v4983_v25, %v7459_v5  ;;  %v1985_v35 = vmul.f32 %v4985_v26, %v7459_v5 }
 0x226   :  { %v651_v56 = vrot.slane %v399_v52, 1  ;;  %v1136_v50 = vrot.slane %v884_v30, 2  ;;  %4890 = vmatmul.mubr.msk.f32.gmra.mxu1 %vm3477_vm3, %v3469_v18  ;;  %v3335_v37 = vsel %vm987_vm2, %v3333_v33, %v3334_v27  ;;  %v2601_v59 = vmul.f32 %v5020_v49, %v7543_v61 }
 0x227   :  { %v2370_v8 = vadd.f32 %v2235_v1, %v1886_v10  ;;  %v3085_v12 = vmul.f32 %v7367_v34, %v7543_v61  ;;  %v1752_v3 = vrot.slane %v1501_v19, 1  ;;  %v2236_v15 = vrot.slane %v1985_v35, 2 }
 0x228   :  { %v652_v58 = vsel %vm502_vm1, %v649_v29, %v651_v56  ;;  %v1137_v43 = vsel %vm987_vm2, %v1134_v53, %v1136_v50  ;;  %v1339_v51 = vmul.f32 %v4981_v24, %v7415_v54  ;;  %v2852_v55 = vrot.slane %v2601_v59, 1 }
 0x229   :  { %v2502_v11 = vadd.f32 %v2438_v2, %v2370_v8  ;;  %v786_v7 = vadd.f32 %v652_v58, %v301_v63  ;;  %v1753_v29 = vsel %vm502_vm1, %v1750_v62, %v1752_v3  ;;  %v2237_v53 = vsel %vm987_vm2, %v2234_v60, %v2236_v15 }
 0x22a   :  { %v2439_v44 = vmul.f32 %v4991_v31, %v7496_v17  ;;  %v3336_v41 = vrot.slane %v3085_v12, 2  ;;  %v7582_v48 = vmax.f32 %v122_v39, 0.0  ;;  %v7584_v45 = vmax.f32 %v123_v38, 0.0 }
 0x22b   :  { %v2986_v40 = vadd.f32 %v2851_v16, %v2502_v11  ;;  %v1271_v28 = vadd.f32 %v1137_v43, %v786_v7  ;;  %v2853_v36 = vsel %vm502_vm1, %v2850_v20, %v2852_v55  ;;  %v400_v0 = vmul.f32 %v4977_v22, %v7411_v32  ;;  %v7601_v20 = vpop.f32.mrf.mxu0  ;;  %v124_v7 = vld [vmem:[%s8859_s0 + $0x340] sm:$0x3] }
 0x22c   :  { %v7591_v62 = vmul.f32 %v4977_v22, %v7415_v54  ;;  %v885_v60 = vmul.f32 %v4979_v23, %v7411_v32  ;;  %v302_v9 = vmul.f32 %v4975_v21, %v7411_v32  ;;  %v7599_v14 = vmul.f32 %v4979_v23, %v7415_v54  ;;  %8906 = vst [vmem:[#allocation3_spill] sm:$0xff] %v7601_v20 }
 0x22d   :  { %v3470_v4 = vadd.f32 %v3335_v37, %v2986_v40  ;;  %v1403_v2 = vadd.f32 %v1339_v51, %v1271_v28  ;;  %v653_v42 = vrot.slane %v400_v0, 1  ;;  %v1502_v52 = vmul.f32 %v4983_v25, %v7494_v47  ;;  %v7618_v59 = vpop.f32.mrf.mxu0 }
 0x22e   :  { %v654_v33 = vrot.slane %v7591_v62, 1  ;;  %v1138_v1 = vrot.slane %v885_v60, 2  ;;  %v1139_v18 = vrot.slane %v7599_v14, 2  ;;  %v1503_v32 = vmul.f32 %v4983_v25, %v7496_v17  ;;  %8907 = vst [vmem:[#allocation4_spill] sm:$0xff] %v7618_v59 }
 0x22f   :  { %4892 = vmatprep.mubr.msk.f32.mxu1 %vm3477_vm3, %v3470_v4  ;;  %v1887_v30 = vadd.f32 %v1753_v29, %v1403_v2  ;;  %v1986_v10 = vmul.f32 %v4985_v26, %v7494_v47  ;;  %v1340_v63 = vmul.f32 %v4981_v24, %v7494_v47  ;;  %v1754_v56 = vrot.slane %v1502_v52, 1  ;;  %v7643_v40 = vpop.f32.mrf.mxu0 }
 0x230   :  { %v655_v16 = vsel %vm502_vm1, %v653_v42, %v654_v33  ;;  %v1987_v50 = vmul.f32 %v4985_v26, %v7496_v17  ;;  %v1140_v8 = vsel %vm987_vm2, %v1138_v1, %v1139_v18  ;;  %v1755_v37 = vrot.slane %v1503_v32, 1  ;;  %8908 = vst [vmem:[#allocation5_spill] sm:$0xff] %v7643_v40 }
 0x231   :  { %v2371_v19 = vadd.f32 %v2237_v53, %v1887_v30  ;;  %v787_v35 = vadd.f32 %v655_v16, %v302_v9  ;;  %v2238_v12 = vrot.slane %v1986_v10, 2  ;;  %v2602_v43 = vmul.f32 %v5020_v49, %v7582_v48  ;;  %v7666_v10 = vpop.f32.mrf.mxu0 }
 0x232   :  { %v2239_v58 = vrot.slane %v1987_v50, 2  ;;  %v7624_v3 = vmul.f32 %v5020_v49, %v7584_v45  ;;  %v3337_v39 = vsel %vm987_vm2, %v3334_v27, %v3336_v41  ;;  %v3086_v11 = vmul.f32 %v7367_v34, %v7582_v48  ;;  %8909 = vst [vmem:[#allocation6_spill] sm:$0xff] %v7666_v10 }
 0x233   :  { %v2503_v15 = vadd.f32 %v2439_v44, %v2371_v19  ;;  %v1272_v38 = vadd.f32 %v1140_v8, %v787_v35  ;;  %v1756_v51 = vsel %vm502_vm1, %v1754_v56, %v1755_v37  ;;  %v2854_v55 = vrot.slane %v2602_v43, 1  ;;  %v125_v19 = vld [vmem:[%s8859_s0 + $0x348] sm:$0xff] }
 0x234   :  { %v2855_v29 = vrot.slane %v7624_v3, 1  ;;  %v7638_v53 = vmul.f32 %v7367_v34, %v7584_v45  ;;  %v2240_v27 = vsel %vm987_vm2, %v2238_v12, %v2239_v58  ;;  %v2440_v41 = vmul.f32 %v4991_v31, %v7582_v48 }
 0x235   :  { %v2987_v6 = vadd.f32 %v2853_v36, %v2503_v15  ;;  %v1404_v44 = vadd.f32 %v1340_v63, %v1272_v38  ;;  %v3338_v28 = vrot.slane %v3086_v11, 2  ;;  %v7646_v62 = vmax.f32 %v124_v7, 0.0 }
 0x236   :  { %v3339_v0 = vrot.slane %v7638_v53, 2  ;;  %v402_v60 = vmul.f32 %v4977_v22, %v7459_v5  ;;  %v303_v36 = vmul.f32 %v4975_v21, %v7415_v54  ;;  %v887_v9 = vmul.f32 %v4979_v23, %v7459_v5 }
 0x237   :  { %v3471_v4 = vadd.f32 %v3337_v39, %v2987_v6  ;;  %v1888_v2 = vadd.f32 %v1756_v51, %v1404_v44  ;;  %v2856_v14 = vsel %vm502_vm1, %v2854_v55, %v2855_v29  ;;  %v1504_v1 = vmul.f32 %v4983_v25, %v7543_v61  ;;  %v7685_v44 = vpop.f32.mrf.mxu0 }
 0x238   :  { %v656_v42 = vrot.slane %v402_v60, 1  ;;  %v1988_v52 = vmul.f32 %v4985_v26, %v7543_v61  ;;  %v1141_v32 = vrot.slane %v887_v9, 2  ;;  %v1341_v54 = vmul.f32 %v4981_v24, %v7496_v17 }
 0x239   :  { %4893 = vmatmul.mubr.msk.f32.gmra.mxu1 %vm3477_vm3, %v3471_v4  ;;  %v2372_v30 = vadd.f32 %v2240_v27, %v1888_v2  ;;  %v2604_v5 = vmul.f32 %v5020_v49, %v7646_v62  ;;  %v1757_v63 = vrot.slane %v1504_v1, 1  ;;  %v3088_v50 = vmul.f32 %v7367_v34, %v7646_v62 }
 0x23a   :  { %v657_v16 = vsel %vm502_vm1, %v654_v33, %v656_v42  ;;  %v2241_v56 = vrot.slane %v1988_v52, 2  ;;  %v3340_v8 = vsel %vm987_vm2, %v3338_v28, %v3339_v0  ;;  %v1142_v43 = vsel %vm987_vm2, %v1139_v18, %v1141_v32  ;;  %v126_v33 = vld [vmem:[%s8859_s0 + $0x350] sm:$0xff] }
 0x23b   :  { %v2504_v35 = vadd.f32 %v2440_v41, %v2372_v30  ;;  %v788_v12 = vadd.f32 %v657_v16, %v303_v36  ;;  %v1758_v15 = vsel %vm502_vm1, %v1755_v37, %v1757_v63  ;;  %v2441_v38 = vmul.f32 %v4991_v31, %v7584_v45 }
 0x23c   :  { %v2242_v39 = vsel %vm987_vm2, %v2239_v58, %v2241_v56  ;;  %v2857_v11 = vrot.slane %v2604_v5, 1  ;;  %v3341_v55 = vrot.slane %v3088_v50, 2  ;;  %v233_v6 = vmax.f32 %v125_v19, 0.0 }
 0x23d   :  { %v2988_v7 = vadd.f32 %v2856_v14, %v2504_v35  ;;  %v1273_v51 = vadd.f32 %v1142_v43, %v788_v12  ;;  %v7687_v27 = vmax.f32 %v126_v33, 0.0  ;;  %v304_v18 = vmul.f32 %v4975_v21, %v7494_v47 }
 0x23e   :  { %v403_v37 = vmul.f32 %v4977_v22, %v7494_v47  ;;  %v404_v58 = vmul.f32 %v4977_v22, %v7496_v17  ;;  %v888_v60 = vmul.f32 %v4979_v23, %v7494_v47  ;;  %v889_v4 = vmul.f32 %v4979_v23, %v7496_v17  ;;  %v7706_v47 = vpop.f32.mrf.mxu0 }
 0x23f   :  { %v3472_v41 = vadd.f32 %v3340_v8, %v2988_v7  ;;  %v1405_v28 = vadd.f32 %v1341_v54, %v1273_v51  ;;  %v1342_v9 = vmul.f32 %v4981_v24, %v7582_v48  ;;  %v1505_v14 = vmul.f32 %v4983_v25, %v7582_v48 }
 0x240   :  { %v658_v2 = vrot.slane %v403_v37, 1  ;;  %v659_v36 = vrot.slane %v404_v58, 1  ;;  %v1143_v1 = vrot.slane %v888_v60, 2  ;;  %v1144_v52 = vrot.slane %v889_v4, 2  ;;  %v7728_v7 = vpop.f32.mrf.mxu0 }
 0x241   :  { %4895 = vmatprep.mubr.msk.f32.mxu1 %vm3477_vm3, %v3472_v41  ;;  %v1889_v42 = vadd.f32 %v1758_v15, %v1405_v28  ;;  %v1506_v30 = vmul.f32 %v4983_v25, %v7584_v45  ;;  %v1759_v54 = vrot.slane %v1505_v14, 1  ;;  %v1989_v5 = vmul.f32 %v4985_v26, %v7582_v48 }
 0x242   :  { %v660_v32 = vsel %vm502_vm1, %v658_v2, %v659_v36  ;;  %v7713_v16 = vmul.f32 %v4985_v26, %v7584_v45  ;;  %v1145_v50 = vsel %vm987_vm2, %v1143_v1, %v1144_v52  ;;  %v2858_v35 = vsel %vm502_vm1, %v2855_v29, %v2857_v11 }
 0x243   :  { %v2373_v63 = vadd.f32 %v2242_v39, %v1889_v42  ;;  %v789_v56 = vadd.f32 %v660_v32, %v304_v18  ;;  %v1760_v19 = vrot.slane %v1506_v30, 1  ;;  %v2243_v8 = vrot.slane %v1989_v5, 2  ;;  %v127_v39 = vld [vmem:[%s8859_s0 + $0x358] sm:$0x3] }
 0x244   :  { %v2244_v12 = vrot.slane %v7713_v16, 2  ;;  %v2605_v43 = vmul.f32 %v5020_v49, %v233_v6  ;;  %v7723_v15 = vmul.f32 %v5020_v49, %v7687_v27  ;;  %v3342_v3 = vsel %vm987_vm2, %v3339_v0, %v3341_v55 }
 0x245   :  { %v2505_v33 = vadd.f32 %v2441_v38, %v2373_v63  ;;  %v1274_v48 = vadd.f32 %v1145_v50, %v789_v56  ;;  %v1761_v29 = vsel %vm502_vm1, %v1759_v54, %v1760_v19  ;;  %v3089_v11 = vmul.f32 %v7367_v34, %v233_v6 }
 0x246   :  { %v3090_v38 = vmul.f32 %v7367_v34, %v7687_v27  ;;  %v2245_v37 = vsel %vm987_vm2, %v2243_v8, %v2244_v12  ;;  %v2442_v58 = vmul.f32 %v4991_v31, %v233_v6  ;;  %v2859_v41 = vrot.slane %v2605_v43, 1 }
 0x247   :  { %v2989_v51 = vadd.f32 %v2858_v35, %v2505_v33  ;;  %v1406_v18 = vadd.f32 %v1342_v9, %v1274_v48  ;;  %v2860_v28 = vrot.slane %v7723_v15, 1  ;;  %v235_v60 = vmax.f32 %v127_v39, 0.0  ;;  %v7746_v9 = vpop.f32.mrf.mxu0 }
 0x248   :  { %v405_v53 = vmul.f32 %v4977_v22, %v7543_v61  ;;  %v305_v4 = vmul.f32 %v4975_v21, %v7496_v17  ;;  %v890_v2 = vmul.f32 %v4979_v23, %v7543_v61  ;;  %v3343_v14 = vrot.slane %v3089_v11, 2 }
 0x249   :  { %v3473_v0 = vadd.f32 %v3342_v3, %v2989_v51  ;;  %v1890_v55 = vadd.f32 %v1761_v29, %v1406_v18  ;;  %v3344_v42 = vrot.slane %v3090_v38, 2  ;;  %v1507_v1 = vmul.f32 %v4983_v25, %v7646_v62  ;;  %v7758_v25 = vpop.f32.mrf.mxu0 }
 0x24a   :  { %v661_v6 = vrot.slane %v405_v53, 1  ;;  %v1146_v22 = vrot.slane %v890_v2, 2  ;;  %v1991_v32 = vmul.f32 %v4985_v26, %v7646_v62  ;;  %v2861_v21 = vsel %vm502_vm1, %v2859_v41, %v2860_v28 }
 0x24b   :  { %4896 = vmatmul.mubr.msk.f32.gmra.mxu1 %vm3477_vm3, %v3473_v0  ;;  %v2374_v30 = vadd.f32 %v2245_v37, %v1890_v55  ;;  %v1762_v23 = vrot.slane %v1507_v1, 1  ;;  %v1343_v16 = vmul.f32 %v4981_v24, %v7584_v45  ;;  %v3345_v63 = vsel %vm987_vm2, %v3343_v14, %v3344_v42 }
 0x24c   :  { %v662_v17 = vsel %vm502_vm1, %v659_v36, %v661_v6  ;;  %v1147_v5 = vsel %vm987_vm2, %v1144_v52, %v1146_v22  ;;  %v2246_v56 = vrot.slane %v1991_v32, 2  ;;  %v2607_v50 = vmul.f32 %v5020_v49, %v235_v60  ;;  %v7770_v49 = vpop.f32.mrf.mxu0 }
 0x24d   :  { %v2506_v61 = vadd.f32 %v2442_v58, %v2374_v30  ;;  %v790_v54 = vadd.f32 %v662_v17, %v305_v4  ;;  %v1763_v36 = vsel %vm502_vm1, %v1760_v19, %v1762_v23  ;;  %v3091_v35 = vmul.f32 %v7367_v34, %v235_v60 }
 0x24e   :  { %v4061_v52 = vsel %vm4059_vm4, %v7552_v57, 0.0  ;;  %v4060_v24 = vsel %vm4059_vm4, %v7576_v46, 0.0  ;;  %v4063_v33 = vsel %vm4059_vm4, %v7618_v59, 0.0  ;;  %v2247_v48 = vsel %vm987_vm2, %v2244_v12, %v2246_v56  ;;  %v7780_v18 = vpop.f32.mrf.mxu0 }
 0x24f   :  { %v2990_v26 = vadd.f32 %v2861_v21, %v2506_v61  ;;  %v1275_v62 = vadd.f32 %v1147_v5, %v790_v54  ;;  %v4062_v43 = vadd.f32 %v4061_v52, %v4060_v24  ;;  %v2862_v15 = vrot.slane %v2607_v50, 1 }
 0x250   :  { %v2443_v19 = vmul.f32 %v4991_v31, %v7687_v27  ;;  %v3346_v3 = vrot.slane %v3091_v35, 2  ;;  %v4065_v29 = vsel %vm4059_vm4, %v7601_v20, 0.0  ;;  %v4067_v11 = vsel %vm4059_vm4, %v7666_v10, 0.0  ;;  %v7788_v0 = vpop.f32.mrf.mxu0 }
 0x251   :  { %v3474_v45 = vadd.f32 %v3345_v63, %v2990_v26  ;;  %v1407_v8 = vadd.f32 %v1343_v16, %v1275_v62  ;;  %v4064_v39 = vadd.f32 %v4063_v33, %v4062_v43  ;;  %v2863_v12 = vsel %vm502_vm1, %v2860_v28, %v2862_v15 }
 0x252   :  { %v3347_v41 = vsel %vm987_vm2, %v3344_v42, %v3346_v3  ;;  %v4069_v31 = vsel %vm4059_vm4, %v7643_v40, 0.0  ;;  %v4071_v27 = vsel %vm4059_vm4, %v7706_v47, 0.0  ;;  %v4073_v2 = vsel %vm4059_vm4, %v7685_v44, 0.0  ;;  %v7795_v42 = vpop.f32.mrf.mxu0 }
 0x253   :  { %4898 = vmatprep.mubr.msk.f32.mxu1 %vm3477_vm3, %v3474_v45  ;;  %v1891_v34 = vadd.f32 %v1763_v36, %v1407_v8  ;;  %v4066_v51 = vadd.f32 %v4065_v29, %v4064_v39  ;;  %v4075_v28 = vsel %vm4059_vm4, %v7746_v9, 0.0  ;;  %v4077_v1 = vsel %vm4059_vm4, %v7728_v7, 0.0 }
 0x254   :  { %v4079_v30 = vsel %vm4059_vm4, %v7770_v49, 0.0  ;;  %v7801_v32 = vpop.f32.mrf.mxu0  ;;  %v4081_v17 = vsel %vm4059_vm4, %v7758_v25, 0.0  ;;  %v4083_v23 = vsel %vm4059_vm4, %v7788_v0, 0.0  ;;  %v4085_v16 = vsel %vm4059_vm4, %v7780_v18, 0.0 }
 0x255   :  { %v2375_v38 = vadd.f32 %v2247_v48, %v1891_v34  ;;  %v4068_v58 = vadd.f32 %v4067_v11, %v4066_v51  ;;  %v4087_v63 = vsel %vm4059_vm4, %v7801_v32, 0.0  ;;  %v4089_v62 = vsel %vm4059_vm4, %v7795_v42, 0.0 }
 0x256   :  { %v7807_v54 = vpop.f32.mrf.mxu0 }
 0x257   :  { %v2507_v37 = vadd.f32 %v2443_v19, %v2375_v38  ;;  %v4070_v53 = vadd.f32 %v4069_v31, %v4068_v58  ;;  %v4093_v8 = vsel %vm4059_vm4, %v7807_v54, 0.0 }
 0x258   :  { %v7813_v50 = vpop.f32.mrf.mxu0 }
 0x259   :  { %v2991_v60 = vadd.f32 %v2863_v12, %v2507_v37  ;;  %v4072_v4 = vadd.f32 %v4071_v27, %v4070_v53  ;;  %v4091_v36 = vsel %vm4059_vm4, %v7813_v50, 0.0 }
 0x25a   :  { %v7819_v52 = vpop.f32.mrf.mxu0 }
 0x25b   :  { %v3475_v55 = vadd.f32 %v3347_v41, %v2991_v60  ;;  %v4074_v14 = vadd.f32 %v4073_v2, %v4072_v4  ;;  %v4097_v19 = vsel %vm4059_vm4, %v7819_v52, 0.0 }
 0x25c   :  { %v7821_v45 = vpop.f32.mrf.mxu0 }
 0x25d   :  { %4899 = vmatmul.mubr.msk.f32.gmra.mxu1 %vm3477_vm3, %v3475_v55  ;;  %v4076_v6 = vadd.f32 %v4075_v28, %v4074_v14  ;;  %v4095_v33 = vsel %vm4059_vm4, %v7821_v45, 0.0 }
 0x25e   :  { %v7827_v48 = vpop.f32.mrf.mxu0 }
 0x25f   :  { %v4078_v22 = vadd.f32 %v4077_v1, %v4076_v6  ;;  %v4101_v51 = vsel %vm4059_vm4, %v7827_v48, 0.0 }
 0x260   :  { %v7829_v34 = vpop.f32.mrf.mxu0 }
 0x261   :  { %v4080_v21 = vadd.f32 %v4079_v30, %v4078_v22  ;;  %v4099_v3 = vsel %vm4059_vm4, %v7829_v34, 0.0 }
 0x262   :  { %v7835_v29 = vpop.f32.mrf.mxu0 }
 0x263   :  { %v4082_v61 = vadd.f32 %v4081_v17, %v4080_v21  ;;  %v4105_v27 = vsel %vm4059_vm4, %v7835_v29, 0.0 }
 0x264   :  { %v7837_v38 = vpop.f32.mrf.mxu0 }
 0x265   :  { %v4084_v5 = vadd.f32 %v4083_v23, %v4082_v61  ;;  %v4103_v37 = vsel %vm4059_vm4, %v7837_v38, 0.0 }
 0x266   :  { %v7843_v58 = vpop.f32.mrf.mxu0 }
 0x267   :  { %v4086_v56 = vadd.f32 %v4085_v16, %v4084_v5  ;;  %v4109_v28 = vsel %vm4059_vm4, %v7843_v58, 0.0 }
 0x268   :  { %v7845_v31 = vpop.f32.mrf.mxu0 }
 0x269   :  { %v4088_v26 = vadd.f32 %v4087_v63, %v4086_v56  ;;  %v4107_v53 = vsel %vm4059_vm4, %v7845_v31, 0.0 }
 0x26a   :  { %v7851_v55 = vpop.f32.mrf.mxu0 }
 0x26b   :  { %v4090_v35 = vadd.f32 %v4089_v62, %v4088_v26  ;;  %v4113_v21 = vsel %vm4059_vm4, %v7851_v55, 0.0 }
 0x26c   :  { %v7853_v2 = vpop.f32.mrf.mxu0 }
 0x26d   :  { %v4092_v24 = vadd.f32 %v4091_v36, %v4090_v35  ;;  %v4111_v6 = vsel %vm4059_vm4, %v7853_v2, 0.0  ;;  %v7875_v36 = vpop.f32.mrf.mxu1 }
 0x26e   :  { %v7859_v1 = vpop.f32.mrf.mxu0 }
 0x26f   :  { %v4094_v43 = vadd.f32 %v4093_v8, %v4092_v24  ;;  %v4117_v63 = vsel %vm4059_vm4, %v7859_v1, 0.0  ;;  %v7879_v8 = vpop.f32.mrf.mxu1 }
 0x270   :  { %v7861_v22 = vpop.f32.mrf.mxu0 }
 0x271   :  { %v4096_v15 = vadd.f32 %v4095_v33, %v4094_v43  ;;  %v4115_v23 = vsel %vm4059_vm4, %v7861_v22, 0.0  ;;  %v4123_v43 = vsel %vm4059_vm4, %v7879_v8, 0.0 }
 0x272   :  { %v7867_v61 = vpop.f32.mrf.mxu0 }
 0x273   :  { %v4098_v39 = vadd.f32 %v4097_v19, %v4096_v15  ;;  %v4121_v35 = vsel %vm4059_vm4, %v7867_v61, 0.0  ;;  %v7883_v15 = vpop.f32.mrf.mxu1  ;;  %v4125_v19 = vsel %vm4059_vm4, %v7875_v36, 0.0 }
 0x274   :  { %v7869_v16 = vpop.f32.mrf.mxu0 }
 0x275   :  { %v4100_v11 = vadd.f32 %v4099_v3, %v4098_v39  ;;  %v4119_v26 = vsel %vm4059_vm4, %v7869_v16, 0.0  ;;  %v7887_v39 = vpop.f32.mrf.mxu1 }
 0x277   :  { %v4102_v12 = vadd.f32 %v4101_v51, %v4100_v11  ;;  %v4127_v11 = vsel %vm4059_vm4, %v7887_v39, 0.0 }
 0x279   :  { %v4104_v41 = vadd.f32 %v4103_v37, %v4102_v12  ;;  %v7891_v12 = vpop.f32.mrf.mxu1  ;;  %v4129_v37 = vsel %vm4059_vm4, %v7883_v15, 0.0 }
 0x27b   :  { %v4106_v60 = vadd.f32 %v4105_v27, %v4104_v41  ;;  %v7895_v41 = vpop.f32.mrf.mxu1 }
 0x27d   :  { %v4108_v4 = vadd.f32 %v4107_v53, %v4106_v60  ;;  %v4131_v60 = vsel %vm4059_vm4, %v7895_v41, 0.0 }
 0x27f   :  { %v4110_v14 = vadd.f32 %v4109_v28, %v4108_v4  ;;  %v7899_v4 = vpop.f32.mrf.mxu1  ;;  %v4133_v28 = vsel %vm4059_vm4, %v7891_v12, 0.0 }
 0x281   :  { %v4112_v30 = vadd.f32 %v4111_v6, %v4110_v14  ;;  %v7903_v14 = vpop.f32.mrf.mxu1 }
 0x283   :  { %v4114_v17 = vadd.f32 %v4113_v21, %v4112_v30  ;;  %v4135_v30 = vsel %vm4059_vm4, %v7903_v14, 0.0 }
 0x285   :  { %v4116_v5 = vadd.f32 %v4115_v23, %v4114_v17  ;;  %v7907_v17 = vpop.f32.mrf.mxu1  ;;  %v4137_v23 = vsel %vm4059_vm4, %v7899_v4, 0.0 }
 0x287   :  { %v4118_v56 = vadd.f32 %v4117_v63, %v4116_v5  ;;  %v7911_v5 = vpop.f32.mrf.mxu1 }
 0x289   :  { %v4120_v62 = vadd.f32 %v4119_v26, %v4118_v56  ;;  %v4139_v56 = vsel %vm4059_vm4, %v7911_v5, 0.0 }
 0x28b   :  { %v4122_v24 = vadd.f32 %v4121_v35, %v4120_v62  ;;  %v7915_v62 = vpop.f32.mrf.mxu1  ;;  %v4141_v35 = vsel %vm4059_vm4, %v7907_v17, 0.0 }
 0x28d   :  { %v4124_v33 = vadd.f32 %v4123_v43, %v4122_v24  ;;  %v7919_v24 = vpop.f32.mrf.mxu1 }
 0x28f   :  { %v4126_v3 = vadd.f32 %v4125_v19, %v4124_v33  ;;  %v4143_v33 = vsel %vm4059_vm4, %v7919_v24, 0.0 }
 0x291   :  { %v4128_v51 = vadd.f32 %v4127_v11, %v4126_v3  ;;  %v7923_v3 = vpop.f32.mrf.mxu1  ;;  %v4145_v11 = vsel %vm4059_vm4, %v7915_v62, 0.0 }
 0x292   :  { %8910 = vst [vmem:[#allocation7_spill] sm:$0xff] %v7923_v3 }
 0x293   :  { %v4130_v27 = vadd.f32 %v4129_v37, %v4128_v51  ;;  %v7927_v51 = vpop.f32.mrf.mxu1 }
 0x294   :  { %8911 = vst [vmem:[#allocation8_spill] sm:$0xff] %v7927_v51 }
 0x295   :  { %v4132_v53 = vadd.f32 %v4131_v60, %v4130_v27  ;;  %v4147_v27 = vsel %vm4059_vm4, %v7927_v51, 0.0 }
 0x297   :  { %v4134_v6 = vadd.f32 %v4133_v28, %v4132_v53  ;;  %v7931_v53 = vpop.f32.mrf.mxu1  ;;  %v4149_v28 = vsel %vm4059_vm4, %v7923_v3, 0.0 }
 0x298   :  { %8912 = vst [vmem:[#allocation9_spill] sm:$0xff] %v7931_v53 }
 0x299   :  { %v4136_v21 = vadd.f32 %v4135_v30, %v4134_v6  ;;  %v7935_v6 = vpop.f32.mrf.mxu1 }
 0x29a   :  { %8913 = vst [vmem:[#allocation10_spill] sm:$0xff] %v7935_v6 }
 0x29b   :  { %v4138_v63 = vadd.f32 %v4137_v23, %v4136_v21  ;;  %v4151_v21 = vsel %vm4059_vm4, %v7935_v6, 0.0 }
 0x29d   :  { %v4140_v26 = vadd.f32 %v4139_v56, %v4138_v63  ;;  %v7939_v63 = vpop.f32.mrf.mxu1  ;;  %v4153_v56 = vsel %vm4059_vm4, %v7931_v53, 0.0 }
 0x29e   :  { %8914 = vst [vmem:[#allocation11_spill] sm:$0xff] %v7939_v63 }
 0x29f   :  { %v4142_v43 = vadd.f32 %v4141_v35, %v4140_v26  ;;  %v7943_v26 = vpop.f32.mrf.mxu1 }
 0x2a0   :  { %8915 = vst [vmem:[#allocation12_spill] sm:$0xff] %v7943_v26 }
 0x2a1   :  { %v4144_v19 = vadd.f32 %v4143_v33, %v4142_v43  ;;  %v4155_v43 = vsel %vm4059_vm4, %v7943_v26, 0.0 }
 0x2a3   :  { %v4146_v37 = vadd.f32 %v4145_v11, %v4144_v19  ;;  %v4157_v11 = vsel %vm4059_vm4, %v7939_v63, 0.0 }
 0x2a5   :  { %v4148_v60 = vadd.f32 %v4147_v27, %v4146_v37 }
 0x2a7   :  { %v4150_v30 = vadd.f32 %v4149_v28, %v4148_v60 }
 0x2a9   :  { %v4152_v23 = vadd.f32 %v4151_v21, %v4150_v30 }
 0x2ab   :  { %v4154_v35 = vadd.f32 %v4153_v56, %v4152_v23 }
 0x2ad   :  { %v4156_v33 = vadd.f32 %v4155_v43, %v4154_v35 }
 0x2af   :  { %v4158_v27 = vadd.f32 %v4157_v11, %v4156_v33 }
 0x2b0   :  { %v7947_v19 = vpop.f32.mrf.mxu1 }
 0x2b1   :  { %8916 = vst [vmem:[#allocation13_spill] sm:$0xff] %v7947_v19  ;;  %v4161_v21 = vsel %vm4059_vm4, %v7947_v19, 0.0 }
 0x2b2   :  { %v7951_v37 = vpop.f32.mrf.mxu1 }
 0x2b3   :  { %8917 = vst [vmem:[#allocation14_spill] sm:$0xff] %v7951_v37  ;;  %v4159_v60 = vsel %vm4059_vm4, %v7951_v37, 0.0 }
 0x2b4   :  { %v4160_v28 = vadd.f32 %v4159_v60, %v4158_v27 }
 0x2b6   :  { %v4162_v56 = vadd.f32 %v4161_v21, %v4160_v28 }
 0x2c2   :  { %v7955_v30 = vpop.f32.mrf.mxu1 }
 0x2c3   :  { %8918 = vst [vmem:[#allocation15_spill] sm:$0xff] %v7955_v30  ;;  %v4165_v33 = vsel %vm4059_vm4, %v7955_v30, 0.0 }
 0x2c4   :  { %v7959_v23 = vpop.f32.mrf.mxu1 }
 0x2c5   :  { %8919 = vst [vmem:[#allocation16_spill] sm:$0xff] %v7959_v23  ;;  %v4163_v35 = vsel %vm4059_vm4, %v7959_v23, 0.0 }
 0x2c6   :  { %v4164_v43 = vadd.f32 %v4163_v35, %v4162_v56 }
 0x2c8   :  { %v4166_v27 = vadd.f32 %v4165_v33, %v4164_v43 }
 0x2d4   :  { %v7963_v13 = vpop.f32.mrf.mxu1 }
 0x2d5   :  { %8920 = vst [vmem:[#allocation17_spill] sm:$0xff] %v7963_v13  ;;  %v4169_v28 = vsel %vm4059_vm4, %v7963_v13, 0.0 }
 0x2d6   :  { %v7967_v11 = vpop.f32.mrf.mxu1 }
 0x2d7   :  { %8921 = vst [vmem:[#allocation18_spill] sm:$0xff] %v7967_v11  ;;  %v4167_v60 = vsel %vm4059_vm4, %v7967_v11, 0.0 }
 0x2d8   :  { %v4168_v37 = vadd.f32 %v4167_v60, %v4166_v27 }
 0x2da   :  { %v4170_v56 = vadd.f32 %v4169_v28, %v4168_v37 }
 0x2e6   :  { %v7971_v19 = vpop.f32.mrf.mxu1 }
 0x2e7   :  { %8922 = vst [vmem:[#allocation19_spill] sm:$0xff] %v7971_v19  ;;  %v4173_v43 = vsel %vm4059_vm4, %v7971_v19, 0.0 }
 0x2e8   :  { %v7975_v21 = vpop.f32.mrf.mxu1 }
 0x2e9   :  { %8923 = vst [vmem:[#allocation20_spill] sm:$0xff] %v7975_v21  ;;  %v4171_v35 = vsel %vm4059_vm4, %v7975_v21, 0.0 }
 0x2ea   :  { %v4172_v23 = vadd.f32 %v4171_v35, %v4170_v56 }
 0x2ec   :  { %v4174_v27 = vadd.f32 %v4173_v43, %v4172_v23 }
 0x2f9   :  { %v7979_v30 = vpop.f32.mrf.mxu1 }
 0x2fa   :  { %8924 = vst [vmem:[#allocation21_spill] sm:$0xff] %v7979_v30  ;;  %v4177_v37 = vsel %vm4059_vm4, %v7979_v30, 0.0 }
 0x2fb   :  { %v7983_v33 = vpop.f32.mrf.mxu1 }
 0x2fc   :  { %8925 = vst [vmem:[#allocation22_spill] sm:$0xff] %v7983_v33  ;;  %v4175_v60 = vsel %vm4059_vm4, %v7983_v33, 0.0 }
 0x2fd   :  { %v4176_v11 = vadd.f32 %v4175_v60, %v4174_v27 }
 0x2ff   :  { %v4178_v56 = vadd.f32 %v4177_v37, %v4176_v11 }
 0x30b   :  { %v7987_v13 = vpop.f32.mrf.mxu1 }
 0x30c   :  { %8926 = vst [vmem:[#allocation23_spill] sm:$0xff] %v7987_v13  ;;  %v4181_v23 = vsel %vm4059_vm4, %v7987_v13, 0.0 }
 0x30d   :  { %v7991_v28 = vpop.f32.mrf.mxu1 }
 0x30e   :  { %8927 = vst [vmem:[#allocation24_spill] sm:$0xff] %v7991_v28  ;;  %v4179_v35 = vsel %vm4059_vm4, %v7991_v28, 0.0 }
 0x30f   :  { %v4180_v21 = vadd.f32 %v4179_v35, %v4178_v56 }
 0x311   :  { %v4182_v27 = vadd.f32 %v4181_v23, %v4180_v21 }
 0x31d   :  { %v7995_v19 = vpop.f32.mrf.mxu1 }
 0x31e   :  { %8928 = vst [vmem:[#allocation25_spill] sm:$0xff] %v7995_v19  ;;  %v4185_v30 = vsel %vm4059_vm4, %v7995_v19, 0.0 }
 0x31f   :  { %v7999_v43 = vpop.f32.mrf.mxu1 }
 0x320   :  { %8929 = vst [vmem:[#allocation26_spill] sm:$0xff] %v7999_v43  ;;  %v4183_v60 = vsel %vm4059_vm4, %v7999_v43, 0.0 }
 0x321   :  { %v4184_v33 = vadd.f32 %v4183_v60, %v4182_v27 }
 0x323   :  { %v4186_v11 = vadd.f32 %v4185_v30, %v4184_v33 }
 0x325   :  { %v4187_v37 = vrot.slane %v4186_v11, 4 }
 0x327   :  { %v4188_v63 = vadd.f32 %v4187_v37, %v4186_v11 }
 0x329   :  { %v4189_v28 = vrot.slane %v4188_v63, 2 }
 0x32b   :  { %v4190_v56 = vadd.f32 %v4189_v28, %v4188_v63 }
 0x32d   :  { %v4191_v35 = vrot.slane %v4190_v56, 1 }
 0x32f   :  { %v4192_v26 = vadd.f32 %v4191_v35, %v4190_v56 }
 0x331   :  { %v8005_v53 = vmul.f32 0.001953125, %v4192_v26 }
 0x333   :  { %v4195_v13 = vsub.f32 %v7576_v46, %v8005_v53  ;;  %v4196_v21 = vsub.f32 %v7552_v57, %v8005_v53  ;;  %v4197_v23 = vsub.f32 %v7618_v59, %v8005_v53  ;;  %v4198_v30 = vsub.f32 %v7601_v20, %v8005_v53 }
 0x334   :  { %v4199_v63 = vsub.f32 %v7666_v10, %v8005_v53  ;;  %v4200_v26 = vsub.f32 %v7643_v40, %v8005_v53  ;;  %v4201_v35 = vsub.f32 %v7706_v47, %v8005_v53  ;;  %v4202_v10 = vsub.f32 %v7685_v44, %v8005_v53 }
 0x335   :  { %v4259_v33 = vmul.f32 %v4195_v13, %v4195_v13  ;;  %v4260_v27 = vmul.f32 %v4196_v21, %v4196_v21  ;;  %v4261_v28 = vmul.f32 %v4197_v23, %v4197_v23  ;;  %v4262_v60 = vmul.f32 %v4198_v30, %v4198_v30 }
 0x336   :  { %v4263_v59 = vmul.f32 %v4199_v63, %v4199_v63  ;;  %v4264_v23 = vmul.f32 %v4200_v26, %v4200_v26  ;;  %v4203_v30 = vsub.f32 %v7746_v9, %v8005_v53  ;;  %v4204_v63 = vsub.f32 %v7728_v7, %v8005_v53 }
 0x337   :  { %v4323_v11 = vsel %vm4059_vm4, %v4259_v33, 0.0  ;;  %v4324_v37 = vsel %vm4059_vm4, %v4260_v27, 0.0  ;;  %v4326_v13 = vsel %vm4059_vm4, %v4261_v28, 0.0  ;;  %v4328_v20 = vsel %vm4059_vm4, %v4262_v60, 0.0 }
 0x338   :  { %v4325_v56 = vadd.f32 %v4324_v37, %v4323_v11  ;;  %v4265_v33 = vmul.f32 %v4201_v35, %v4201_v35  ;;  %v4330_v27 = vsel %vm4059_vm4, %v4263_v59, 0.0  ;;  %v4266_v37 = vmul.f32 %v4202_v10, %v4202_v10 }
 0x339   :  { %v4332_v28 = vsel %vm4059_vm4, %v4264_v23, 0.0  ;;  %v4205_v26 = vsub.f32 %v7770_v49, %v8005_v53  ;;  %v4206_v35 = vsub.f32 %v7758_v25, %v8005_v53  ;;  %v4207_v10 = vsub.f32 %v7788_v0, %v8005_v53 }
 0x33a   :  { %v4327_v21 = vadd.f32 %v4326_v13, %v4325_v56  ;;  %v4267_v13 = vmul.f32 %v4203_v30, %v4203_v30  ;;  %v4336_v59 = vsel %vm4059_vm4, %v4266_v37, 0.0  ;;  %v4208_v30 = vsub.f32 %v7780_v18, %v8005_v53 }
 0x33c   :  { %v4329_v40 = vadd.f32 %v4328_v20, %v4327_v21  ;;  %v4334_v20 = vsel %vm4059_vm4, %v4265_v33, 0.0  ;;  %v4268_v21 = vmul.f32 %v4204_v63, %v4204_v63  ;;  %v4338_v23 = vsel %vm4059_vm4, %v4267_v13, 0.0 }
 0x33d   :  { %v4209_v63 = vsub.f32 %v7801_v32, %v8005_v53 }
 0x33e   :  { %v4331_v11 = vadd.f32 %v4330_v27, %v4329_v40  ;;  %v4269_v27 = vmul.f32 %v4205_v26, %v4205_v26  ;;  %v4340_v33 = vsel %vm4059_vm4, %v4268_v21, 0.0  ;;  %v4210_v26 = vsub.f32 %v7795_v42, %v8005_v53 }
 0x340   :  { %v4333_v56 = vadd.f32 %v4332_v28, %v4331_v11  ;;  %v4270_v28 = vmul.f32 %v4206_v35, %v4206_v35  ;;  %v4342_v37 = vsel %vm4059_vm4, %v4269_v27, 0.0  ;;  %v4211_v35 = vsub.f32 %v7813_v50, %v8005_v53 }
 0x342   :  { %v4335_v60 = vadd.f32 %v4334_v20, %v4333_v56  ;;  %v4271_v20 = vmul.f32 %v4207_v10, %v4207_v10  ;;  %v4344_v13 = vsel %vm4059_vm4, %v4270_v28, 0.0  ;;  %v4212_v10 = vsub.f32 %v7807_v54, %v8005_v53 }
 0x344   :  { %v4337_v40 = vadd.f32 %v4336_v59, %v4335_v60  ;;  %v4272_v59 = vmul.f32 %v4208_v30, %v4208_v30  ;;  %v4346_v21 = vsel %vm4059_vm4, %v4271_v20, 0.0  ;;  %v4213_v30 = vsub.f32 %v7821_v45, %v8005_v53 }
 0x346   :  { %v4339_v11 = vadd.f32 %v4338_v23, %v4337_v40  ;;  %v4273_v23 = vmul.f32 %v4209_v63, %v4209_v63  ;;  %v4348_v27 = vsel %vm4059_vm4, %v4272_v59, 0.0  ;;  %v4214_v63 = vsub.f32 %v7819_v52, %v8005_v53 }
 0x348   :  { %v4341_v56 = vadd.f32 %v4340_v33, %v4339_v11  ;;  %v4274_v33 = vmul.f32 %v4210_v26, %v4210_v26  ;;  %v4350_v28 = vsel %vm4059_vm4, %v4273_v23, 0.0  ;;  %v4215_v26 = vsub.f32 %v7829_v34, %v8005_v53 }
 0x34a   :  { %v4343_v60 = vadd.f32 %v4342_v37, %v4341_v56  ;;  %v4275_v37 = vmul.f32 %v4211_v35, %v4211_v35  ;;  %v4352_v20 = vsel %vm4059_vm4, %v4274_v33, 0.0  ;;  %v4216_v35 = vsub.f32 %v7827_v48, %v8005_v53 }
 0x34c   :  { %v4345_v40 = vadd.f32 %v4344_v13, %v4343_v60  ;;  %v4276_v13 = vmul.f32 %v4212_v10, %v4212_v10  ;;  %v4354_v59 = vsel %vm4059_vm4, %v4275_v37, 0.0  ;;  %v4217_v10 = vsub.f32 %v7837_v38, %v8005_v53 }
 0x34e   :  { %v4347_v11 = vadd.f32 %v4346_v21, %v4345_v40  ;;  %v4277_v21 = vmul.f32 %v4213_v30, %v4213_v30  ;;  %v4356_v23 = vsel %vm4059_vm4, %v4276_v13, 0.0  ;;  %v4218_v30 = vsub.f32 %v7835_v29, %v8005_v53 }
 0x350   :  { %v4349_v56 = vadd.f32 %v4348_v27, %v4347_v11  ;;  %v4278_v27 = vmul.f32 %v4214_v63, %v4214_v63  ;;  %v4358_v33 = vsel %vm4059_vm4, %v4277_v21, 0.0  ;;  %v4219_v63 = vsub.f32 %v7845_v31, %v8005_v53 }
 0x352   :  { %v4351_v60 = vadd.f32 %v4350_v28, %v4349_v56  ;;  %v4279_v28 = vmul.f32 %v4215_v26, %v4215_v26  ;;  %v4360_v37 = vsel %vm4059_vm4, %v4278_v27, 0.0  ;;  %v4220_v26 = vsub.f32 %v7843_v58, %v8005_v53 }
 0x354   :  { %v4353_v40 = vadd.f32 %v4352_v20, %v4351_v60  ;;  %v4280_v20 = vmul.f32 %v4216_v35, %v4216_v35  ;;  %v4362_v13 = vsel %vm4059_vm4, %v4279_v28, 0.0  ;;  %v4221_v35 = vsub.f32 %v7853_v2, %v8005_v53 }
 0x356   :  { %v4355_v11 = vadd.f32 %v4354_v59, %v4353_v40  ;;  %v4281_v59 = vmul.f32 %v4217_v10, %v4217_v10  ;;  %v4364_v21 = vsel %vm4059_vm4, %v4280_v20, 0.0  ;;  %v4222_v10 = vsub.f32 %v7851_v55, %v8005_v53 }
 0x358   :  { %v4357_v56 = vadd.f32 %v4356_v23, %v4355_v11  ;;  %v4282_v23 = vmul.f32 %v4218_v30, %v4218_v30  ;;  %v4366_v27 = vsel %vm4059_vm4, %v4281_v59, 0.0  ;;  %v4223_v30 = vsub.f32 %v7861_v22, %v8005_v53 }
 0x35a   :  { %v4359_v60 = vadd.f32 %v4358_v33, %v4357_v56  ;;  %v4283_v33 = vmul.f32 %v4219_v63, %v4219_v63  ;;  %v4368_v28 = vsel %vm4059_vm4, %v4282_v23, 0.0  ;;  %v4224_v63 = vsub.f32 %v7859_v1, %v8005_v53 }
 0x35c   :  { %v4361_v40 = vadd.f32 %v4360_v37, %v4359_v60  ;;  %v4284_v37 = vmul.f32 %v4220_v26, %v4220_v26  ;;  %v4370_v20 = vsel %vm4059_vm4, %v4283_v33, 0.0  ;;  %v4225_v26 = vsub.f32 %v7869_v16, %v8005_v53 }
 0x35e   :  { %v4363_v11 = vadd.f32 %v4362_v13, %v4361_v40  ;;  %v4285_v13 = vmul.f32 %v4221_v35, %v4221_v35  ;;  %v4372_v59 = vsel %vm4059_vm4, %v4284_v37, 0.0  ;;  %v4226_v35 = vsub.f32 %v7867_v61, %v8005_v53 }
 0x360   :  { %v4365_v56 = vadd.f32 %v4364_v21, %v4363_v11  ;;  %v4286_v21 = vmul.f32 %v4222_v10, %v4222_v10  ;;  %v4374_v23 = vsel %vm4059_vm4, %v4285_v13, 0.0  ;;  %v4227_v10 = vsub.f32 %v7879_v8, %v8005_v53 }
 0x362   :  { %v4367_v60 = vadd.f32 %v4366_v27, %v4365_v56  ;;  %v4287_v27 = vmul.f32 %v4223_v30, %v4223_v30  ;;  %v4376_v33 = vsel %vm4059_vm4, %v4286_v21, 0.0  ;;  %v4228_v30 = vsub.f32 %v7875_v36, %v8005_v53 }
 0x364   :  { %v4369_v40 = vadd.f32 %v4368_v28, %v4367_v60  ;;  %v4288_v28 = vmul.f32 %v4224_v63, %v4224_v63  ;;  %v4378_v37 = vsel %vm4059_vm4, %v4287_v27, 0.0  ;;  %v4229_v63 = vsub.f32 %v7887_v39, %v8005_v53 }
 0x366   :  { %v4371_v11 = vadd.f32 %v4370_v20, %v4369_v40  ;;  %v4289_v20 = vmul.f32 %v4225_v26, %v4225_v26  ;;  %v4380_v13 = vsel %vm4059_vm4, %v4288_v28, 0.0  ;;  %v4230_v26 = vsub.f32 %v7883_v15, %v8005_v53 }
 0x368   :  { %v4373_v56 = vadd.f32 %v4372_v59, %v4371_v11  ;;  %v4290_v59 = vmul.f32 %v4226_v35, %v4226_v35  ;;  %v4382_v21 = vsel %vm4059_vm4, %v4289_v20, 0.0  ;;  %v4231_v35 = vsub.f32 %v7895_v41, %v8005_v53 }
 0x36a   :  { %v4375_v60 = vadd.f32 %v4374_v23, %v4373_v56  ;;  %v4291_v23 = vmul.f32 %v4227_v10, %v4227_v10  ;;  %v4384_v27 = vsel %vm4059_vm4, %v4290_v59, 0.0  ;;  %v4232_v10 = vsub.f32 %v7891_v12, %v8005_v53 }
 0x36c   :  { %v4377_v40 = vadd.f32 %v4376_v33, %v4375_v60  ;;  %v4292_v33 = vmul.f32 %v4228_v30, %v4228_v30  ;;  %v4386_v28 = vsel %vm4059_vm4, %v4291_v23, 0.0  ;;  %v4233_v30 = vsub.f32 %v7903_v14, %v8005_v53 }
 0x36e   :  { %v4379_v11 = vadd.f32 %v4378_v37, %v4377_v40  ;;  %v4293_v37 = vmul.f32 %v4229_v63, %v4229_v63  ;;  %v4388_v20 = vsel %vm4059_vm4, %v4292_v33, 0.0  ;;  %v4234_v63 = vsub.f32 %v7899_v4, %v8005_v53 }
 0x370   :  { %v4381_v56 = vadd.f32 %v4380_v13, %v4379_v11  ;;  %v4294_v13 = vmul.f32 %v4230_v26, %v4230_v26  ;;  %v4390_v59 = vsel %vm4059_vm4, %v4293_v37, 0.0  ;;  %v4235_v26 = vsub.f32 %v7911_v5, %v8005_v53 }
 0x372   :  { %v4383_v60 = vadd.f32 %v4382_v21, %v4381_v56  ;;  %v4295_v21 = vmul.f32 %v4231_v35, %v4231_v35  ;;  %v4392_v23 = vsel %vm4059_vm4, %v4294_v13, 0.0  ;;  %v4236_v35 = vsub.f32 %v7907_v17, %v8005_v53 }
 0x374   :  { %v4385_v40 = vadd.f32 %v4384_v27, %v4383_v60  ;;  %v4296_v27 = vmul.f32 %v4232_v10, %v4232_v10  ;;  %v4394_v33 = vsel %vm4059_vm4, %v4295_v21, 0.0  ;;  %v4237_v10 = vsub.f32 %v7919_v24, %v8005_v53 }
 0x376   :  { %v4387_v11 = vadd.f32 %v4386_v28, %v4385_v40  ;;  %v4297_v28 = vmul.f32 %v4233_v30, %v4233_v30  ;;  %v4396_v37 = vsel %vm4059_vm4, %v4296_v27, 0.0  ;;  %v4238_v30 = vsub.f32 %v7915_v62, %v8005_v53 }
 0x378   :  { %v4389_v56 = vadd.f32 %v4388_v20, %v4387_v11  ;;  %v4298_v20 = vmul.f32 %v4234_v63, %v4234_v63  ;;  %v4398_v13 = vsel %vm4059_vm4, %v4297_v28, 0.0  ;;  %v4239_v63 = vsub.f32 %v7927_v51, %v8005_v53 }
 0x37a   :  { %v4391_v60 = vadd.f32 %v4390_v59, %v4389_v56  ;;  %v4299_v59 = vmul.f32 %v4235_v26, %v4235_v26  ;;  %v4400_v21 = vsel %vm4059_vm4, %v4298_v20, 0.0  ;;  %v4240_v26 = vsub.f32 %v7923_v3, %v8005_v53 }
 0x37c   :  { %v4393_v40 = vadd.f32 %v4392_v23, %v4391_v60  ;;  %v4300_v23 = vmul.f32 %v4236_v35, %v4236_v35  ;;  %v4402_v27 = vsel %vm4059_vm4, %v4299_v59, 0.0  ;;  %v4241_v35 = vsub.f32 %v7935_v6, %v8005_v53 }
 0x37d   :  { %v4304_v51 = vmul.f32 %v4240_v26, %v4240_v26 }
 0x37e   :  { %v4395_v11 = vadd.f32 %v4394_v33, %v4393_v40  ;;  %v4301_v33 = vmul.f32 %v4237_v10, %v4237_v10  ;;  %v4404_v28 = vsel %vm4059_vm4, %v4300_v23, 0.0  ;;  %v4305_v3 = vmul.f32 %v4241_v35, %v4241_v35 }
 0x380   :  { %v4397_v56 = vadd.f32 %v4396_v37, %v4395_v11  ;;  %v4302_v37 = vmul.f32 %v4238_v30, %v4238_v30  ;;  %v4406_v20 = vsel %vm4059_vm4, %v4301_v33, 0.0  ;;  %v4412_v33 = vsel %vm4059_vm4, %v4304_v51, 0.0 }
 0x382   :  { %v4399_v60 = vadd.f32 %v4398_v13, %v4397_v56  ;;  %v4303_v13 = vmul.f32 %v4239_v63, %v4239_v63  ;;  %v4408_v59 = vsel %vm4059_vm4, %v4302_v37, 0.0  ;;  %v4414_v37 = vsel %vm4059_vm4, %v4305_v3, 0.0 }
 0x384   :  { %v4401_v40 = vadd.f32 %v4400_v21, %v4399_v60  ;;  %v8930_v21 = vld [vmem:[#allocation9_spill] sm:$0xff]  ;;  %v4410_v23 = vsel %vm4059_vm4, %v4303_v13, 0.0 }
 0x385   :  { %v4242_v10 = vsub.f32 %v8930_v21, %v8005_v53 }
 0x386   :  { %v4403_v11 = vadd.f32 %v4402_v27, %v4401_v40  ;;  %v8931_v27 = vld [vmem:[#allocation12_spill] sm:$0xff] }
 0x387   :  { %v4243_v30 = vsub.f32 %v8931_v27, %v8005_v53  ;;  %v4306_v6 = vmul.f32 %v4242_v10, %v4242_v10 }
 0x388   :  { %v4405_v56 = vadd.f32 %v4404_v28, %v4403_v11  ;;  %v8932_v28 = vld [vmem:[#allocation11_spill] sm:$0xff] }
 0x389   :  { %v4244_v63 = vsub.f32 %v8932_v28, %v8005_v53  ;;  %v4307_v21 = vmul.f32 %v4243_v30, %v4243_v30  ;;  %v4416_v13 = vsel %vm4059_vm4, %v4306_v6, 0.0 }
 0x38a   :  { %v4407_v60 = vadd.f32 %v4406_v20, %v4405_v56  ;;  %v8933_v20 = vld [vmem:[#allocation14_spill] sm:$0xff] }
 0x38b   :  { %v4245_v26 = vsub.f32 %v8933_v20, %v8005_v53  ;;  %v4308_v27 = vmul.f32 %v4244_v63, %v4244_v63  ;;  %v4418_v51 = vsel %vm4059_vm4, %v4307_v21, 0.0 }
 0x38c   :  { %v4409_v40 = vadd.f32 %v4408_v59, %v4407_v60  ;;  %v8934_v59 = vld [vmem:[#allocation13_spill] sm:$0xff] }
 0x38d   :  { %v4246_v35 = vsub.f32 %v8934_v59, %v8005_v53  ;;  %v4309_v28 = vmul.f32 %v4245_v26, %v4245_v26  ;;  %v4420_v3 = vsel %vm4059_vm4, %v4308_v27, 0.0 }
 0x38e   :  { %v4411_v11 = vadd.f32 %v4410_v23, %v4409_v40  ;;  %v8935_v23 = vld [vmem:[#allocation16_spill] sm:$0xff] }
 0x38f   :  { %v4247_v10 = vsub.f32 %v8935_v23, %v8005_v53  ;;  %v4310_v20 = vmul.f32 %v4246_v35, %v4246_v35  ;;  %v4422_v6 = vsel %vm4059_vm4, %v4309_v28, 0.0 }
 0x390   :  { %v4413_v56 = vadd.f32 %v4412_v33, %v4411_v11  ;;  %v8936_v33 = vld [vmem:[#allocation15_spill] sm:$0xff] }
 0x391   :  { %v4248_v30 = vsub.f32 %v8936_v33, %v8005_v53  ;;  %v4311_v59 = vmul.f32 %v4247_v10, %v4247_v10  ;;  %v4424_v21 = vsel %vm4059_vm4, %v4310_v20, 0.0 }
 0x392   :  { %v4415_v60 = vadd.f32 %v4414_v37, %v4413_v56  ;;  %v8937_v37 = vld [vmem:[#allocation18_spill] sm:$0xff] }
 0x393   :  { %v4249_v63 = vsub.f32 %v8937_v37, %v8005_v53  ;;  %v4312_v23 = vmul.f32 %v4248_v30, %v4248_v30  ;;  %v4426_v27 = vsel %vm4059_vm4, %v4311_v59, 0.0 }
 0x394   :  { %v4417_v40 = vadd.f32 %v4416_v13, %v4415_v60  ;;  %v8938_v13 = vld [vmem:[#allocation17_spill] sm:$0xff] }
 0x395   :  { %v4250_v26 = vsub.f32 %v8938_v13, %v8005_v53  ;;  %v4313_v33 = vmul.f32 %v4249_v63, %v4249_v63  ;;  %v4428_v28 = vsel %vm4059_vm4, %v4312_v23, 0.0 }
 0x396   :  { %v4419_v11 = vadd.f32 %v4418_v51, %v4417_v40  ;;  %v8939_v51 = vld [vmem:[#allocation20_spill] sm:$0xff] }
 0x397   :  { %v4251_v35 = vsub.f32 %v8939_v51, %v8005_v53  ;;  %v4314_v37 = vmul.f32 %v4250_v26, %v4250_v26  ;;  %v4430_v20 = vsel %vm4059_vm4, %v4313_v33, 0.0 }
 0x398   :  { %v4421_v56 = vadd.f32 %v4420_v3, %v4419_v11  ;;  %v8940_v3 = vld [vmem:[#allocation19_spill] sm:$0xff] }
 0x399   :  { %v4252_v10 = vsub.f32 %v8940_v3, %v8005_v53  ;;  %v4315_v13 = vmul.f32 %v4251_v35, %v4251_v35  ;;  %v4432_v59 = vsel %vm4059_vm4, %v4314_v37, 0.0 }
 0x39a   :  { %v4423_v60 = vadd.f32 %v4422_v6, %v4421_v56  ;;  %v8941_v6 = vld [vmem:[#allocation22_spill] sm:$0xff] }
 0x39b   :  { %v4253_v30 = vsub.f32 %v8941_v6, %v8005_v53  ;;  %v4316_v51 = vmul.f32 %v4252_v10, %v4252_v10  ;;  %v4434_v23 = vsel %vm4059_vm4, %v4315_v13, 0.0  ;;  %v4257_v10 = vsub.f32 %v7999_v43, %v8005_v53 }
 0x39c   :  { %v4425_v40 = vadd.f32 %v4424_v21, %v4423_v60  ;;  %v8942_v21 = vld [vmem:[#allocation21_spill] sm:$0xff] }
 0x39d   :  { %v4254_v63 = vsub.f32 %v8942_v21, %v8005_v53  ;;  %v4317_v3 = vmul.f32 %v4253_v30, %v4253_v30  ;;  %v4436_v33 = vsel %vm4059_vm4, %v4316_v51, 0.0  ;;  %v4258_v30 = vsub.f32 %v7995_v19, %v8005_v53 }
 0x39e   :  { %v4427_v11 = vadd.f32 %v4426_v27, %v4425_v40  ;;  %v8943_v27 = vld [vmem:[#allocation24_spill] sm:$0xff] }
 0x39f   :  { %v4255_v26 = vsub.f32 %v8943_v27, %v8005_v53  ;;  %v4318_v6 = vmul.f32 %v4254_v63, %v4254_v63  ;;  %v4438_v37 = vsel %vm4059_vm4, %v4317_v3, 0.0  ;;  %v4322_v51 = vmul.f32 %v4258_v30, %v4258_v30 }
 0x3a0   :  { %v4429_v56 = vadd.f32 %v4428_v28, %v4427_v11  ;;  %v8944_v28 = vld [vmem:[#allocation23_spill] sm:$0xff] }
 0x3a1   :  { %v4256_v35 = vsub.f32 %v8944_v28, %v8005_v53  ;;  %v4440_v13 = vsel %vm4059_vm4, %v4318_v6, 0.0  ;;  %v4448_v3 = vsel %vm4059_vm4, %v4322_v51, 0.0  ;;  %v8946_v51 = vld [vmem:[#allocation4_spill] sm:$0xff] }
 0x3a2   :  { %v4431_v60 = vadd.f32 %v4430_v20, %v4429_v56  ;;  %v4319_v20 = vmul.f32 %v4255_v26, %v4255_v26 }
 0x3a4   :  { %v4433_v40 = vadd.f32 %v4432_v59, %v4431_v60  ;;  %v4320_v59 = vmul.f32 %v4256_v35, %v4256_v35  ;;  %v4442_v63 = vsel %vm4059_vm4, %v4319_v20, 0.0  ;;  %v4457_v20 = vld [vmem:[%s8861_s3] sm:$0x1] }
 0x3a6   :  { %v4435_v11 = vadd.f32 %v4434_v23, %v4433_v40  ;;  %v4321_v23 = vmul.f32 %v4257_v10, %v4257_v10 }
 0x3a8   :  { %v4437_v56 = vadd.f32 %v4436_v33, %v4435_v11  ;;  %v4444_v11 = vsel %vm4059_vm4, %v4320_v59, 0.0  ;;  %v4446_v26 = vsel %vm4059_vm4, %v4321_v23, 0.0  ;;  %v8205_v59 = vld [vmem:[%s8862_s4] sm:$0x1] }
 0x3aa   :  { %v4439_v60 = vadd.f32 %v4438_v37, %v4437_v56 }
 0x3ac   :  { %v4441_v40 = vadd.f32 %v4440_v13, %v4439_v60 }
 0x3ae   :  { %v4443_v28 = vadd.f32 %v4442_v63, %v4441_v40 }
 0x3b0   :  { %v4445_v33 = vadd.f32 %v4444_v11, %v4443_v28 }
 0x3b2   :  { %v4447_v43 = vadd.f32 %v4446_v26, %v4445_v33  ;;  %v8948_v26 = vld [vmem:[#allocation6_spill] sm:$0xff] }
 0x3b4   :  { %v4449_v56 = vadd.f32 %v4448_v3, %v4447_v43 }
 0x3b6   :  { %v4450_v37 = vrot.slane %v4449_v56, 4 }
 0x3b8   :  { %v4451_v19 = vadd.f32 %v4450_v37, %v4449_v56  ;;  %v8949_v56 = vld [vmem:[#allocation5_spill] sm:$0xff] }
 0x3ba   :  { %v4452_v35 = vrot.slane %v4451_v19, 2 }
 0x3bc   :  { %v4453_v27 = vadd.f32 %v4452_v35, %v4451_v19  ;;  %v8945_v19 = vld [vmem:[#allocation2_spill] sm:$0xff] }
 0x3be   :  { %v4454_v6 = vrot.slane %v4453_v27, 1 }
 0x3c0   :  { %v4455_v60 = vadd.f32 %v4454_v6, %v4453_v27 }
 0x3c2   :  { %v4456_v10 = vmul.f32 0.001953125, %v4455_v60 }
 0x3c4   :  { %v4458_v13 = vadd.f32 0.001, %v4456_v10  ;;  %v8950_v10 = vld [vmem:[#allocation8_spill] sm:$0xff] }
 0x3c6   :  { %4903 = vrsqrt.f32 %v4458_v13  ;;  %v8951_v13 = vld [vmem:[#allocation7_spill] sm:$0xff] }
 0x3d3   :  { %v4904_v28 = vpop.eup %4903 }
 0x3d4   :  { %v4460_v30 = vmul.f32 %v4904_v28, %v4457_v20  ;;  %v8952_v20 = vld [vmem:[#allocation10_spill] sm:$0xff]  ;;  %v8953_v28 = vld [vmem:[#allocation9_spill] sm:$0xff] }
 0x3d6   :  { %v8208_v43 = vmul.f32 %v4460_v30, %v8005_v53  ;;  %v8211_v40 = vrot.slane %v4460_v30, %v8945_v19  ;;  %v8947_v53 = vld [vmem:[#allocation3_spill] sm:$0xff]  ;;  %v8954_v30 = vld [vmem:[#allocation12_spill] sm:$0xff] }
 0x3d8   :  { %v4463_v27 = vsub.f32 %v8205_v59, %v8208_v43  ;;  %v8217_v23 = vmul.f32 %v8211_v40, %v7576_v46  ;;  %v8221_v63 = vmul.f32 %v7552_v57, %v8211_v40  ;;  %v8225_v11 = vmul.f32 %v8211_v40, %v8946_v51  ;;  %v8955_v59 = vld [vmem:[#allocation11_spill] sm:$0xff]  ;;  %v8957_v51 = vld [vmem:[#allocation14_spill] sm:$0xff] }
 0x3d9   :  { %v8229_v33 = vmul.f32 %v8947_v53, %v8211_v40  ;;  %v8233_v3 = vmul.f32 %v8211_v40, %v8948_v26  ;;  %v8237_v46 = vmul.f32 %v8949_v56, %v8211_v40  ;;  %v8241_v57 = vmul.f32 %v8211_v40, %v7706_v47  ;;  %v8959_v26 = vld [vmem:[#allocation13_spill] sm:$0xff] }
 0x3da   :  { %v8245_v37 = vmul.f32 %v7685_v44, %v8211_v40  ;;  %v8249_v35 = vmul.f32 %v8211_v40, %v7746_v9  ;;  %v8253_v6 = vmul.f32 %v7728_v7, %v8211_v40  ;;  %v8257_v60 = vmul.f32 %v8211_v40, %v7770_v49 }
 0x3db   :  { %v8261_v47 = vmul.f32 %v7758_v25, %v8211_v40  ;;  %v8265_v44 = vmul.f32 %v8211_v40, %v7788_v0  ;;  %v8269_v9 = vmul.f32 %v7780_v18, %v8211_v40  ;;  %v8273_v7 = vmul.f32 %v8211_v40, %v7801_v32 }
 0x3dc   :  { %v8277_v49 = vmul.f32 %v7795_v42, %v8211_v40  ;;  %v8281_v25 = vmul.f32 %v8211_v40, %v7813_v50  ;;  %v8285_v0 = vmul.f32 %v7807_v54, %v8211_v40  ;;  %v8289_v18 = vmul.f32 %v8211_v40, %v7821_v45 }
 0x3dd   :  { %v8293_v32 = vmul.f32 %v7819_v52, %v8211_v40  ;;  %v8297_v42 = vmul.f32 %v8211_v40, %v7829_v34  ;;  %v8301_v50 = vmul.f32 %v7827_v48, %v8211_v40  ;;  %v8305_v54 = vmul.f32 %v8211_v40, %v7837_v38 }
 0x3de   :  { %v8309_v45 = vmul.f32 %v7835_v29, %v8211_v40  ;;  %v8313_v52 = vmul.f32 %v8211_v40, %v7845_v31  ;;  %v8317_v34 = vmul.f32 %v7843_v58, %v8211_v40  ;;  %v8321_v48 = vmul.f32 %v8211_v40, %v7853_v2 }
 0x3df   :  { %v8325_v38 = vmul.f32 %v7851_v55, %v8211_v40  ;;  %v8329_v29 = vmul.f32 %v8211_v40, %v7861_v22  ;;  %v8333_v31 = vmul.f32 %v7859_v1, %v8211_v40  ;;  %v8337_v58 = vmul.f32 %v8211_v40, %v7869_v16 }
 0x3e0   :  { %v8341_v2 = vmul.f32 %v7867_v61, %v8211_v40  ;;  %v8345_v55 = vmul.f32 %v8211_v40, %v7879_v8  ;;  %v8349_v22 = vmul.f32 %v7875_v36, %v8211_v40  ;;  %v8353_v1 = vmul.f32 %v8211_v40, %v7887_v39 }
 0x3e1   :  { %v8357_v16 = vmul.f32 %v7883_v15, %v8211_v40  ;;  %v8361_v61 = vmul.f32 %v8211_v40, %v7895_v41  ;;  %v8365_v8 = vmul.f32 %v7891_v12, %v8211_v40  ;;  %v8369_v36 = vmul.f32 %v8211_v40, %v7903_v14 }
 0x3e2   :  { %v8373_v39 = vmul.f32 %v7899_v4, %v8211_v40  ;;  %v8377_v15 = vmul.f32 %v8211_v40, %v7911_v5  ;;  %v8381_v41 = vmul.f32 %v7907_v17, %v8211_v40  ;;  %v8385_v12 = vmul.f32 %v8211_v40, %v7919_v24 }
 0x3e3   :  { %v8389_v14 = vmul.f32 %v7915_v62, %v8211_v40  ;;  %v8393_v4 = vmul.f32 %v8211_v40, %v8950_v10  ;;  %v8397_v5 = vmul.f32 %v8951_v13, %v8211_v40  ;;  %v8401_v17 = vmul.f32 %v8211_v40, %v8952_v20  ;;  %v8961_v10 = vld [vmem:[#allocation16_spill] sm:$0xff]  ;;  %v8963_v20 = vld [vmem:[#allocation15_spill] sm:$0xff] }
 0x3e4   :  { %v8405_v24 = vmul.f32 %v8953_v28, %v8211_v40  ;;  %v8409_v62 = vmul.f32 %v8211_v40, %v8954_v30  ;;  %v8413_v43 = vmul.f32 %v8955_v59, %v8211_v40  ;;  %v8417_v53 = vmul.f32 %v8211_v40, %v8957_v51  ;;  %v8964_v30 = vld [vmem:[#allocation18_spill] sm:$0xff] }
 0x3e5   :  { %v8421_v56 = vmul.f32 %v8959_v26, %v8211_v40  ;;  %v8425_v13 = vmul.f32 %v8211_v40, %v8961_v10  ;;  %v8429_v28 = vmul.f32 %v8963_v20, %v8211_v40  ;;  %v8433_v59 = vmul.f32 %v8211_v40, %v8964_v30 }
 0x3e6   :  { %8956 = vst [vmem:[#allocation21_spill] sm:$0xff] %v8413_v43  ;;  %8958 = vst [vmem:[#allocation2_spill] sm:$0xff] %v8417_v53  ;;  %v8966_v43 = vld [vmem:[#allocation17_spill] sm:$0xff]  ;;  %v8968_v53 = vld [vmem:[#allocation20_spill] sm:$0xff]  ;;  %v8453_v30 = vmul.f32 %v8942_v21, %v8211_v40 }
 0x3e7   :  { %8960 = vst [vmem:[#allocation4_spill] sm:$0xff] %v8421_v56  ;;  %8962 = vst [vmem:[#allocation3_spill] sm:$0xff] %v8425_v13  ;;  %v8437_v51 = vmul.f32 %v8966_v43, %v8211_v40  ;;  %v8441_v26 = vmul.f32 %v8211_v40, %v8968_v53  ;;  %v8970_v56 = vld [vmem:[#allocation19_spill] sm:$0xff]  ;;  %v8972_v13 = vld [vmem:[#allocation22_spill] sm:$0xff] }
 0x3e8   :  { %8965 = vst [vmem:[#allocation6_spill] sm:$0xff] %v8433_v59  ;;  %v8445_v10 = vmul.f32 %v8970_v56, %v8211_v40  ;;  %v8449_v20 = vmul.f32 %v8211_v40, %v8972_v13  ;;  %v8456_v59 = vrot.slane %v4463_v27, %v8945_v19  ;;  %v8974_v43 = vld [vmem:[#allocation24_spill] sm:$0xff]  ;;  %v8975_v53 = vld [vmem:[#allocation23_spill] sm:$0xff]  ;;  %v8976_v56 = vld [vmem:[#allocation26_spill] sm:$0xff] }
 0x3e9   :  { %8967 = vst [vmem:[#allocation5_spill] sm:$0xff] %v8437_v51  ;;  %8969 = vst [vmem:[#allocation8_spill] sm:$0xff] %v8441_v26  ;;  %v8460_v51 = vmul.f32 %v8211_v40, %v8974_v43  ;;  %v8464_v26 = vmul.f32 %v8975_v53, %v8211_v40  ;;  %v8977_v13 = vld [vmem:[#allocation25_spill] sm:$0xff] }
 0x3ea   :  { %8971 = vst [vmem:[#allocation7_spill] sm:$0xff] %v8445_v10  ;;  %8973 = vst [vmem:[#allocation10_spill] sm:$0xff] %v8449_v20  ;;  %v8468_v10 = vmul.f32 %v8211_v40, %v8976_v56  ;;  %v8472_v20 = vmul.f32 %v8977_v13, %v8211_v40  ;;  %v4540_v21 = vadd.f32 %v8456_v59, %v8217_v23 }
 0x3eb   :  { %v4541_v19 = vadd.f32 %v8456_v59, %v8221_v63  ;;  %v4542_v27 = vadd.f32 %v8456_v59, %v8225_v11  ;;  %v4543_v43 = vadd.f32 %v8456_v59, %v8229_v33  ;;  %v4544_v53 = vadd.f32 %v8456_v59, %v8233_v3 }
 0x3ec   :  { %v4545_v56 = vadd.f32 %v8456_v59, %v8237_v46  ;;  %v4546_v40 = vadd.f32 %v8456_v59, %v8241_v57  ;;  %v4547_v23 = vadd.f32 %v8456_v59, %v8245_v37  ;;  %v4548_v63 = vadd.f32 %v8456_v59, %v8249_v35  ;;  %4604 = vst.msk [vmem:[%s8863_s5] sm:$0xff] %vm4059_vm4, %v4540_v21 }
 0x3ed   :  { %v4549_v11 = vadd.f32 %v8456_v59, %v8253_v6  ;;  %v4550_v33 = vadd.f32 %v8456_v59, %v8257_v60  ;;  %v4551_v3 = vadd.f32 %v8456_v59, %v8261_v47  ;;  %4605 = vst.msk [vmem:[%s8863_s5 + $0x8] sm:$0xff] %vm4059_vm4, %v4541_v19  ;;  %4606 = vst.msk [vmem:[%s8863_s5 + $0x10] sm:$0xff] %vm4059_vm4, %v4542_v27 }
 0x3ee   :  { %4607 = vst.msk [vmem:[%s8863_s5 + $0x18] sm:$0xff] %vm4059_vm4, %v4543_v43  ;;  %v4552_v46 = vadd.f32 %v8456_v59, %v8265_v44  ;;  %v4553_v57 = vadd.f32 %v8456_v59, %v8269_v9  ;;  %v4554_v37 = vadd.f32 %v8456_v59, %v8273_v7  ;;  %v4555_v35 = vadd.f32 %v8456_v59, %v8277_v49 }
 0x3ef   :  { %4608 = vst.msk [vmem:[%s8863_s5 + $0x20] sm:$0xff] %vm4059_vm4, %v4544_v53  ;;  %4609 = vst.msk [vmem:[%s8863_s5 + $0x28] sm:$0xff] %vm4059_vm4, %v4545_v56  ;;  %v4556_v6 = vadd.f32 %v8456_v59, %v8281_v25  ;;  %v4557_v60 = vadd.f32 %v8456_v59, %v8285_v0  ;;  %v4558_v47 = vadd.f32 %v8456_v59, %v8289_v18  ;;  %v8982_v19 = vld [vmem:[#allocation6_spill] sm:$0xff] }
 0x3f0   :  { %4610 = vst.msk [vmem:[%s8863_s5 + $0x30] sm:$0xff] %vm4059_vm4, %v4546_v40  ;;  %4611 = vst.msk [vmem:[%s8863_s5 + $0x38] sm:$0xff] %vm4059_vm4, %v4547_v23  ;;  %v4559_v44 = vadd.f32 %v8456_v59, %v8293_v32  ;;  %v4560_v9 = vadd.f32 %v8456_v59, %v8297_v42  ;;  %v4561_v7 = vadd.f32 %v8456_v59, %v8301_v50  ;;  %v8983_v43 = vld [vmem:[#allocation5_spill] sm:$0xff] }
 0x3f1   :  { %4612 = vst.msk [vmem:[%s8863_s5 + $0x40] sm:$0xff] %vm4059_vm4, %v4548_v63  ;;  %4613 = vst.msk [vmem:[%s8863_s5 + $0x48] sm:$0xff] %vm4059_vm4, %v4549_v11  ;;  %v4562_v49 = vadd.f32 %v8456_v59, %v8305_v54  ;;  %v4563_v25 = vadd.f32 %v8456_v59, %v8309_v45  ;;  %v4564_v0 = vadd.f32 %v8456_v59, %v8313_v52  ;;  %v8985_v40 = vld [vmem:[#allocation7_spill] sm:$0xff]  ;;  %v8986_v63 = vld [vmem:[#allocation10_spill] sm:$0xff] }
 0x3f2   :  { %4614 = vst.msk [vmem:[%s8863_s5 + $0x50] sm:$0xff] %vm4059_vm4, %v4550_v33  ;;  %4615 = vst.msk [vmem:[%s8863_s5 + $0x58] sm:$0xff] %vm4059_vm4, %v4551_v3  ;;  %v4565_v18 = vadd.f32 %v8456_v59, %v8317_v34  ;;  %v4566_v32 = vadd.f32 %v8456_v59, %v8321_v48  ;;  %v4567_v42 = vadd.f32 %v8456_v59, %v8325_v38 }
 0x3f3   :  { %4616 = vst.msk [vmem:[%s8863_s5 + $0x60] sm:$0xff] %vm4059_vm4, %v4552_v46  ;;  %4617 = vst.msk [vmem:[%s8863_s5 + $0x68] sm:$0xff] %vm4059_vm4, %v4553_v57  ;;  %v4568_v50 = vadd.f32 %v8456_v59, %v8329_v29  ;;  %v4569_v54 = vadd.f32 %v8456_v59, %v8333_v31  ;;  %v4570_v45 = vadd.f32 %v8456_v59, %v8337_v58 }
 0x3f4   :  { %4618 = vst.msk [vmem:[%s8863_s5 + $0x70] sm:$0xff] %vm4059_vm4, %v4554_v37  ;;  %4619 = vst.msk [vmem:[%s8863_s5 + $0x78] sm:$0xff] %vm4059_vm4, %v4555_v35  ;;  %v4571_v52 = vadd.f32 %v8456_v59, %v8341_v2  ;;  %v4572_v34 = vadd.f32 %v8456_v59, %v8345_v55  ;;  %v4573_v48 = vadd.f32 %v8456_v59, %v8349_v22 }
 0x3f5   :  { %4620 = vst.msk [vmem:[%s8863_s5 + $0x80] sm:$0xff] %vm4059_vm4, %v4556_v6  ;;  %4621 = vst.msk [vmem:[%s8863_s5 + $0x88] sm:$0xff] %vm4059_vm4, %v4557_v60  ;;  %v4574_v38 = vadd.f32 %v8456_v59, %v8353_v1  ;;  %v4575_v29 = vadd.f32 %v8456_v59, %v8357_v16  ;;  %v4576_v31 = vadd.f32 %v8456_v59, %v8361_v61 }
 0x3f6   :  { %4622 = vst.msk [vmem:[%s8863_s5 + $0x90] sm:$0xff] %vm4059_vm4, %v4558_v47  ;;  %4623 = vst.msk [vmem:[%s8863_s5 + $0x98] sm:$0xff] %vm4059_vm4, %v4559_v44  ;;  %v4577_v58 = vadd.f32 %v8456_v59, %v8365_v8  ;;  %v4578_v2 = vadd.f32 %v8456_v59, %v8369_v36  ;;  %v4579_v55 = vadd.f32 %v8456_v59, %v8373_v39 }
 0x3f7   :  { %4624 = vst.msk [vmem:[%s8863_s5 + $0xa0] sm:$0xff] %vm4059_vm4, %v4560_v9  ;;  %4625 = vst.msk [vmem:[%s8863_s5 + $0xa8] sm:$0xff] %vm4059_vm4, %v4561_v7  ;;  %v4580_v22 = vadd.f32 %v8456_v59, %v8377_v15  ;;  %v4581_v1 = vadd.f32 %v8456_v59, %v8381_v41  ;;  %v4582_v16 = vadd.f32 %v8456_v59, %v8385_v12  ;;  %v8978_v12 = vld [vmem:[#allocation21_spill] sm:$0xff] }
 0x3f8   :  { %4626 = vst.msk [vmem:[%s8863_s5 + $0xb0] sm:$0xff] %vm4059_vm4, %v4562_v49  ;;  %4627 = vst.msk [vmem:[%s8863_s5 + $0xb8] sm:$0xff] %vm4059_vm4, %v4563_v25  ;;  %v4583_v61 = vadd.f32 %v8456_v59, %v8389_v14  ;;  %v4584_v8 = vadd.f32 %v8456_v59, %v8393_v4  ;;  %v4585_v36 = vadd.f32 %v8456_v59, %v8397_v5  ;;  %v8979_v4 = vld [vmem:[#allocation2_spill] sm:$0xff] }
 0x3f9   :  { %4628 = vst.msk [vmem:[%s8863_s5 + $0xc0] sm:$0xff] %vm4059_vm4, %v4564_v0  ;;  %4629 = vst.msk [vmem:[%s8863_s5 + $0xc8] sm:$0xff] %vm4059_vm4, %v4565_v18  ;;  %v4586_v39 = vadd.f32 %v8456_v59, %v8401_v17  ;;  %v4587_v15 = vadd.f32 %v8456_v59, %v8405_v24  ;;  %v4588_v41 = vadd.f32 %v8456_v59, %v8409_v62  ;;  %v8980_v17 = vld [vmem:[#allocation4_spill] sm:$0xff]  ;;  %v8981_v62 = vld [vmem:[#allocation3_spill] sm:$0xff] }
 0x3fa   :  { %4630 = vst.msk [vmem:[%s8863_s5 + $0xd0] sm:$0xff] %vm4059_vm4, %v4566_v32  ;;  %4631 = vst.msk [vmem:[%s8863_s5 + $0xd8] sm:$0xff] %vm4059_vm4, %v4567_v42  ;;  %v4589_v14 = vadd.f32 %v8456_v59, %v8978_v12  ;;  %v4590_v5 = vadd.f32 %v8456_v59, %v8979_v4  ;;  %v4591_v24 = vadd.f32 %v8456_v59, %v8980_v17 }
 0x3fb   :  { %4632 = vst.msk [vmem:[%s8863_s5 + $0xe0] sm:$0xff] %vm4059_vm4, %v4568_v50  ;;  %4633 = vst.msk [vmem:[%s8863_s5 + $0xe8] sm:$0xff] %vm4059_vm4, %v4569_v54  ;;  %v4592_v13 = vadd.f32 %v8456_v59, %v8981_v62  ;;  %v4593_v21 = vadd.f32 %v8456_v59, %v8429_v28  ;;  %v4594_v27 = vadd.f32 %v8456_v59, %v8982_v19  ;;  %v8984_v28 = vld [vmem:[#allocation8_spill] sm:$0xff] }
 0x3fc   :  { %4634 = vst.msk [vmem:[%s8863_s5 + $0xf0] sm:$0xff] %vm4059_vm4, %v4570_v45  ;;  %4635 = vst.msk [vmem:[%s8863_s5 + $0xf8] sm:$0xff] %vm4059_vm4, %v4571_v52  ;;  %v4595_v53 = vadd.f32 %v8456_v59, %v8983_v43  ;;  %v4596_v56 = vadd.f32 %v8456_v59, %v8984_v28  ;;  %v4597_v23 = vadd.f32 %v8456_v59, %v8985_v40 }
 0x3fd   :  { %4636 = vst.msk [vmem:[%s8863_s5 + $0x100] sm:$0xff] %vm4059_vm4, %v4572_v34  ;;  %4637 = vst.msk [vmem:[%s8863_s5 + $0x108] sm:$0xff] %vm4059_vm4, %v4573_v48  ;;  %v4598_v11 = vadd.f32 %v8456_v59, %v8986_v63  ;;  %v4599_v33 = vadd.f32 %v8456_v59, %v8453_v30  ;;  %v4600_v30 = vadd.f32 %v8456_v59, %v8460_v51 }
 0x3fe   :  { %4638 = vst.msk [vmem:[%s8863_s5 + $0x110] sm:$0xff] %vm4059_vm4, %v4574_v38  ;;  %4639 = vst.msk [vmem:[%s8863_s5 + $0x118] sm:$0xff] %vm4059_vm4, %v4575_v29  ;;  %v4601_v3 = vadd.f32 %v8456_v59, %v8464_v26  ;;  %v4602_v46 = vadd.f32 %v8456_v59, %v8468_v10  ;;  %v4603_v57 = vadd.f32 %v8456_v59, %v8472_v20 }
 0x3ff   :  { %4640 = vst.msk [vmem:[%s8863_s5 + $0x120] sm:$0xff] %vm4059_vm4, %v4576_v31  ;;  %4641 = vst.msk [vmem:[%s8863_s5 + $0x128] sm:$0xff] %vm4059_vm4, %v4577_v58 }
 0x400   :  { %4642 = vst.msk [vmem:[%s8863_s5 + $0x130] sm:$0xff] %vm4059_vm4, %v4578_v2  ;;  %4643 = vst.msk [vmem:[%s8863_s5 + $0x138] sm:$0xff] %vm4059_vm4, %v4579_v55 }
 0x401   :  { %4644 = vst.msk [vmem:[%s8863_s5 + $0x140] sm:$0xff] %vm4059_vm4, %v4580_v22  ;;  %4645 = vst.msk [vmem:[%s8863_s5 + $0x148] sm:$0xff] %vm4059_vm4, %v4581_v1 }
 0x402   :  { %4646 = vst.msk [vmem:[%s8863_s5 + $0x150] sm:$0xff] %vm4059_vm4, %v4582_v16  ;;  %4647 = vst.msk [vmem:[%s8863_s5 + $0x158] sm:$0xff] %vm4059_vm4, %v4583_v61 }
 0x403   :  { %4648 = vst.msk [vmem:[%s8863_s5 + $0x160] sm:$0xff] %vm4059_vm4, %v4584_v8  ;;  %4649 = vst.msk [vmem:[%s8863_s5 + $0x168] sm:$0xff] %vm4059_vm4, %v4585_v36 }
 0x404   :  { %4650 = vst.msk [vmem:[%s8863_s5 + $0x170] sm:$0xff] %vm4059_vm4, %v4586_v39  ;;  %4651 = vst.msk [vmem:[%s8863_s5 + $0x178] sm:$0xff] %vm4059_vm4, %v4587_v15 }
 0x405   :  { %4652 = vst.msk [vmem:[%s8863_s5 + $0x180] sm:$0xff] %vm4059_vm4, %v4588_v41  ;;  %4653 = vst.msk [vmem:[%s8863_s5 + $0x188] sm:$0xff] %vm4059_vm4, %v4589_v14 }
 0x406   :  { %4654 = vst.msk [vmem:[%s8863_s5 + $0x190] sm:$0xff] %vm4059_vm4, %v4590_v5  ;;  %4655 = vst.msk [vmem:[%s8863_s5 + $0x198] sm:$0xff] %vm4059_vm4, %v4591_v24 }
 0x407   :  { %4656 = vst.msk [vmem:[%s8863_s5 + $0x1a0] sm:$0xff] %vm4059_vm4, %v4592_v13  ;;  %4657 = vst.msk [vmem:[%s8863_s5 + $0x1a8] sm:$0xff] %vm4059_vm4, %v4593_v21 }
 0x408   :  { %4658 = vst.msk [vmem:[%s8863_s5 + $0x1b0] sm:$0xff] %vm4059_vm4, %v4594_v27  ;;  %4659 = vst.msk [vmem:[%s8863_s5 + $0x1b8] sm:$0xff] %vm4059_vm4, %v4595_v53 }
 0x409   :  { %4660 = vst.msk [vmem:[%s8863_s5 + $0x1c0] sm:$0xff] %vm4059_vm4, %v4596_v56  ;;  %4661 = vst.msk [vmem:[%s8863_s5 + $0x1c8] sm:$0xff] %vm4059_vm4, %v4597_v23 }
 0x40a   :  { %4662 = vst.msk [vmem:[%s8863_s5 + $0x1d0] sm:$0xff] %vm4059_vm4, %v4598_v11  ;;  %4663 = vst.msk [vmem:[%s8863_s5 + $0x1d8] sm:$0xff] %vm4059_vm4, %v4599_v33 }
 0x40b   :  { %4664 = vst.msk [vmem:[%s8863_s5 + $0x1e0] sm:$0xff] %vm4059_vm4, %v4600_v30  ;;  %4665 = vst.msk [vmem:[%s8863_s5 + $0x1e8] sm:$0xff] %vm4059_vm4, %v4601_v3 }
 0x40c   :  { %4666 = vst.msk [vmem:[%s8863_s5 + $0x1f0] sm:$0xff] %vm4059_vm4, %v4602_v46  ;;  %4667 = vst.msk [vmem:[%s8863_s5 + $0x1f8] sm:$0xff] %vm4059_vm4, %v4603_v57 }

</bundles_post_ra>
